<compile_context>
chip_gen: v7x
topology: tpu7x:2x2x1
jax: 0.10.0
libtpu: 0.0.40
codegen_flags: <defaults>
</compile_context>

<pallas_src>
import jax
import jax.numpy as jnp
from jax import lax
from jax.experimental import pallas as pl
from jax.experimental.pallas import tpu as pltpu

K_SIZE = 4  # all ConvTranspose kernels are 4x4
BN_EPS = 1e-5


# ----------------------------------------------------------------------------
# Pallas kernels: matmul (+ fused ReLU -> per-column affine epilogue)
# ----------------------------------------------------------------------------
def _matmul_relu_bn_kernel(a_ref, b_ref, scale_ref, shift_ref, o_ref):
    acc = jnp.dot(a_ref[...], b_ref[...], preferred_element_type=jnp.float32)
    acc = jnp.maximum(acc, 0.0)                       # ReLU(True)
    acc = acc * scale_ref[...] + shift_ref[...]       # eval-mode BatchNorm (folded)
    o_ref[...] = acc.astype(o_ref.dtype)


def _matmul_kernel(a_ref, b_ref, o_ref):
    acc = jnp.dot(a_ref[...], b_ref[...], preferred_element_type=jnp.float32)
    o_ref[...] = acc.astype(o_ref.dtype)


def fused_matmul(a, b, scale=None, shift=None):
    """out = epilogue(a @ b). a: (M,K), b: (K,N); bf16 on the MXU, f32 accum.
    scale/shift: (N,) or None (no ReLU/BN epilogue)."""
    M, K = a.shape
    K2, N = b.shape
    assert K == K2
    a = a.astype(jnp.bfloat16)
    b = b.astype(jnp.bfloat16)

    # Large tiles, but give every layer a 2-step parallel grid so a megacore
    # part (v7x) has something to shard; single-TC parts just loop twice.
    if N >= 256 and (N // 2) % 128 == 0:
        tn = N // 2
    else:
        tn = N
    if tn == N and M >= 512 and (M // 2) % 8 == 0:
        tm = M // 2
    else:
        tm = M
    grid = (M // tm, N // tn)

    a_spec = pl.BlockSpec((tm, K), lambda i, j: (i, 0))
    b_spec = pl.BlockSpec((K, tn), lambda i, j: (0, j))
    o_spec = pl.BlockSpec((tm, tn), lambda i, j: (i, j))
    cparams = pltpu.CompilerParams(dimension_semantics=("parallel", "parallel"))
    out_shape = jax.ShapeDtypeStruct((M, N), jnp.float32)

    if scale is None:  # last layer: no epilogue, no scale/shift DMAs
        return pl.pallas_call(
            _matmul_kernel,
            out_shape=out_shape,
            grid=grid,
            in_specs=[a_spec, b_spec],
            out_specs=o_spec,
            compiler_params=cparams,
        )(a, b)

    s_spec = pl.BlockSpec((1, tn), lambda i, j: (0, j))
    scale2 = scale.reshape(1, N).astype(jnp.float32)
    shift2 = shift.reshape(1, N).astype(jnp.float32)
    return pl.pallas_call(
        _matmul_relu_bn_kernel,
        out_shape=out_shape,
        grid=grid,
        in_specs=[a_spec, b_spec, s_spec, s_spec],
        out_specs=o_spec,
        compiler_params=cparams,
    )(a, b, scale2, shift2)


# ----------------------------------------------------------------------------
# Weight packing / BN folding (done once, outside the forward pass)
# ----------------------------------------------------------------------------
def bn_fold(gamma, beta, mean, var, eps=BN_EPS):
    scale = gamma / jnp.sqrt(var + eps)
    shift = beta - mean * scale
    return scale, shift


def make_parity_weight(w):
    """Pack a ConvTranspose2d(k=4,s=2,p=1) weight (Cin,Cout,4,4) into a
    (9*Cin, 4*Cout) matrix for the sub-pixel decomposition.
    Rows ordered (dy,dx,ci) over the 3x3 padded-input neighborhood of each
    output 2x2 block; columns ordered (py,px,co) over the 4 output parities.
    Mapping: output y[2m+py, 2n+px] uses kernel tap (ky,kx)=(3+py-2dy, 3+px-2dx)
    against padded input xp[m+dy, n+dx] whenever the tap index is in range."""
    Cin, Cout = w.shape[0], w.shape[1]
    zero = jnp.zeros((Cin, Cout), w.dtype)
    rows = []
    for dy in range(3):
        for dx in range(3):
            cols = []
            for py in range(2):
                for px in range(2):
                    ky = 3 + py - 2 * dy
                    kx = 3 + px - 2 * dx
                    if 0 <= ky < K_SIZE and 0 <= kx < K_SIZE:
                        cols.append(w[:, :, ky, kx])
                    else:
                        cols.append(zero)
            rows.append(jnp.concatenate(cols, axis=1))      # (Cin, 4*Cout)
    return jnp.concatenate(rows, axis=0)                    # (9*Cin, 4*Cout)


def prepare_params(params):
    """Fold BN into per-column affines, pack weights as bf16 matmul operands."""
    latent = params["w1"].shape[0]
    c1 = params["w1"].shape[1]
    # layer 1: ConvT(k=4,s=1,p=0) on a 1x1 input == matmul; columns (ky,kx,co).
    w1_mat = jnp.transpose(params["w1"], (0, 2, 3, 1)).reshape(latent, 16 * c1)
    w1_mat = jnp.pad(w1_mat, ((0, 128 - latent), (0, 0)))   # pad K 100 -> 128

    s1, sh1 = bn_fold(*params["bn1"])
    s2, sh2 = bn_fold(*params["bn2"])
    s3, sh3 = bn_fold(*params["bn3"])

    return {
        "w1_mat": w1_mat.astype(jnp.bfloat16),
        "w2_mat": make_parity_weight(params["w2"]).astype(jnp.bfloat16),
        "w3_mat": make_parity_weight(params["w3"]).astype(jnp.bfloat16),
        "w4_mat": make_parity_weight(params["w4"]).astype(jnp.bfloat16),
        "s1": jnp.tile(s1, 16), "sh1": jnp.tile(sh1, 16),
        "s2": jnp.tile(s2, 4), "sh2": jnp.tile(sh2, 4),
        "s3": jnp.tile(s3, 4), "sh3": jnp.tile(sh3, 4),
    }


# ----------------------------------------------------------------------------
# Layer wrappers (small JAX glue around the Pallas matmuls)
# ----------------------------------------------------------------------------
def _patches_3x3(x_nhwc):
    """3x3 padded-neighborhood im2col: (B,H,W,C) -> (B*H*W, 9*C), no zero rows."""
    B, H, W, C = x_nhwc.shape
    xp = jnp.pad(x_nhwc, ((0, 0), (1, 1), (1, 1), (0, 0)))
    taps = [xp[:, dy:dy + H, dx:dx + W, :] for dy in range(3) for dx in range(3)]
    return jnp.concatenate(taps, axis=-1).reshape(B * H * W, 9 * C)


def _pixel_shuffle(y_flat, B, H, W, Cout):
    """(B*H*W, 4*Cout) with columns (py,px,co) -> NHWC (B, 2H, 2W, Cout)."""
    y = y_flat.reshape(B, H, W, 2, 2, Cout)
    y = jnp.transpose(y, (0, 1, 3, 2, 4, 5))
    return y.reshape(B, 2 * H, 2 * W, Cout)


def deconv_s2p1(x_nhwc, w_mat, scale=None, shift=None):
    """ConvTranspose2d(kernel=4, stride=2, padding=1, bias=False) via the
    sub-pixel decomposition + one fused Pallas matmul. Returns NHWC (B,2H,2W,Cout)."""
    B, H, W, _ = x_nhwc.shape
    Cout = w_mat.shape[1] // 4
    a = _patches_3x3(x_nhwc)
    y = fused_matmul(a, w_mat, scale, shift)
    return _pixel_shuffle(y, B, H, W, Cout)


def position_gan_forward(prep, noise_nchw):
    """Forward pass of PositionGanConditional. noise: (B, 100, 1, 1) NCHW.
    Returns logits (B, 4, 32, 32) NCHW (matches the PyTorch module)."""
    B = noise_nchw.shape[0]
    c1 = prep["w1_mat"].shape[1] // 16
    z = noise_nchw.reshape(B, -1)
    z = jnp.pad(z, ((0, 0), (0, 128 - z.shape[1])))               # K 100 -> 128

    x = fused_matmul(z, prep["w1_mat"], prep["s1"], prep["sh1"])  # (B, 4096)
    x = x.reshape(B, K_SIZE, K_SIZE, c1)                          # (B, 4, 4, 256)
    x = deconv_s2p1(x, prep["w2_mat"], prep["s2"], prep["sh2"])   # (B, 8, 8, 128)
    x = deconv_s2p1(x, prep["w3_mat"], prep["s3"], prep["sh3"])   # (B,16,16,  64)
    x = deconv_s2p1(x, prep["w4_mat"])                            # (B,32,32,   4)
    return jnp.transpose(x, (0, 3, 1, 2))                         # NCHW


# ----------------------------------------------------------------------------
# Pure-JAX reference (lax conv) for verification
# ----------------------------------------------------------------------------
def reference_forward(params, noise_nchw):
    def convT(x, w, stride, pad):
        K = w.shape[2]
        w_hwio = jnp.transpose(w[:, :, ::-1, ::-1], (2, 3, 0, 1))
        x_nhwc = jnp.transpose(x, (0, 2, 3, 1))
        q = K - 1 - pad
        y = lax.conv_general_dilated(
            x_nhwc, w_hwio, window_strides=(1, 1),
            padding=[(q, q), (q, q)], lhs_dilation=(stride, stride),
            dimension_numbers=("NHWC", "HWIO", "NHWC"))
        return jnp.transpose(y, (0, 3, 1, 2))

    def bn(x, gamma, beta, mean, var, eps=BN_EPS):
        g = gamma[None, :, None, None]
        b = beta[None, :, None, None]
        m = mean[None, :, None, None]
        v = var[None, :, None, None]
        return (x - m) / jnp.sqrt(v + eps) * g + b

    x = convT(noise_nchw, params["w1"], 1, 0)
    x = bn(jnp.maximum(x, 0.0), *params["bn1"])
    x = convT(x, params["w2"], 2, 1)
    x = bn(jnp.maximum(x, 0.0), *params["bn2"])
    x = convT(x, params["w3"], 2, 1)
    x = bn(jnp.maximum(x, 0.0), *params["bn3"])
    x = convT(x, params["w4"], 2, 1)
    return x


# ----------------------------------------------------------------------------
# Deterministic parameter init (synthetic weights; no checkpoint loading)
# ----------------------------------------------------------------------------
def init_params(key):
    latent_dim = 100
    f = 32
    n_classes = 4
    ks = jax.random.split(key, 20)

    def w(k, cin, cout):
        return 0.02 * jax.random.normal(k, (cin, cout, K_SIZE, K_SIZE), jnp.float32)

    def bn(k, c):
        k0, k1, k2, k3 = jax.random.split(k, 4)
        gamma = 1.0 + 0.1 * jax.random.normal(k0, (c,), jnp.float32)
        beta = 0.1 * jax.random.normal(k1, (c,), jnp.float32)
        mean = 0.1 * jax.random.normal(k2, (c,), jnp.float32)
        var = jax.random.uniform(k3, (c,), jnp.float32, 0.5, 1.5)
        return (gamma, beta, mean, var)

    return {
        "w1": w(ks[0], latent_dim, f * 8),
        "bn1": bn(ks[1], f * 8),
        "w2": w(ks[2], f * 8, f * 4),
        "bn2": bn(ks[3], f * 4),
        "w3": w(ks[4], f * 4, f * 2),
        "bn3": bn(ks[5], f * 2),
        "w4": w(ks[6], f * 2, n_classes),
    }


if __name__ == "__main__":
    key = jax.random.PRNGKey(0)
    k_param, k_noise = jax.random.split(key)

    params = init_params(k_param)
    prep = prepare_params(params)

    batch = 2
    noise = jax.random.normal(k_noise, (batch, 100, 1, 1), jnp.float32)

    fwd = jax.jit(position_gan_forward)
    out = jax.block_until_ready(fwd(prep, noise))
    assert out.shape == (batch, 4, 32, 32), out.shape

    ref = jax.block_until_ready(reference_forward(params, noise))
    max_err = float(jnp.max(jnp.abs(out - ref)))
    # bf16 MXU inputs with f32 accumulation: allow ~1e-2 level absolute error.
    if max_err > 2e-2:
        raise AssertionError(f"Pallas output mismatch vs reference: max_err={max_err}")

    print("KERNEL_OK")
</pallas_src>

<mosaic_0001>
module attributes {stable_mosaic.version = 11 : i64} {
  func.func @_matmul_relu_bn_kernel(%arg0: i32, %arg1: i32, %arg2: memref<2x128xbf16, #tpu.memory_space<vmem>>, %arg3: memref<128x2048xbf16, #tpu.memory_space<vmem>>, %arg4: memref<1x2048xf32, #tpu.memory_space<vmem>>, %arg5: memref<1x2048xf32, #tpu.memory_space<vmem>>, %arg6: memref<2x2048xf32, #tpu.memory_space<vmem>>) attributes {dimension_semantics = [#tpu.dimension_semantics<parallel>, #tpu.dimension_semantics<parallel>], iteration_bounds = array<i64: 1, 2>, scalar_prefetch = 0 : i64, scratch_operands = 0 : i64, tpu.core_type = #tpu.core_type<tc>, window_params = [{transform_indices = @transform_0, window_bounds = array<i64: 2, 128>}, {transform_indices = @transform_1, window_bounds = array<i64: 128, 2048>}, {transform_indices = @transform_2, window_bounds = array<i64: 1, 2048>}, {transform_indices = @transform_3, window_bounds = array<i64: 1, 2048>}, {transform_indices = @transform_4, window_bounds = array<i64: 2, 2048>}]} {
    %c0 = arith.constant 0 : index
    %c0_0 = arith.constant 0 : index
    %0 = vector.load %arg2[%c0, %c0_0] : memref<2x128xbf16, #tpu.memory_space<vmem>>, vector<2x128xbf16>
    %c0_1 = arith.constant 0 : index
    %c0_2 = arith.constant 0 : index
    %1 = vector.load %arg3[%c0_1, %c0_2] : memref<128x2048xbf16, #tpu.memory_space<vmem>>, vector<128x2048xbf16>
    %cst = arith.constant dense<0.000000e+00> : vector<2x2048xf32>
    %2 = tpu.matmul %0, %1, %cst {dimension_numbers = #tpu.dot_dimension_numbers<[1], [0], [0], [1], [0, 0, 1, 1], [], []>} : vector<2x128xbf16>, vector<128x2048xbf16>, vector<2x2048xf32> -> vector<2x2048xf32>
    %cst_3 = arith.constant 0.000000e+00 : f32
    %3 = vector.broadcast %cst_3 : f32 to vector<2x2048xf32>
    %4 = arith.maximumf %2, %3 : vector<2x2048xf32>
    %c0_4 = arith.constant 0 : index
    %c0_5 = arith.constant 0 : index
    %5 = vector.load %arg4[%c0_4, %c0_5] : memref<1x2048xf32, #tpu.memory_space<vmem>>, vector<1x2048xf32>
    %6 = vector.broadcast %5 : vector<1x2048xf32> to vector<2x2048xf32>
    %7 = arith.mulf %4, %6 : vector<2x2048xf32>
    %c0_6 = arith.constant 0 : index
    %c0_7 = arith.constant 0 : index
    %8 = vector.load %arg5[%c0_6, %c0_7] : memref<1x2048xf32, #tpu.memory_space<vmem>>, vector<1x2048xf32>
    %9 = vector.broadcast %8 : vector<1x2048xf32> to vector<2x2048xf32>
    %10 = arith.addf %7, %9 : vector<2x2048xf32>
    %c0_8 = arith.constant 0 : index
    %c0_9 = arith.constant 0 : index
    %11 = vector.load %arg6[%c0_8, %c0_9] : memref<2x2048xf32, #tpu.memory_space<vmem>>, vector<2x2048xf32>
    tpu.vector_store %arg6[%c0_8, %c0_9], %10 {strides = array<i32>} : memref<2x2048xf32, #tpu.memory_space<vmem>>, vector<2x2048xf32>,
    return
  }
  func.func @transform_0(%arg0: i32, %arg1: i32) -> (i32, i32) {
    %c0_i32 = arith.constant 0 : i32
    %c0_i32_0 = arith.constant 0 : i32
    return %arg0, %c0_i32 : i32, i32
  }
  func.func @transform_1(%arg0: i32, %arg1: i32) -> (i32, i32) {
    %c0_i32 = arith.constant 0 : i32
    %c0_i32_0 = arith.constant 0 : i32
    return %c0_i32, %arg1 : i32, i32
  }
  func.func @transform_2(%arg0: i32, %arg1: i32) -> (i32, i32) {
    %c0_i32 = arith.constant 0 : i32
    %c0_i32_0 = arith.constant 0 : i32
    return %c0_i32, %arg1 : i32, i32
  }
  func.func @transform_3(%arg0: i32, %arg1: i32) -> (i32, i32) {
    %c0_i32 = arith.constant 0 : i32
    %c0_i32_0 = arith.constant 0 : i32
    return %c0_i32, %arg1 : i32, i32
  }
  func.func @transform_4(%arg0: i32, %arg1: i32) -> (i32, i32) {
    %c0_i32 = arith.constant 0 : i32
    return %arg0, %arg1 : i32, i32
  }
}

module attributes {stable_mosaic.version = 11 : i64} {
  func.func @_matmul_relu_bn_kernel(%arg0: i32, %arg1: i32, %arg2: memref<32x2304xbf16, #tpu.memory_space<vmem>>, %arg3: memref<2304x256xbf16, #tpu.memory_space<vmem>>, %arg4: memref<1x256xf32, #tpu.memory_space<vmem>>, %arg5: memref<1x256xf32, #tpu.memory_space<vmem>>, %arg6: memref<32x256xf32, #tpu.memory_space<vmem>>) attributes {dimension_semantics = [#tpu.dimension_semantics<parallel>, #tpu.dimension_semantics<parallel>], iteration_bounds = array<i64: 1, 2>, scalar_prefetch = 0 : i64, scratch_operands = 0 : i64, tpu.core_type = #tpu.core_type<tc>, window_params = [{transform_indices = @transform_0, window_bounds = array<i64: 32, 2304>}, {transform_indices = @transform_1, window_bounds = array<i64: 2304, 256>}, {transform_indices = @transform_2, window_bounds = array<i64: 1, 256>}, {transform_indices = @transform_3, window_bounds = array<i64: 1, 256>}, {transform_indices = @transform_4, window_bounds = array<i64: 32, 256>}]} {
    %c0 = arith.constant 0 : index
    %c0_0 = arith.constant 0 : index
    %0 = vector.load %arg2[%c0, %c0_0] : memref<32x2304xbf16, #tpu.memory_space<vmem>>, vector<32x2304xbf16>
    %c0_1 = arith.constant 0 : index
    %c0_2 = arith.constant 0 : index
    %1 = vector.load %arg3[%c0_1, %c0_2] : memref<2304x256xbf16, #tpu.memory_space<vmem>>, vector<2304x256xbf16>
    %cst = arith.constant dense<0.000000e+00> : vector<32x256xf32>
    %2 = tpu.matmul %0, %1, %cst {dimension_numbers = #tpu.dot_dimension_numbers<[1], [0], [0], [1], [0, 0, 1, 1], [], []>} : vector<32x2304xbf16>, vector<2304x256xbf16>, vector<32x256xf32> -> vector<32x256xf32>
    %cst_3 = arith.constant 0.000000e+00 : f32
    %3 = vector.broadcast %cst_3 : f32 to vector<32x256xf32>
    %4 = arith.maximumf %2, %3 : vector<32x256xf32>
    %c0_4 = arith.constant 0 : index
    %c0_5 = arith.constant 0 : index
    %5 = vector.load %arg4[%c0_4, %c0_5] : memref<1x256xf32, #tpu.memory_space<vmem>>, vector<1x256xf32>
    %6 = vector.broadcast %5 : vector<1x256xf32> to vector<32x256xf32>
    %7 = arith.mulf %4, %6 : vector<32x256xf32>
    %c0_6 = arith.constant 0 : index
    %c0_7 = arith.constant 0 : index
    %8 = vector.load %arg5[%c0_6, %c0_7] : memref<1x256xf32, #tpu.memory_space<vmem>>, vector<1x256xf32>
    %9 = vector.broadcast %8 : vector<1x256xf32> to vector<32x256xf32>
    %10 = arith.addf %7, %9 : vector<32x256xf32>
    %c0_8 = arith.constant 0 : index
    %c0_9 = arith.constant 0 : index
    %11 = vector.load %arg6[%c0_8, %c0_9] : memref<32x256xf32, #tpu.memory_space<vmem>>, vector<32x256xf32>
    tpu.vector_store %arg6[%c0_8, %c0_9], %10 {strides = array<i32>} : memref<32x256xf32, #tpu.memory_space<vmem>>, vector<32x256xf32>,
    return
  }
  func.func @transform_0(%arg0: i32, %arg1: i32) -> (i32, i32) {
    %c0_i32 = arith.constant 0 : i32
    %c0_i32_0 = arith.constant 0 : i32
    return %arg0, %c0_i32 : i32, i32
  }
  func.func @transform_1(%arg0: i32, %arg1: i32) -> (i32, i32) {
    %c0_i32 = arith.constant 0 : i32
    %c0_i32_0 = arith.constant 0 : i32
    return %c0_i32, %arg1 : i32, i32
  }
  func.func @transform_2(%arg0: i32, %arg1: i32) -> (i32, i32) {
    %c0_i32 = arith.constant 0 : i32
    %c0_i32_0 = arith.constant 0 : i32
    return %c0_i32, %arg1 : i32, i32
  }
  func.func @transform_3(%arg0: i32, %arg1: i32) -> (i32, i32) {
    %c0_i32 = arith.constant 0 : i32
    %c0_i32_0 = arith.constant 0 : i32
    return %c0_i32, %arg1 : i32, i32
  }
  func.func @transform_4(%arg0: i32, %arg1: i32) -> (i32, i32) {
    %c0_i32 = arith.constant 0 : i32
    return %arg0, %arg1 : i32, i32
  }
}

module attributes {stable_mosaic.version = 11 : i64} {
  func.func @_matmul_relu_bn_kernel(%arg0: i32, %arg1: i32, %arg2: memref<128x1152xbf16, #tpu.memory_space<vmem>>, %arg3: memref<1152x128xbf16, #tpu.memory_space<vmem>>, %arg4: memref<1x128xf32, #tpu.memory_space<vmem>>, %arg5: memref<1x128xf32, #tpu.memory_space<vmem>>, %arg6: memref<128x128xf32, #tpu.memory_space<vmem>>) attributes {dimension_semantics = [#tpu.dimension_semantics<parallel>, #tpu.dimension_semantics<parallel>], iteration_bounds = array<i64: 1, 2>, scalar_prefetch = 0 : i64, scratch_operands = 0 : i64, tpu.core_type = #tpu.core_type<tc>, window_params = [{transform_indices = @transform_0, window_bounds = array<i64: 128, 1152>}, {transform_indices = @transform_1, window_bounds = array<i64: 1152, 128>}, {transform_indices = @transform_2, window_bounds = array<i64: 1, 128>}, {transform_indices = @transform_3, window_bounds = array<i64: 1, 128>}, {transform_indices = @transform_4, window_bounds = array<i64: 128, 128>}]} {
    %c0 = arith.constant 0 : index
    %c0_0 = arith.constant 0 : index
    %0 = vector.load %arg2[%c0, %c0_0] : memref<128x1152xbf16, #tpu.memory_space<vmem>>, vector<128x1152xbf16>
    %c0_1 = arith.constant 0 : index
    %c0_2 = arith.constant 0 : index
    %1 = vector.load %arg3[%c0_1, %c0_2] : memref<1152x128xbf16, #tpu.memory_space<vmem>>, vector<1152x128xbf16>
    %cst = arith.constant dense<0.000000e+00> : vector<128x128xf32>
    %2 = tpu.matmul %0, %1, %cst {dimension_numbers = #tpu.dot_dimension_numbers<[1], [0], [0], [1], [0, 0, 1, 1], [], []>} : vector<128x1152xbf16>, vector<1152x128xbf16>, vector<128x128xf32> -> vector<128x128xf32>
    %cst_3 = arith.constant 0.000000e+00 : f32
    %3 = vector.broadcast %cst_3 : f32 to vector<128x128xf32>
    %4 = arith.maximumf %2, %3 : vector<128x128xf32>
    %c0_4 = arith.constant 0 : index
    %c0_5 = arith.constant 0 : index
    %5 = vector.load %arg4[%c0_4, %c0_5] : memref<1x128xf32, #tpu.memory_space<vmem>>, vector<1x128xf32>
    %6 = vector.broadcast %5 : vector<1x128xf32> to vector<128x128xf32>
    %7 = arith.mulf %4, %6 : vector<128x128xf32>
    %c0_6 = arith.constant 0 : index
    %c0_7 = arith.constant 0 : index
    %8 = vector.load %arg5[%c0_6, %c0_7] : memref<1x128xf32, #tpu.memory_space<vmem>>, vector<1x128xf32>
    %9 = vector.broadcast %8 : vector<1x128xf32> to vector<128x128xf32>
    %10 = arith.addf %7, %9 : vector<128x128xf32>
    %c0_8 = arith.constant 0 : index
    %c0_9 = arith.constant 0 : index
    %11 = vector.load %arg6[%c0_8, %c0_9] : memref<128x128xf32, #tpu.memory_space<vmem>>, vector<128x128xf32>
    tpu.vector_store %arg6[%c0_8, %c0_9], %10 {strides = array<i32>} : memref<128x128xf32, #tpu.memory_space<vmem>>, vector<128x128xf32>,
    return
  }
  func.func @transform_0(%arg0: i32, %arg1: i32) -> (i32, i32) {
    %c0_i32 = arith.constant 0 : i32
    %c0_i32_0 = arith.constant 0 : i32
    return %arg0, %c0_i32 : i32, i32
  }
  func.func @transform_1(%arg0: i32, %arg1: i32) -> (i32, i32) {
    %c0_i32 = arith.constant 0 : i32
    %c0_i32_0 = arith.constant 0 : i32
    return %c0_i32, %arg1 : i32, i32
  }
  func.func @transform_2(%arg0: i32, %arg1: i32) -> (i32, i32) {
    %c0_i32 = arith.constant 0 : i32
    %c0_i32_0 = arith.constant 0 : i32
    return %c0_i32, %arg1 : i32, i32
  }
  func.func @transform_3(%arg0: i32, %arg1: i32) -> (i32, i32) {
    %c0_i32 = arith.constant 0 : i32
    %c0_i32_0 = arith.constant 0 : i32
    return %c0_i32, %arg1 : i32, i32
  }
  func.func @transform_4(%arg0: i32, %arg1: i32) -> (i32, i32) {
    %c0_i32 = arith.constant 0 : i32
    return %arg0, %arg1 : i32, i32
  }
}

module attributes {stable_mosaic.version = 11 : i64} {
  func.func @_matmul_kernel(%arg0: i32, %arg1: i32, %arg2: memref<256x576xbf16, #tpu.memory_space<vmem>>, %arg3: memref<576x16xbf16, #tpu.memory_space<vmem>>, %arg4: memref<256x16xf32, #tpu.memory_space<vmem>>) attributes {dimension_semantics = [#tpu.dimension_semantics<parallel>, #tpu.dimension_semantics<parallel>], iteration_bounds = array<i64: 2, 1>, scalar_prefetch = 0 : i64, scratch_operands = 0 : i64, tpu.core_type = #tpu.core_type<tc>, window_params = [{transform_indices = @transform_0, window_bounds = array<i64: 256, 576>}, {transform_indices = @transform_1, window_bounds = array<i64: 576, 16>}, {transform_indices = @transform_2, window_bounds = array<i64: 256, 16>}]} {
    %c0 = arith.constant 0 : index
    %c0_0 = arith.constant 0 : index
    %0 = vector.load %arg2[%c0, %c0_0] : memref<256x576xbf16, #tpu.memory_space<vmem>>, vector<256x576xbf16>
    %c0_1 = arith.constant 0 : index
    %c0_2 = arith.constant 0 : index
    %1 = vector.load %arg3[%c0_1, %c0_2] : memref<576x16xbf16, #tpu.memory_space<vmem>>, vector<576x16xbf16>
    %cst = arith.constant dense<0.000000e+00> : vector<256x16xf32>
    %2 = tpu.matmul %0, %1, %cst {dimension_numbers = #tpu.dot_dimension_numbers<[1], [0], [0], [1], [0, 0, 1, 1], [], []>} : vector<256x576xbf16>, vector<576x16xbf16>, vector<256x16xf32> -> vector<256x16xf32>
    %c0_3 = arith.constant 0 : index
    %c0_4 = arith.constant 0 : index
    %3 = vector.load %arg4[%c0_3, %c0_4] : memref<256x16xf32, #tpu.memory_space<vmem>>, vector<256x16xf32>
    tpu.vector_store %arg4[%c0_3, %c0_4], %2 {strides = array<i32>} : memref<256x16xf32, #tpu.memory_space<vmem>>, vector<256x16xf32>,
    return
  }
  func.func @transform_0(%arg0: i32, %arg1: i32) -> (i32, i32) {
    %c0_i32 = arith.constant 0 : i32
    %c0_i32_0 = arith.constant 0 : i32
    return %arg0, %c0_i32 : i32, i32
  }
  func.func @transform_1(%arg0: i32, %arg1: i32) -> (i32, i32) {
    %c0_i32 = arith.constant 0 : i32
    %c0_i32_0 = arith.constant 0 : i32
    return %c0_i32, %arg1 : i32, i32
  }
  func.func @transform_2(%arg0: i32, %arg1: i32) -> (i32, i32) {
    %c0_i32 = arith.constant 0 : i32
    return %arg0, %arg1 : i32, i32
  }
}

</mosaic_0001>

<bundles_post_ra>
// kernel: position_gan_forward.4
= control target key start
LH: loop header
LB: loop body
LE: loop exit
PB: predicated region body
PF: predicated region fallthrough
CT: control target
= control target key end

     0   :  { %s2750_s0 = inlined_call_operand.vmem [shape: bf16[2,128], index: 0, kind: input, shape index: {}]   ;;  %s2751_s1 = inlined_call_operand.hbm [shape: bf16[128,4096], index: 1, kind: input, shape index: {}]   ;;  %s2752_s2 = inlined_call_operand.hbm [shape: f32[1,4096], index: 2, kind: input, shape index: {}]   ;;  %s2753_s3 = inlined_call_operand.hbm [shape: f32[1,4096], index: 3, kind: input, shape index: {}]   ;;  %s2754_s4 = inlined_call_operand.vmem [shape: f32[2,4096], index: 4, kind: output, shape index: {}]  }
   0x1   :  { %2760 = sst [smem:[#allocation10_spill]] %s2751_s1 }
   0x2   :  { %2761 = sst [smem:[#allocation11_spill]] %s2752_s2 }
   0x3   :  { %9 = vsyncpa [#allocation3], 0 }
   0x4   :  { %11 = vsyncpa [#allocation3 + $0x1], 0 }
   0x5   :  { %12 = vsyncpa [#allocation5], 0 }
   0x6   :  { %14 = vsyncpa [#allocation5 + $0x1], 0  ;;  %s2286_s15 = smov 0   ;;  %s2288_s16 = smov 0  }
   0x7   :  { %s2290_s17 = smov 0   ;;  %s2292_s18 = smov 0  }
   0x8   :  { %s2294_s19 = smov 0   ;;  %s2296_s20 = smov 0  }
   0x9 LB: > { %s2756_s21 = sadd.s32 4294967295, %s2251_s20   ;;  %s29_s22 = sadd.s32 1, %s2247_s19  ;;  %s2251_s20 = sphi %s2296_s20, %s20_s20   ;;  %s2247_s19 = sphi %s2294_s19, %s2780_s19   ;;  %s2243_s18 = sphi %s2292_s18, %s2779_s18   ;;  %s2239_s17 = sphi %s2290_s17, %s2778_s17   ;;  %s2235_s16 = sphi %s2288_s16, %s2777_s16   ;;  %s2231_s15 = sphi %s2286_s15, %s2776_s15  }
   0xa   : > { %p30_p0 = scmp.ge.s32.totalorder %s29_s22, 2  ;;  %s65_s23 = sadd.s32 1, %s2239_s17 }
   0xb   : > { %p72_p1 = scmp.ne.s32.totalorder %s2239_s17, %s2235_s16  ;;  %p73_p2 = scmp.eq.s32.totalorder %s2251_s20, 0 }
   0xc   : > { %s2782_s22 = smov (%p30_p0, %s29_s22), 0  ;;  %p78_p4 = scmp.ne.s32.totalorder %s2235_s16, %s2231_s15 }
   0xd   : > { %2762 = sst [smem:[#allocation9_spill]] %s2782_s22  ;;  %p74_p3 = por %p73_p2, %p72_p1 }
   0xe   : > { %s62_s24 = ssub.s32 %s2247_s19, %s2782_s22  ;;  %p79_p5 = scmp.eq.s32.totalorder %s2756_s21, 0 }
   0xf   : > { %p63_p6 = scmp.eq.s32.totalorder %s62_s24, 0  ;;  %p2053_p8 = scmp.lt.s32.totalorder %s2251_s20, 2 }
  0x10   : > { %p2327_p7 = por %p79_p5, %p78_p4  ;;  %s2336_s27 = sand.u32 1, %s2239_s17  }
  0x11   : > { %s2333_s26 = scalar_select %p63_p6, %s2239_s17, %s65_s23  }
  0x12   : > { %s2763_s25 = scalar_select %p2327_p7, 1, 0 }
  0x13   : > { %p2338_p9 = pnand %p2053_p8, %p74_p3  ;;  %s1889_s29 = sshll.u32 %s2336_s27, 10 }
  0x14   : > { %s192_s30 = scalar_lea.vmem [#allocation2], %s1889_s29  ;;  %s209_s6 = sand.u32 1, %s2251_s20  }
  0x15   : > { %s2764_s28 = scalar_select %p2338_p9, 1, 0 }
  0x16   : > { %s199_s5 = sshll.u32 %s192_s30, 4  ;;  %s2757_s7 = sshll.u32 %s2336_s27, 4  ;;  %s2344_s5 = int_to_ptr.vmem [resolvable:$true] %s199_s5 }
  0x17   : > { %s2035_s8 = sshll.u32 %s2247_s19, 8  ;;  %s2765_s2 = sld [smem:[#allocation11_spill]] }
  0x18   : > { %s213_s12 = scalar_lea.vmem [#allocation4], %s2757_s7  ;;  %s2360_s23 = scalar_lea.hbm %s2753_s3, %s2035_s8 }
  0x19   : > { %s221_s13 = sshll.u32 %s213_s12, 4  ;;  %s2362_s24 = scalar_lea.sflag [#allocation5], %s209_s6  ;;  %s2355_s13 = int_to_ptr.vmem [resolvable:$true] %s221_s13 }
  0x1a   : > { %p2368_p11 = pneg %p2338_p9 }
  0x1d   : > { %s2351_s11 = scalar_lea.hbm %s2765_s2, %s2035_s8  ;;  %s2112_s12 = scalar_lea.hbm %s2765_s2, 512 }
  0x1e   : > { %s2107_s29 = scalar_lea.hbm %s2351_s11, 256  ;;  %p2113_p0 = scmp.lt.u32.totalorder %s2351_s11, %s2765_s2 }
  0x1f   : > { %p2108_p10 = scmp.ne.s32.totalorder %s2351_s11, %s2107_s29  ;;  %p2114_p1 = scmp.lt.u32.totalorder %s2112_s12, %s2107_s29 }
  0x20   : > { %p2116_p3 = scmp.lt.u32.totalorder %s2107_s29, %s2351_s11 }
  0x21   : > { %p2110_p12 = pnand %p2368_p11, %p2108_p10  ;;  %p2115_p2 = por %p2114_p1, %p2113_p0 }
  0x23   : > { %p2111_p13 = pneg %p2110_p12  ;;  %p2117_p4 = por %p2116_p3, %p2115_p2 }
  0x25   : > { %p2118_p5 = pnand %p2117_p4, %p2111_p13 }
  0x27   : > { %2121 = shalt.err (!%p2118_p5)
}
  0x28   : > { %s2122_s6 = scalar_lea.vmem %s2355_s13, 256  ;;  %s2253_s15 = smov [#allocation4]  }
  0x29   : > { %p2123_p6 = scmp.ne.s32.totalorder %s2355_s13, %s2122_s6  ;;  %s2127_s9 = sshll.u32 %s2253_s15, 4  ;;  %s2128_s9 = int_to_ptr.vmem [resolvable:$false] %s2127_s9 }
  0x2a   : > { %s2129_s10 = scalar_lea.vmem %s2128_s9, 512  ;;  %p2130_p12 = scmp.lt.s32.totalorder %s2355_s13, %s2128_s9 }
  0x2b   : > { %p2125_p8 = pnand %p2123_p6, %p2368_p11  ;;  %p2131_p7 = scmp.lt.s32.totalorder %s2129_s10, %s2122_s6 }
  0x2d   : > { %p2126_p10 = pneg %p2125_p8  ;;  %p2132_p0 = por %p2131_p7, %p2130_p12 }
  0x2f   : > { %p2133_p1 = pnand %p2132_p0, %p2126_p10 }
  0x31   : > { %2136 = shalt.err (!%p2133_p1)
}
  0x32   : > { %2049 = dma.hbm_to_vmem [thread:$0]  (!%p2338_p9), %s2351_s11, 256, %s2355_s13, %s2362_s24  }
  0x33   : > { %p1898_p13 = scmp.ge.s32.totalorder %s2251_s20, 1  ;;  %p245_p2 = scmp.lt.s32.totalorder %s2251_s20, 3 }
  0x34   : > { %s2034_s29 = sshll.u32 %s2247_s19, 10  ;;  %s2768_s1 = sld [smem:[#allocation10_spill]] }
  0x35   : > { %p2395_p3 = pnand %p1898_p13, %p245_p2  ;;  %s189_s15 = scalar_lea.sflag [#allocation3], %s2336_s27 }
  0x37   : > { %s2767_s12 = scalar_select %p2395_p3, 1, 0 }
  0x3a   : > { %s2402_s6 = scalar_lea.hbm %s2768_s1, %s2034_s29  ;;  %s2142_s10 = scalar_lea.hbm %s2768_s1, 32768 }
  0x3b   : > { %s2137_s9 = scalar_lea.hbm %s2402_s6, 16384  ;;  %p2143_p6 = scmp.lt.u32.totalorder %s2402_s6, %s2768_s1 }
  0x3c   : > { %p2138_p7 = scmp.ne.s32.totalorder %s2402_s6, %s2137_s9  ;;  %p2144_p8 = scmp.lt.u32.totalorder %s2142_s10, %s2137_s9 }
  0x3d   : > { %p2146_p12 = scmp.lt.u32.totalorder %s2137_s9, %s2402_s6 }
  0x3e   : > { %p2140_p4 = pnand %p2138_p7, %p2368_p11  ;;  %p2145_p10 = por %p2144_p8, %p2143_p6 }
  0x40   : > { %p2141_p5 = pneg %p2140_p4  ;;  %p2147_p0 = por %p2146_p12, %p2145_p10 }
  0x42   : > { %p2148_p1 = pnand %p2147_p0, %p2141_p5 }
  0x44   : > { %2151 = shalt.err (!%p2148_p1)
}
  0x45   : > { %s2152_s29 = scalar_lea.vmem %s2344_s5, 16384  ;;  %s2254_s14 = smov [#allocation2]  }
  0x46   : > { %p2153_p13 = scmp.ne.s32.totalorder %s2344_s5, %s2152_s29  ;;  %s2157_s8 = sshll.u32 %s2254_s14, 4  ;;  %s2158_s8 = int_to_ptr.vmem [resolvable:$false] %s2157_s8 }
  0x47   : > { %s2159_s21 = scalar_lea.vmem %s2158_s8, 32768  ;;  %p2160_p4 = scmp.lt.s32.totalorder %s2344_s5, %s2158_s8 }
  0x48   : > { %p2155_p2 = pnand %p2153_p13, %p2368_p11  ;;  %p2161_p3 = scmp.lt.s32.totalorder %s2159_s21, %s2152_s29 }
  0x4a   : > { %p2156_p7 = pneg %p2155_p2  ;;  %p2162_p6 = por %p2161_p3, %p2160_p4 }
  0x4c   : > { %p2163_p8 = pnand %p2162_p6, %p2156_p7 }
  0x4e   : > { %2166 = shalt.err (!%p2163_p8)
}
  0x4f   : > { %s2255_s7 = smov 2048   ;;  %s2256_s9 = smov 1024  }
  0x50   : > { %s2257_s11 = smov 64   ;;  %s2769_s13 = sshll.u32 %s2336_s27, 4 }
  0x51   : > { %2046 = dma.hbm_to_vmem [thread:$0]  (!%p2338_p9), %s2402_s6, 16384, %s2344_s5, %s189_s15, %s2255_s7, %s2256_s9, %s2257_s11  }
  0x52   : > { %s232_s10 = scalar_lea.vmem [#allocation6], %s2769_s13  ;;  %s2167_s14 = scalar_lea.hbm %s2360_s23, 256 }
  0x53   : > { %s240_s29 = sshll.u32 %s232_s10, 4  ;;  %p2168_p3 = scmp.ne.s32.totalorder %s2360_s23, %s2167_s14  ;;  %s241_s29 = int_to_ptr.vmem [resolvable:$true] %s240_s29 }
  0x54   : > { %s2172_s1 = scalar_lea.hbm %s2753_s3, 512  ;;  %p2173_p12 = scmp.lt.u32.totalorder %s2360_s23, %s2753_s3 }
  0x55   : > { %p2170_p5 = pnand %p2168_p3, %p2368_p11  ;;  %p2174_p0 = scmp.lt.u32.totalorder %s2172_s1, %s2167_s14 }
  0x56   : > { %p2176_p13 = scmp.lt.u32.totalorder %s2167_s14, %s2360_s23 }
  0x57   : > { %p2171_p10 = pneg %p2170_p5  ;;  %p2175_p1 = por %p2174_p0, %p2173_p12 }
  0x59   : > { %p2177_p2 = por %p2176_p13, %p2175_p1 }
  0x5b   : > { %p2178_p7 = pnand %p2177_p2, %p2171_p10 }
  0x5d   : > { %2181 = shalt.err (!%p2178_p7)
}
  0x5e   : > { %s2182_s27 = scalar_lea.vmem %s241_s29, 256  ;;  %s2258_s5 = smov [#allocation6]  }
  0x5f   : > { %p2183_p4 = scmp.ne.s32.totalorder %s241_s29, %s2182_s27  ;;  %s2187_s6 = sshll.u32 %s2258_s5, 4  ;;  %s2188_s6 = int_to_ptr.vmem [resolvable:$false] %s2187_s6 }
  0x60   : > { %s2189_s15 = scalar_lea.vmem %s2188_s6, 512  ;;  %p2190_p3 = scmp.lt.s32.totalorder %s241_s29, %s2188_s6 }
  0x61   : > { %p2185_p6 = pnand %p2183_p4, %p2368_p11  ;;  %p2191_p5 = scmp.lt.s32.totalorder %s2189_s15, %s2182_s27 }
  0x63   : > { %p2186_p8 = pneg %p2185_p6  ;;  %p2192_p9 = por %p2191_p5, %p2190_p3 }
  0x65   : > { %p2193_p0 = pnand %p2192_p9, %p2186_p8 }
  0x67   : > { %2196 = shalt.err (!%p2193_p0)
}
  0x68   : > { %p2770_p12 = scmp.ne.s32.totalorder %s2764_s28, 0  ;;  %p2771_p10 = scmp.ne.s32.totalorder %s2767_s12, 0 }
  0x69   : > { %s2451_s1 = sand.u32 (!%p2771_p10), 1, %s2235_s16   ;;  %p2772_p9 = scmp.ne.s32.totalorder (!%p2771_p10), %s2763_s25, 0 }
  0x6a   : > { %2052 = dma.hbm_to_vmem [thread:$0]  (!%p2770_p12), %s2360_s23, 256, %s241_s29, %s2362_s24  }
  0x6b   : > { %249 = sbr.rel (%p2771_p10) target bundleno = 477 (0x1dd), region = 36  ;;  %s1899_s2 = sshll.u32 (!%p2771_p10), %s2451_s1, 10 }
  0x6c   : > { %s252_s22 = scalar_lea.sflag (!%p2771_p10), [#allocation3], %s2451_s1  ;;  %s2455_s30 = scalar_lea.vmem (!%p2771_p10), [#allocation2], %s1899_s2 }
  0x72   : > { %2222 = dma.done.wait (%p2772_p9), %s252_s22, 16384  }
  0x73   : > { %2224 = vsyncadd (%p2772_p9), %s252_s22, 4294950912  ;;  %s2773_s28 = sadd.s32 4294967295, %s2251_s20   ;;  %s1900_s24 = sshll.u32 %s2451_s1, 4 }
  0x74   : > { %s260_s23 = sand.u32 1, %s2773_s28   ;;  %s2466_s7 = scalar_lea.vmem [#allocation4], %s1900_s24 }
  0x75   : > { %s261_s12 = scalar_lea.sflag [#allocation5], %s260_s23 }
  0x76   : > { %2226 = dma.done.wait (%p2772_p9), %s261_s12, 512  }
  0x77   : > { %2228 = vsyncadd (%p2772_p9), %s261_s12, 4294966784  ;;  %v2259_v0 = vmov 0   ;;  %v333_v1 = vld [vmem:[%s2455_s30] sm:$0xff]  ;;  %v334_v3 = vld [vmem:[%s2455_s30 + $0x8] sm:$0xff]  ;;  %s273_s11 = scalar_lea.vmem [#allocation6], %s1900_s24  ;;  %s1902_s13 = sshll.u32 %s2243_s18, 4 }
  0x78   : > { %1133 = vmatprep.mubr.bf16.mxu0 %v2259_v0  ;;  %1174 = vmatprep.mubr.bf16.mxu1 %v2259_v0  ;;  %v341_v2 = vld [vmem:[%s2455_s30 + $0x40] sm:$0xff]  ;;  %v342_v5 = vld [vmem:[%s2455_s30 + $0x48] sm:$0xff]  ;;  %v335_v63 = vld [vmem:[%s2455_s30 + $0x10] sm:$0xff]  ;;  %p2653_p11 = scmp.lt.s32.totalorder %s1902_s13, 31 }
  0x79   : > { %v1905_v4 = vcombine.high %v333_v1, %v341_v2  ;;  %v1904_v6 = vcombine.low %v333_v1, %v341_v2  ;;  %v349_v7 = vld [vmem:[%s2455_s30 + $0x80] sm:$0xff]  ;;  %v1907_v9 = vcombine.high %v334_v3, %v342_v5  ;;  %v1906_v10 = vcombine.low %v334_v3, %v342_v5  ;;  %v350_v12 = vld [vmem:[%s2455_s30 + $0x88] sm:$0xff]  ;;  %v343_v1 = vld [vmem:[%s2455_s30 + $0x50] sm:$0xff] }
  0x7a   : > { %v357_v8 = vld [vmem:[%s2455_s30 + $0xc0] sm:$0xff]  ;;  %v358_v13 = vld [vmem:[%s2455_s30 + $0xc8] sm:$0xff]  ;;  %v336_v2 = vld [vmem:[%s2455_s30 + $0x18] sm:$0xff]  ;;  %s2784_s13 = smov (!%p2653_p11, %s1902_s13), 31 }
  0x7b   : > { %v1921_v11 = vcombine.high %v349_v7, %v357_v8  ;;  %v365_v14 = vld [vmem:[%s2455_s30 + $0x100] sm:$0xff]  ;;  %1101 = vmatprep.subr.bf16.mxu0 %v1905_v4  ;;  %v1923_v15 = vcombine.high %v350_v12, %v358_v13  ;;  %v366_v17 = vld [vmem:[%s2455_s30 + $0x108] sm:$0xff]  ;;  %1142 = vmatprep.subr.bf16.mxu1 %v1907_v9  ;;  %v1920_v19 = vcombine.low %v349_v7, %v357_v8  ;;  %v344_v3 = vld [vmem:[%s2455_s30 + $0x58] sm:$0xff]  ;;  %s1903_s10 = sshll.u32 %s2784_s13, 1 }
  0x7c   : > { %v373_v16 = vld [vmem:[%s2455_s30 + $0x140] sm:$0xff]  ;;  %v374_v18 = vld [vmem:[%s2455_s30 + $0x148] sm:$0xff]  ;;  %1102 = vmatpush1.bf16.msra.mxu0 %v1904_v6  ;;  %1143 = vmatpush1.bf16.msra.mxu1 %v1906_v10  ;;  %v1922_v20 = vcombine.low %v350_v12, %v358_v13  ;;  %v1909_v6 = vcombine.high %v335_v63, %v343_v1  ;;  %v1911_v7 = vcombine.high %v336_v2, %v344_v3  ;;  %v351_v8 = vld [vmem:[%s2455_s30 + $0x90] sm:$0xff]  ;;  %s2672_s8 = scalar_lea.vmem %s2754_s4, %s1903_s10 }
  0x7d   : > { %1103 = vmatprep.subr.bf16.mxu0 %v1921_v11  ;;  %v1937_v21 = vcombine.high %v365_v14, %v373_v16  ;;  %1144 = vmatprep.subr.bf16.mxu1 %v1923_v15  ;;  %v1939_v22 = vcombine.high %v366_v17, %v374_v18  ;;  %v381_v23 = vld [vmem:[%s2455_s30 + $0x180] sm:$0xff]  ;;  %v382_v25 = vld [vmem:[%s2455_s30 + $0x188] sm:$0xff]  ;;  %v1936_v27 = vcombine.low %v365_v14, %v373_v16  ;;  %v359_v9 = vld [vmem:[%s2455_s30 + $0xd0] sm:$0xff] }
  0x7e   : > { %v389_v24 = vld [vmem:[%s2455_s30 + $0x1c0] sm:$0xff]  ;;  %v390_v26 = vld [vmem:[%s2455_s30 + $0x1c8] sm:$0xff]  ;;  %v1938_v28 = vcombine.low %v366_v17, %v374_v18  ;;  %v352_v10 = vld [vmem:[%s2455_s30 + $0x98] sm:$0xff]  ;;  %v1908_v13 = vcombine.low %v335_v63, %v343_v1  ;;  %v1910_v14 = vcombine.low %v336_v2, %v344_v3  ;;  %v1925_v15 = vcombine.high %v351_v8, %v359_v9 }
  0x7f   : > { %v1953_v29 = vcombine.high %v381_v23, %v389_v24  ;;  %v1955_v30 = vcombine.high %v382_v25, %v390_v26  ;;  %v397_v31 = vld [vmem:[%s2455_s30 + $0x200] sm:$0xff]  ;;  %v398_v33 = vld [vmem:[%s2455_s30 + $0x208] sm:$0xff]  ;;  %v1952_v35 = vcombine.low %v381_v23, %v389_v24  ;;  %v1954_v36 = vcombine.low %v382_v25, %v390_v26  ;;  %v360_v11 = vld [vmem:[%s2455_s30 + $0xd8] sm:$0xff] }
  0x80   : > { %1104 = vmatpush1.bf16.msra.mxu0 %v1920_v19  ;;  %1145 = vmatpush1.bf16.msra.mxu1 %v1922_v20  ;;  %v405_v32 = vld [vmem:[%s2455_s30 + $0x240] sm:$0xff]  ;;  %v406_v34 = vld [vmem:[%s2455_s30 + $0x248] sm:$0xff]  ;;  %v1927_v16 = vcombine.high %v352_v10, %v360_v11  ;;  %v367_v17 = vld [vmem:[%s2455_s30 + $0x110] sm:$0xff] }
  0x81   : > { %1105 = vmatprep.subr.bf16.mxu0 %v1937_v21  ;;  %1146 = vmatprep.subr.bf16.mxu1 %v1939_v22  ;;  %v1969_v37 = vcombine.high %v397_v31, %v405_v32  ;;  %v1971_v38 = vcombine.high %v398_v33, %v406_v34  ;;  %v413_v39 = vld [vmem:[%s2455_s30 + $0x280] sm:$0xff]  ;;  %v414_v41 = vld [vmem:[%s2455_s30 + $0x288] sm:$0xff]  ;;  %v1968_v43 = vcombine.low %v397_v31, %v405_v32  ;;  %v375_v18 = vld [vmem:[%s2455_s30 + $0x150] sm:$0xff] }
  0x82   : > { %v421_v40 = vld [vmem:[%s2455_s30 + $0x2c0] sm:$0xff]  ;;  %v422_v42 = vld [vmem:[%s2455_s30 + $0x2c8] sm:$0xff]  ;;  %v1970_v44 = vcombine.low %v398_v33, %v406_v34  ;;  %v368_v19 = vld [vmem:[%s2455_s30 + $0x118] sm:$0xff]  ;;  %v1924_v21 = vcombine.low %v351_v8, %v359_v9  ;;  %v1926_v22 = vcombine.low %v352_v10, %v360_v11  ;;  %v1941_v23 = vcombine.high %v367_v17, %v375_v18 }
  0x83   : > { %v1985_v45 = vcombine.high %v413_v39, %v421_v40  ;;  %v1987_v46 = vcombine.high %v414_v41, %v422_v42  ;;  %v429_v47 = vld [vmem:[%s2455_s30 + $0x300] sm:$0xff]  ;;  %v430_v49 = vld [vmem:[%s2455_s30 + $0x308] sm:$0xff]  ;;  %v1984_v51 = vcombine.low %v413_v39, %v421_v40  ;;  %v1986_v52 = vcombine.low %v414_v41, %v422_v42  ;;  %v376_v20 = vld [vmem:[%s2455_s30 + $0x158] sm:$0xff] }
  0x84   : > { %1106 = vmatpush1.bf16.msra.mxu0 %v1936_v27  ;;  %1147 = vmatpush1.bf16.msra.mxu1 %v1938_v28  ;;  %v437_v48 = vld [vmem:[%s2455_s30 + $0x340] sm:$0xff]  ;;  %v438_v50 = vld [vmem:[%s2455_s30 + $0x348] sm:$0xff]  ;;  %v1943_v24 = vcombine.high %v368_v19, %v376_v20  ;;  %v383_v25 = vld [vmem:[%s2455_s30 + $0x190] sm:$0xff] }
  0x85   : > { %1107 = vmatprep.subr.bf16.mxu0 %v1953_v29  ;;  %1148 = vmatprep.subr.bf16.mxu1 %v1955_v30  ;;  %v2001_v53 = vcombine.high %v429_v47, %v437_v48  ;;  %v2003_v54 = vcombine.high %v430_v49, %v438_v50  ;;  %v445_v55 = vld [vmem:[%s2455_s30 + $0x380] sm:$0xff]  ;;  %v446_v57 = vld [vmem:[%s2455_s30 + $0x388] sm:$0xff]  ;;  %v2000_v59 = vcombine.low %v429_v47, %v437_v48  ;;  %v391_v26 = vld [vmem:[%s2455_s30 + $0x1d0] sm:$0xff] }
  0x86   : > { %v453_v56 = vld [vmem:[%s2455_s30 + $0x3c0] sm:$0xff]  ;;  %v454_v58 = vld [vmem:[%s2455_s30 + $0x3c8] sm:$0xff]  ;;  %v2002_v60 = vcombine.low %v430_v49, %v438_v50  ;;  %v384_v27 = vld [vmem:[%s2455_s30 + $0x198] sm:$0xff]  ;;  %v1940_v29 = vcombine.low %v367_v17, %v375_v18  ;;  %v1942_v30 = vcombine.low %v368_v19, %v376_v20  ;;  %v1957_v31 = vcombine.high %v383_v25, %v391_v26 }
  0x87   : > { %v2017_v61 = vcombine.high %v445_v55, %v453_v56  ;;  %v2019_v62 = vcombine.high %v446_v57, %v454_v58  ;;  %v2016_v4 = vcombine.low %v445_v55, %v453_v56  ;;  %v2018_v5 = vcombine.low %v446_v57, %v454_v58  ;;  %v2517_v12 = vld [vmem:[%s2750_s0] sm:$0x1]  ;;  %v392_v28 = vld [vmem:[%s2455_s30 + $0x1d8] sm:$0xff]  ;;  %v399_v33 = vld [vmem:[%s2455_s30 + $0x210] sm:$0xff] }
  0x88   : > { %1108 = vmatpush1.bf16.msra.mxu0 %v1952_v35  ;;  %1149 = vmatpush1.bf16.msra.mxu1 %v1954_v36  ;;  %v1959_v32 = vcombine.high %v384_v27, %v392_v28  ;;  %v407_v34 = vld [vmem:[%s2455_s30 + $0x250] sm:$0xff]  ;;  %v400_v35 = vld [vmem:[%s2455_s30 + $0x218] sm:$0xff]  ;;  %v337_v2 = vld [vmem:[%s2455_s30 + $0x20] sm:$0xff] }
  0x89   : > { %1109 = vmatprep.subr.bf16.mxu0 %v1969_v37  ;;  %1150 = vmatprep.subr.bf16.mxu1 %v1971_v38  ;;  %v408_v36 = vld [vmem:[%s2455_s30 + $0x258] sm:$0xff]  ;;  %v1956_v37 = vcombine.low %v383_v25, %v391_v26  ;;  %v1958_v38 = vcombine.low %v384_v27, %v392_v28  ;;  %v1973_v39 = vcombine.high %v399_v33, %v407_v34  ;;  %v415_v41 = vld [vmem:[%s2455_s30 + $0x290] sm:$0xff]  ;;  %v345_v3 = vld [vmem:[%s2455_s30 + $0x60] sm:$0xff] }
  0x8a   : > { %v1975_v40 = vcombine.high %v400_v35, %v408_v36  ;;  %v423_v42 = vld [vmem:[%s2455_s30 + $0x2d0] sm:$0xff]  ;;  %v1913_v8 = vcombine.high %v337_v2, %v345_v3  ;;  %v353_v10 = vld [vmem:[%s2455_s30 + $0xa0] sm:$0xff] }
  0x8b   : > { %v1989_v47 = vcombine.high %v415_v41, %v423_v42  ;;  %v431_v49 = vld [vmem:[%s2455_s30 + $0x310] sm:$0xff]  ;;  %v361_v11 = vld [vmem:[%s2455_s30 + $0xe0] sm:$0xff] }
  0x8c   : > { %1110 = vmatpush1.bf16.msra.mxu0 %v1968_v43  ;;  %1151 = vmatpush1.bf16.msra.mxu1 %v1970_v44  ;;  %v416_v43 = vld [vmem:[%s2455_s30 + $0x298] sm:$0xff]  ;;  %v439_v50 = vld [vmem:[%s2455_s30 + $0x350] sm:$0xff]  ;;  %v1929_v17 = vcombine.high %v353_v10, %v361_v11  ;;  %v369_v19 = vld [vmem:[%s2455_s30 + $0x120] sm:$0xff] }
  0x8d   : > { %1111 = vmatprep.subr.bf16.mxu0 %v1985_v45  ;;  %1152 = vmatprep.subr.bf16.mxu1 %v1987_v46  ;;  %v424_v44 = vld [vmem:[%s2455_s30 + $0x2d8] sm:$0xff]  ;;  %v1972_v45 = vcombine.low %v399_v33, %v407_v34  ;;  %v1974_v46 = vcombine.low %v400_v35, %v408_v36  ;;  %v2005_v55 = vcombine.high %v431_v49, %v439_v50  ;;  %v447_v57 = vld [vmem:[%s2455_s30 + $0x390] sm:$0xff]  ;;  %v377_v20 = vld [vmem:[%s2455_s30 + $0x160] sm:$0xff] }
  0x8e   : > { %v1991_v48 = vcombine.high %v416_v43, %v424_v44  ;;  %v455_v58 = vld [vmem:[%s2455_s30 + $0x3d0] sm:$0xff]  ;;  %v1945_v25 = vcombine.high %v369_v19, %v377_v20  ;;  %v385_v27 = vld [vmem:[%s2455_s30 + $0x1a0] sm:$0xff] }
  0x8f   : > { %v2021_v63 = vcombine.high %v447_v57, %v455_v58  ;;  %v393_v28 = vld [vmem:[%s2455_s30 + $0x1e0] sm:$0xff] }
  0x90   : > { %1112 = vmatpush1.bf16.msra.mxu0 %v1984_v51  ;;  %1153 = vmatpush1.bf16.msra.mxu1 %v1986_v52  ;;  %v432_v51 = vld [vmem:[%s2455_s30 + $0x318] sm:$0xff]  ;;  %v1961_v33 = vcombine.high %v385_v27, %v393_v28  ;;  %v401_v35 = vld [vmem:[%s2455_s30 + $0x220] sm:$0xff] }
  0x91   : > { %1113 = vmatprep.subr.bf16.mxu0 %v2001_v53  ;;  %1154 = vmatprep.subr.bf16.mxu1 %v2003_v54  ;;  %v440_v52 = vld [vmem:[%s2455_s30 + $0x358] sm:$0xff]  ;;  %v1988_v53 = vcombine.low %v415_v41, %v423_v42  ;;  %v1990_v54 = vcombine.low %v416_v43, %v424_v44  ;;  %v409_v36 = vld [vmem:[%s2455_s30 + $0x260] sm:$0xff] }
  0x92   : > { %v2007_v56 = vcombine.high %v432_v51, %v440_v52  ;;  %v1977_v41 = vcombine.high %v401_v35, %v409_v36  ;;  %v417_v43 = vld [vmem:[%s2455_s30 + $0x2a0] sm:$0xff] }
  0x93   : > { %v425_v44 = vld [vmem:[%s2455_s30 + $0x2e0] sm:$0xff] }
  0x94   : > { %1114 = vmatpush1.bf16.msra.mxu0 %v2000_v59  ;;  %1155 = vmatpush1.bf16.msra.mxu1 %v2002_v60  ;;  %v448_v59 = vld [vmem:[%s2455_s30 + $0x398] sm:$0xff] }
  0x95   : > { %1115 = vmatprep.subr.bf16.mxu0 %v2017_v61  ;;  %1156 = vmatprep.subr.bf16.mxu1 %v2019_v62  ;;  %v456_v60 = vld [vmem:[%s2455_s30 + $0x3d8] sm:$0xff]  ;;  %v2004_v61 = vcombine.low %v431_v49, %v439_v50  ;;  %v2006_v62 = vcombine.low %v432_v51, %v440_v52  ;;  %v1993_v49 = vcombine.high %v417_v43, %v425_v44  ;;  %v433_v51 = vld [vmem:[%s2455_s30 + $0x320] sm:$0xff] }
  0x96   : > { %v2023_v1 = vcombine.high %v448_v59, %v456_v60  ;;  %v441_v52 = vld [vmem:[%s2455_s30 + $0x360] sm:$0xff] }
  0x98   : > { %1116 = vmatpush1.bf16.msra.mxu0 %v2016_v4  ;;  %1157 = vmatpush1.bf16.msra.mxu1 %v2018_v5  ;;  %v338_v4 = vld [vmem:[%s2455_s30 + $0x28] sm:$0xff] }
  0x99   : > { %1183 = vmatprep.subr.bf16.mxu0 %v1909_v6  ;;  %1224 = vmatprep.subr.bf16.mxu1 %v1911_v7  ;;  %v346_v5 = vld [vmem:[%s2455_s30 + $0x68] sm:$0xff]  ;;  %v2020_v6 = vcombine.low %v447_v57, %v455_v58  ;;  %v2022_v7 = vcombine.low %v448_v59, %v456_v60  ;;  %v2009_v57 = vcombine.high %v433_v51, %v441_v52  ;;  %v449_v59 = vld [vmem:[%s2455_s30 + $0x3a0] sm:$0xff] }
  0x9a   : > { %v1915_v9 = vcombine.high %v338_v4, %v346_v5  ;;  %v457_v60 = vld [vmem:[%s2455_s30 + $0x3e0] sm:$0xff] }
  0x9b   : > { %1134 = vmatmul.mubr.bf16.vlgmr.msra.gmra.mrb[0].mxu0 %v2517_v12  ;;  %1175 = vmatmul.mubr.bf16.vlgmr.msra.gmra.mrb[0].mxu1 %v2517_v12 }
  0x9c   : > { %1184 = vmatpush1.bf16.msra.mxu0 %v1908_v13  ;;  %1225 = vmatpush1.bf16.msra.mxu1 %v1910_v14  ;;  %v354_v13 = vld [vmem:[%s2455_s30 + $0xa8] sm:$0xff] }
  0x9d   : > { %1185 = vmatprep.subr.bf16.mxu0 %v1925_v15  ;;  %1226 = vmatprep.subr.bf16.mxu1 %v1927_v16  ;;  %v362_v14 = vld [vmem:[%s2455_s30 + $0xe8] sm:$0xff]  ;;  %v1912_v15 = vcombine.low %v337_v2, %v345_v3  ;;  %v1914_v16 = vcombine.low %v338_v4, %v346_v5  ;;  %v2025_v2 = vcombine.high %v449_v59, %v457_v60  ;;  %v339_v4 = vld [vmem:[%s2455_s30 + $0x30] sm:$0xff] }
  0x9e   : > { %1215 = vmatprep.mubr.bf16.mxu0 %v2259_v0  ;;  %1256 = vmatprep.mubr.bf16.mxu1 %v2259_v0  ;;  %v1931_v18 = vcombine.high %v354_v13, %v362_v14  ;;  %v347_v5 = vld [vmem:[%s2455_s30 + $0x70] sm:$0xff] }
  0xa0   : > { %1186 = vmatpush1.bf16.msra.mxu0 %v1924_v21  ;;  %1227 = vmatpush1.bf16.msra.mxu1 %v1926_v22  ;;  %v370_v21 = vld [vmem:[%s2455_s30 + $0x128] sm:$0xff] }
  0xa1   : > { %1187 = vmatprep.subr.bf16.mxu0 %v1941_v23  ;;  %1228 = vmatprep.subr.bf16.mxu1 %v1943_v24  ;;  %v378_v22 = vld [vmem:[%s2455_s30 + $0x168] sm:$0xff]  ;;  %v1928_v23 = vcombine.low %v353_v10, %v361_v11  ;;  %v1930_v24 = vcombine.low %v354_v13, %v362_v14  ;;  %v1917_v10 = vcombine.high %v339_v4, %v347_v5  ;;  %v355_v13 = vld [vmem:[%s2455_s30 + $0xb0] sm:$0xff] }
  0xa2   : > { %v1947_v26 = vcombine.high %v370_v21, %v378_v22  ;;  %v363_v14 = vld [vmem:[%s2455_s30 + $0xf0] sm:$0xff] }
  0xa4   : > { %1188 = vmatpush1.bf16.msra.mxu0 %v1940_v29  ;;  %1229 = vmatpush1.bf16.msra.mxu1 %v1942_v30  ;;  %v386_v29 = vld [vmem:[%s2455_s30 + $0x1a8] sm:$0xff] }
  0xa5   : > { %1189 = vmatprep.subr.bf16.mxu0 %v1957_v31  ;;  %1230 = vmatprep.subr.bf16.mxu1 %v1959_v32  ;;  %v394_v30 = vld [vmem:[%s2455_s30 + $0x1e8] sm:$0xff]  ;;  %v1944_v31 = vcombine.low %v369_v19, %v377_v20  ;;  %v1946_v32 = vcombine.low %v370_v21, %v378_v22  ;;  %v1933_v19 = vcombine.high %v355_v13, %v363_v14  ;;  %v371_v21 = vld [vmem:[%s2455_s30 + $0x130] sm:$0xff] }
  0xa6   : > { %v1963_v34 = vcombine.high %v386_v29, %v394_v30  ;;  %v379_v22 = vld [vmem:[%s2455_s30 + $0x170] sm:$0xff] }
  0xa8   : > { %1190 = vmatpush1.bf16.msra.mxu0 %v1956_v37  ;;  %1231 = vmatpush1.bf16.msra.mxu1 %v1958_v38  ;;  %v402_v37 = vld [vmem:[%s2455_s30 + $0x228] sm:$0xff] }
  0xa9   : > { %1191 = vmatprep.subr.bf16.mxu0 %v1973_v39  ;;  %1232 = vmatprep.subr.bf16.mxu1 %v1975_v40  ;;  %v410_v38 = vld [vmem:[%s2455_s30 + $0x268] sm:$0xff]  ;;  %v1960_v39 = vcombine.low %v385_v27, %v393_v28  ;;  %v1962_v40 = vcombine.low %v386_v29, %v394_v30  ;;  %v1949_v27 = vcombine.high %v371_v21, %v379_v22  ;;  %v387_v29 = vld [vmem:[%s2455_s30 + $0x1b0] sm:$0xff] }
  0xaa   : > { %v1979_v42 = vcombine.high %v402_v37, %v410_v38  ;;  %v395_v30 = vld [vmem:[%s2455_s30 + $0x1f0] sm:$0xff] }
  0xac   : > { %1192 = vmatpush1.bf16.msra.mxu0 %v1972_v45  ;;  %1233 = vmatpush1.bf16.msra.mxu1 %v1974_v46  ;;  %v418_v45 = vld [vmem:[%s2455_s30 + $0x2a8] sm:$0xff] }
  0xad   : > { %1193 = vmatprep.subr.bf16.mxu0 %v1989_v47  ;;  %1234 = vmatprep.subr.bf16.mxu1 %v1991_v48  ;;  %v426_v46 = vld [vmem:[%s2455_s30 + $0x2e8] sm:$0xff]  ;;  %v1976_v47 = vcombine.low %v401_v35, %v409_v36  ;;  %v1978_v48 = vcombine.low %v402_v37, %v410_v38  ;;  %v1965_v35 = vcombine.high %v387_v29, %v395_v30  ;;  %v403_v37 = vld [vmem:[%s2455_s30 + $0x230] sm:$0xff] }
  0xae   : > { %v1995_v50 = vcombine.high %v418_v45, %v426_v46  ;;  %v411_v38 = vld [vmem:[%s2455_s30 + $0x270] sm:$0xff] }
  0xb0   : > { %1194 = vmatpush1.bf16.msra.mxu0 %v1988_v53  ;;  %1235 = vmatpush1.bf16.msra.mxu1 %v1990_v54  ;;  %v434_v53 = vld [vmem:[%s2455_s30 + $0x328] sm:$0xff] }
  0xb1   : > { %1195 = vmatprep.subr.bf16.mxu0 %v2005_v55  ;;  %1236 = vmatprep.subr.bf16.mxu1 %v2007_v56  ;;  %v442_v54 = vld [vmem:[%s2455_s30 + $0x368] sm:$0xff]  ;;  %v1992_v55 = vcombine.low %v417_v43, %v425_v44  ;;  %v1994_v56 = vcombine.low %v418_v45, %v426_v46  ;;  %v419_v44 = vld [vmem:[%s2455_s30 + $0x2b0] sm:$0xff]  ;;  %v420_v46 = vld [vmem:[%s2455_s30 + $0x2b8] sm:$0xff] }
  0xb2   : > { %v2011_v58 = vcombine.high %v434_v53, %v442_v54  ;;  %v427_v45 = vld [vmem:[%s2455_s30 + $0x2f0] sm:$0xff] }
  0xb4   : > { %1196 = vmatpush1.bf16.msra.mxu0 %v2004_v61  ;;  %1237 = vmatpush1.bf16.msra.mxu1 %v2006_v62  ;;  %v450_v61 = vld [vmem:[%s2455_s30 + $0x3a8] sm:$0xff] }
  0xb5   : > { %1197 = vmatprep.subr.bf16.mxu0 %v2021_v63  ;;  %1238 = vmatprep.subr.bf16.mxu1 %v2023_v1  ;;  %v458_v62 = vld [vmem:[%s2455_s30 + $0x3e8] sm:$0xff]  ;;  %v2008_v63 = vcombine.low %v433_v51, %v441_v52  ;;  %v2010_v1 = vcombine.low %v434_v53, %v442_v54  ;;  %v435_v52 = vld [vmem:[%s2455_s30 + $0x330] sm:$0xff]  ;;  %v436_v54 = vld [vmem:[%s2455_s30 + $0x338] sm:$0xff] }
  0xb6   : > { %v2027_v3 = vcombine.high %v450_v61, %v458_v62  ;;  %v443_v53 = vld [vmem:[%s2455_s30 + $0x370] sm:$0xff] }
  0xb8   : > { %1198 = vmatpush1.bf16.msra.mxu0 %v2020_v6  ;;  %1239 = vmatpush1.bf16.msra.mxu1 %v2022_v7  ;;  %v340_v6 = vld [vmem:[%s2455_s30 + $0x38] sm:$0xff] }
  0xb9   : > { %1265 = vmatprep.subr.bf16.mxu0 %v1913_v8  ;;  %1306 = vmatprep.subr.bf16.mxu1 %v1915_v9  ;;  %v348_v7 = vld [vmem:[%s2455_s30 + $0x78] sm:$0xff]  ;;  %v2024_v8 = vcombine.low %v449_v59, %v457_v60  ;;  %v2026_v9 = vcombine.low %v450_v61, %v458_v62  ;;  %v451_v60 = vld [vmem:[%s2455_s30 + $0x3b0] sm:$0xff] }
  0xba   : > { %v1919_v11 = vcombine.high %v340_v6, %v348_v7  ;;  %v459_v61 = vld [vmem:[%s2455_s30 + $0x3f0] sm:$0xff]  ;;  %v452_v62 = vld [vmem:[%s2455_s30 + $0x3b8] sm:$0xff] }
  0xbb   : > { %1216 = vmatmul.mubr.bf16.vlgmr.msra.gmra.mrb[4].mxu0 %v2517_v12  ;;  %1257 = vmatmul.mubr.bf16.vlgmr.msra.gmra.mrb[4].mxu1 %v2517_v12 }
  0xbc   : > { %1266 = vmatpush1.bf16.msra.mxu0 %v1912_v15  ;;  %1307 = vmatpush1.bf16.msra.mxu1 %v1914_v16  ;;  %v356_v15 = vld [vmem:[%s2455_s30 + $0xb8] sm:$0xff] }
  0xbd   : > { %1267 = vmatprep.subr.bf16.mxu0 %v1929_v17  ;;  %1308 = vmatprep.subr.bf16.mxu1 %v1931_v18  ;;  %v364_v16 = vld [vmem:[%s2455_s30 + $0xf8] sm:$0xff]  ;;  %v1916_v17 = vcombine.low %v339_v4, %v347_v5  ;;  %v1918_v18 = vcombine.low %v340_v6, %v348_v7  ;;  %v2028_v5 = vcombine.low %v451_v60, %v459_v61  ;;  %v1449_v7 = vlaneseq }
  0xbe   : > { %1297 = vmatprep.mubr.bf16.mxu0 %v2259_v0  ;;  %1338 = vmatprep.mubr.bf16.mxu1 %v2259_v0  ;;  %v1935_v20 = vcombine.high %v356_v15, %v364_v16 }
  0xc0   : > { %1268 = vmatpush1.bf16.msra.mxu0 %v1928_v23  ;;  %1309 = vmatpush1.bf16.msra.mxu1 %v1930_v24  ;;  %v372_v23 = vld [vmem:[%s2455_s30 + $0x138] sm:$0xff] }
  0xc1   : > { %1269 = vmatprep.subr.bf16.mxu0 %v1945_v25  ;;  %1310 = vmatprep.subr.bf16.mxu1 %v1947_v26  ;;  %v380_v24 = vld [vmem:[%s2455_s30 + $0x178] sm:$0xff]  ;;  %v1932_v25 = vcombine.low %v355_v13, %v363_v14  ;;  %v1934_v26 = vcombine.low %v356_v15, %v364_v16  ;;  %v2632_v14 = vld [vmem:[%s2466_s7] sm:$0xff] }
  0xc2   : > { %v1951_v28 = vcombine.high %v372_v23, %v380_v24 }
  0xc4   : > { %1270 = vmatpush1.bf16.msra.mxu0 %v1944_v31  ;;  %1311 = vmatpush1.bf16.msra.mxu1 %v1946_v32  ;;  %v388_v31 = vld [vmem:[%s2455_s30 + $0x1b8] sm:$0xff] }
  0xc5   : > { %1271 = vmatprep.subr.bf16.mxu0 %v1961_v33  ;;  %1312 = vmatprep.subr.bf16.mxu1 %v1963_v34  ;;  %v396_v32 = vld [vmem:[%s2455_s30 + $0x1f8] sm:$0xff]  ;;  %v1948_v33 = vcombine.low %v371_v21, %v379_v22  ;;  %v1950_v34 = vcombine.low %v372_v23, %v380_v24 }
  0xc6   : > { %v1967_v36 = vcombine.high %v388_v31, %v396_v32 }
  0xc8   : > { %1272 = vmatpush1.bf16.msra.mxu0 %v1960_v39  ;;  %1313 = vmatpush1.bf16.msra.mxu1 %v1962_v40  ;;  %v404_v39 = vld [vmem:[%s2455_s30 + $0x238] sm:$0xff] }
  0xc9   : > { %1273 = vmatprep.subr.bf16.mxu0 %v1977_v41  ;;  %1314 = vmatprep.subr.bf16.mxu1 %v1979_v42  ;;  %v412_v40 = vld [vmem:[%s2455_s30 + $0x278] sm:$0xff]  ;;  %v1964_v41 = vcombine.low %v387_v29, %v395_v30  ;;  %v1981_v42 = vcombine.high %v403_v37, %v411_v38 }
  0xca   : > { %v1983_v43 = vcombine.high %v404_v39, %v412_v40 }
  0xcc   : > { %1274 = vmatpush1.bf16.msra.mxu0 %v1976_v47  ;;  %1315 = vmatpush1.bf16.msra.mxu1 %v1978_v48  ;;  %v428_v47 = vld [vmem:[%s2455_s30 + $0x2f8] sm:$0xff]  ;;  %v1980_v48 = vcombine.low %v403_v37, %v411_v38 }
  0xcd   : > { %1275 = vmatprep.subr.bf16.mxu0 %v1993_v49  ;;  %1316 = vmatprep.subr.bf16.mxu1 %v1995_v50  ;;  %v1982_v49 = vcombine.low %v404_v39, %v412_v40  ;;  %v1997_v50 = vcombine.high %v419_v44, %v427_v45  ;;  %v1999_v51 = vcombine.high %v420_v46, %v428_v47 }
  0xd0   : > { %1276 = vmatpush1.bf16.msra.mxu0 %v1992_v55  ;;  %1317 = vmatpush1.bf16.msra.mxu1 %v1994_v56  ;;  %v444_v55 = vld [vmem:[%s2455_s30 + $0x378] sm:$0xff]  ;;  %v1996_v56 = vcombine.low %v419_v44, %v427_v45 }
  0xd1   : > { %1277 = vmatprep.subr.bf16.mxu0 %v2009_v57  ;;  %1318 = vmatprep.subr.bf16.mxu1 %v2011_v58  ;;  %v1998_v57 = vcombine.low %v420_v46, %v428_v47  ;;  %v2013_v58 = vcombine.high %v435_v52, %v443_v53  ;;  %v2015_v59 = vcombine.high %v436_v54, %v444_v55 }
  0xd4   : > { %1278 = vmatpush1.bf16.msra.mxu0 %v2008_v63  ;;  %1319 = vmatpush1.bf16.msra.mxu1 %v2010_v1  ;;  %v460_v63 = vld [vmem:[%s2455_s30 + $0x3f8] sm:$0xff]  ;;  %v2012_v1 = vcombine.low %v435_v52, %v443_v53 }
  0xd5   : > { %1279 = vmatprep.subr.bf16.mxu0 %v2025_v2  ;;  %1320 = vmatprep.subr.bf16.mxu1 %v2027_v3  ;;  %v2014_v2 = vcombine.low %v436_v54, %v444_v55  ;;  %v2029_v3 = vcombine.high %v451_v60, %v459_v61  ;;  %v2031_v4 = vcombine.high %v452_v62, %v460_v63 }
  0xd6   : > { %v2030_v6 = vcombine.low %v452_v62, %v460_v63 }
  0xd8   : > { %1280 = vmatpush1.bf16.msra.mxu0 %v2024_v8  ;;  %1321 = vmatpush1.bf16.msra.mxu1 %v2026_v9  ;;  %v1450_v8 = vshrl.u32 %v1449_v7, 7 }
  0xd9   : > { %1347 = vmatprep.subr.bf16.mxu0 %v1917_v10  ;;  %1388 = vmatprep.subr.bf16.mxu1 %v1919_v11  ;;  %v2625_v10 = vld [vmem:[%s273_s11 + $0x8] sm:$0xff] }
  0xda   : > { %v2621_v9 = vsub.s32 4, %v1450_v8  ;;  %v2629_v13 = vsub.s32 0, %v1450_v8  ;;  %v2634_v15 = vsub.s32 2, %v1450_v8  ;;  %v2636_v16 = vsub.s32 1, %v1450_v8 }
  0xdb   : > { %1298 = vmatmul.mubr.bf16.vlgmr.msra.gmra.mrb[8].mxu0 %v2517_v12  ;;  %1339 = vmatmul.mubr.bf16.vlgmr.msra.gmra.mrb[8].mxu1 %v2517_v12  ;;  %v2675_v54 = vsub.s32 6, %v1450_v8  ;;  %v2677_v55 = vsub.s32 5, %v1450_v8 }
  0xdc   : > { %1348 = vmatpush1.bf16.msra.mxu0 %v1916_v17  ;;  %1389 = vmatpush1.bf16.msra.mxu1 %v1918_v18  ;;  %v1600_v11 = vrot.slane %v2625_v10, %v2621_v9  ;;  %v2640_v17 = vld [vmem:[%s273_s11] sm:$0xff]  ;;  %v2260_v18 = vmov 1983009808   ;;  %v1460_v22 = vrot.slane %v2632_v14, %v2634_v15  ;;  %v1456_v23 = vrot.slane %v2632_v14, %v2636_v16 }
  0xdd   : > { %1349 = vmatprep.subr.bf16.mxu0 %v1933_v19  ;;  %1390 = vmatprep.subr.bf16.mxu1 %v1935_v20  ;;  %v1664_v19 = vunpack.c.l.s4 %v2260_v18  ;;  %v1452_v20 = vrot.slane %v2632_v14, %v2629_v13  ;;  %v1472_v60 = vrot.slane %v2632_v14, %v2677_v55  ;;  %v1568_v62 = vrot.slane %v2640_v17, %v2621_v9 }
  0xde   : > { %1379 = vmatprep.mubr.bf16.mxu0 %v2259_v0  ;;  %1420 = vmatprep.mubr.bf16.mxu1 %v2259_v0  ;;  %v1966_v0 = vcombine.low %v388_v31, %v396_v32  ;;  %v1556_v32 = vrot.slane %v2640_v17, %v2636_v16 }
  0xe0   : > { %1350 = vmatpush1.bf16.msra.mxu0 %v1932_v25  ;;  %1391 = vmatpush1.bf16.msra.mxu1 %v1934_v26  ;;  %v1552_v25 = vrot.slane %v2640_v17, %v2629_v13 }
  0xe1   : > { %1351 = vmatprep.subr.bf16.mxu0 %v1949_v27  ;;  %1392 = vmatprep.subr.bf16.mxu1 %v1951_v28  ;;  %v1560_v27 = vrot.slane %v2640_v17, %v2634_v15 }
  0xe4   : > { %1352 = vmatpush1.bf16.msra.mxu0 %v1948_v33  ;;  %1393 = vmatpush1.bf16.msra.mxu1 %v1950_v34  ;;  %v1665_v33 = vunpack.c.0.s8 %v1664_v19 }
  0xe5   : > { %1353 = vmatprep.subr.bf16.mxu0 %v1965_v35  ;;  %1394 = vmatprep.subr.bf16.mxu1 %v1967_v36 }
  0xe6   : > { %v2665_v47 = vsub.s32 %v1665_v33, %v1450_v8 }
  0xe8   : > { %1354 = vmatpush1.bf16.msra.mxu0 %v1964_v41  ;;  %1395 = vmatpush1.bf16.msra.mxu1 %v1966_v0 }
  0xe9   : > { %1355 = vmatprep.subr.bf16.mxu0 %v1981_v42  ;;  %1396 = vmatprep.subr.bf16.mxu1 %v1983_v43 }
  0xec   : > { %1356 = vmatpush1.bf16.msra.mxu0 %v1980_v48  ;;  %1397 = vmatpush1.bf16.msra.mxu1 %v1982_v49 }
  0xed   : > { %1357 = vmatprep.subr.bf16.mxu0 %v1997_v50  ;;  %1398 = vmatprep.subr.bf16.mxu1 %v1999_v51 }
  0xf0   : > { %1358 = vmatpush1.bf16.msra.mxu0 %v1996_v56  ;;  %1399 = vmatpush1.bf16.msra.mxu1 %v1998_v57  ;;  %v2679_v56 = vsub.s32 7, %v1450_v8  ;;  %v1468_v57 = vrot.slane %v2632_v14, %v2621_v9 }
  0xf1   : > { %1359 = vmatprep.subr.bf16.mxu0 %v2013_v58  ;;  %1400 = vmatprep.subr.bf16.mxu1 %v2015_v59  ;;  %v1476_v59 = vrot.slane %v2632_v14, %v2675_v54 }
  0xf4   : > { %1360 = vmatpush1.bf16.msra.mxu0 %v2012_v1  ;;  %1401 = vmatpush1.bf16.msra.mxu1 %v2014_v2  ;;  %v1480_v2 = vrot.slane %v2632_v14, %v2679_v56 }
  0xf5   : > { %1361 = vmatprep.subr.bf16.mxu0 %v2029_v3  ;;  %1402 = vmatprep.subr.bf16.mxu1 %v2031_v4  ;;  %v1576_v4 = vrot.slane %v2640_v17, %v2675_v54 }
  0xf8   : > { %1362 = vmatpush1.bf16.msra.mxu0 %v2028_v5  ;;  %1403 = vmatpush1.bf16.msra.mxu1 %v2030_v6  ;;  %v1572_v6 = vrot.slane %v2640_v17, %v2677_v55 }
  0xfb   : > { %1380 = vmatmul.mubr.bf16.vlgmr.msra.gmra.mrb[12].mxu0 %v2517_v12  ;;  %1421 = vmatmul.mubr.bf16.vlgmr.msra.gmra.mrb[12].mxu1 %v2517_v12  ;;  %v2638_v12 = vsub.s32 3, %v1450_v8 }
  0xfd   : > { %v1464_v29 = vrot.slane %v2632_v14, %v2638_v12  ;;  %v1564_v38 = vrot.slane %v2640_v17, %v2638_v12 }
 0x16e   : > { %v1135_v21 = vpop.f32.mrb[0].mxu0  ;;  %v1176_v26 = vpop.f32.mrb[0].mxu1 }
 0x16f   : > { %v1429_v24 = vmax.f32 %v1135_v21, 0.0  ;;  %v1137_v28 = vpop.f32.mrb[1].mxu0  ;;  %v1431_v30 = vmax.f32 %v1176_v26, 0.0  ;;  %v1178_v34 = vpop.f32.mrb[1].mxu1 }
 0x170   : > { %v1430_v31 = vmax.f32 %v1137_v28, 0.0  ;;  %v1139_v35 = vpop.f32.mrb[2].mxu0  ;;  %v1432_v37 = vmax.f32 %v1178_v34, 0.0  ;;  %v1180_v39 = vpop.f32.mrb[2].mxu1 }
 0x171   : > { %v1529_v36 = vmul.f32 %v1452_v20, %v1429_v24  ;;  %v1140_v40 = vpop.f32.mrb[3].mxu0  ;;  %v1531_v41 = vmul.f32 %v1460_v22, %v1431_v30  ;;  %v1181_v42 = vpop.f32.mrb[3].mxu1  ;;  %v1580_v20 = vrot.slane %v2640_v17, %v2679_v56  ;;  %v1446_v17 = vld [vmem:[%s2466_s7 + $0x8] sm:$0xff] }
 0x172   : > { %v1530_v0 = vmul.f32 %v1456_v23, %v1430_v31  ;;  %v1532_v44 = vmul.f32 %v1464_v29, %v1432_v37  ;;  %v1484_v35 = vrot.slane %v1446_v17, %v2629_v13  ;;  %v1492_v37 = vrot.slane %v1446_v17, %v2634_v15 }
 0x173   : > { %v1629_v43 = vadd.f32 %v1552_v25, %v1529_v36  ;;  %v1631_v45 = vadd.f32 %v1560_v27, %v1531_v41  ;;  %v1584_v40 = vrot.slane %v2625_v10, %v2629_v13  ;;  %v1496_v42 = vrot.slane %v1446_v17, %v2638_v12 }
 0x174   : > { %v1630_v46 = vadd.f32 %v1556_v32, %v1530_v0  ;;  %v1632_v48 = vadd.f32 %v1564_v38, %v1532_v44  ;;  %v1488_v38 = vrot.slane %v1446_v17, %v2636_v16  ;;  %v1592_v44 = vrot.slane %v2625_v10, %v2634_v15 }
 0x176   : > { %v1661_v49 = vcombine.low %v1629_v43, %v1630_v46  ;;  %v1662_v50 = vcombine.low %v1631_v45, %v1632_v48  ;;  %v1588_v46 = vrot.slane %v2625_v10, %v2636_v16 }
 0x178   : > { %v1669_v51 = vrot.slane %v1661_v49, %v2665_v47  ;;  %v1676_v52 = vrot.slane %v1662_v50, %v2665_v47 }
 0x17a   : > { %v1677_v53 = vcombine.low %v1669_v51, %v1676_v52  ;;  %v1596_v52 = vrot.slane %v2625_v10, %v2638_v12  ;;  %v1500_v12 = vrot.slane %v1446_v17, %v2621_v9 }
 0x17c   : > { %1733 = vst [vmem:[%s2672_s8] sm:$0xff] %v1677_v53 }
 0x18e   : > { %v1217_v58 = vpop.f32.mrb[4].mxu0  ;;  %v1258_v63 = vpop.f32.mrb[4].mxu1 }
 0x18f   : > { %v1433_v61 = vmax.f32 %v1217_v58, 0.0  ;;  %v1219_v1 = vpop.f32.mrb[5].mxu0  ;;  %v1435_v3 = vmax.f32 %v1258_v63, 0.0  ;;  %v1260_v7 = vpop.f32.mrb[5].mxu1 }
 0x190   : > { %v1434_v5 = vmax.f32 %v1219_v1, 0.0  ;;  %v1221_v8 = vpop.f32.mrb[6].mxu0  ;;  %v1436_v19 = vmax.f32 %v1260_v7, 0.0  ;;  %v1262_v21 = vpop.f32.mrb[6].mxu1  ;;  %v1504_v7 = vrot.slane %v1446_v17, %v2677_v55 }
 0x191   : > { %v1533_v18 = vmul.f32 %v1468_v57, %v1433_v61  ;;  %v1222_v22 = vpop.f32.mrb[7].mxu0  ;;  %v1535_v14 = vmul.f32 %v1476_v59, %v1435_v3  ;;  %v1263_v24 = vpop.f32.mrb[7].mxu1 }
 0x192   : > { %v1534_v23 = vmul.f32 %v1472_v60, %v1434_v5  ;;  %v1536_v26 = vmul.f32 %v1480_v2, %v1436_v19  ;;  %v1608_v22 = vrot.slane %v2625_v10, %v2675_v54 }
 0x193   : > { %v1633_v25 = vadd.f32 %v1568_v62, %v1533_v18  ;;  %v1635_v27 = vadd.f32 %v1576_v4, %v1535_v14 }
 0x194   : > { %v1634_v28 = vadd.f32 %v1572_v6, %v1534_v23  ;;  %v1636_v29 = vadd.f32 %v1580_v20, %v1536_v26  ;;  %v1508_v6 = vrot.slane %v1446_v17, %v2675_v54  ;;  %v1512_v20 = vrot.slane %v1446_v17, %v2679_v56 }
 0x195   : > { %v1604_v23 = vrot.slane %v2625_v10, %v2677_v55 }
 0x196   : > { %v1678_v30 = vcombine.low %v1633_v25, %v1634_v28  ;;  %v1679_v31 = vcombine.low %v1635_v27, %v1636_v29  ;;  %v1612_v28 = vrot.slane %v2625_v10, %v2679_v56 }
 0x198   : > { %v1686_v32 = vrot.slane %v1678_v30, %v2665_v47  ;;  %v1693_v33 = vrot.slane %v1679_v31, %v2665_v47 }
 0x19a   : > { %v1694_v34 = vcombine.low %v1686_v32, %v1693_v33 }
 0x19c   : > { %1734 = vst [vmem:[%s2672_s8 + $0x8] sm:$0xff] %v1694_v34 }
 0x1ae   : > { %v1299_v36 = vpop.f32.mrb[8].mxu0  ;;  %v1340_v41 = vpop.f32.mrb[8].mxu1 }
 0x1af   : > { %v1437_v39 = vmax.f32 %v1299_v36, 0.0  ;;  %v1301_v0 = vpop.f32.mrb[9].mxu0  ;;  %v1439_v43 = vmax.f32 %v1340_v41, 0.0  ;;  %v1342_v48 = vpop.f32.mrb[9].mxu1 }
 0x1b0   : > { %v1438_v45 = vmax.f32 %v1301_v0, 0.0  ;;  %v1303_v49 = vpop.f32.mrb[10].mxu0  ;;  %v1440_v51 = vmax.f32 %v1342_v48, 0.0  ;;  %v1344_v13 = vpop.f32.mrb[10].mxu1 }
 0x1b1   : > { %v1537_v50 = vmul.f32 %v1484_v35, %v1437_v39  ;;  %v1304_v53 = vpop.f32.mrb[11].mxu0  ;;  %v1539_v57 = vmul.f32 %v1492_v37, %v1439_v43  ;;  %v1345_v59 = vpop.f32.mrb[11].mxu1 }
 0x1b2   : > { %v1538_v58 = vmul.f32 %v1488_v38, %v1438_v45  ;;  %v1540_v61 = vmul.f32 %v1496_v42, %v1440_v51 }
 0x1b3   : > { %v1637_v60 = vadd.f32 %v1584_v40, %v1537_v50  ;;  %v1639_v15 = vadd.f32 %v1592_v44, %v1539_v57 }
 0x1b4   : > { %v1638_v62 = vadd.f32 %v1588_v46, %v1538_v58  ;;  %v1640_v63 = vadd.f32 %v1596_v52, %v1540_v61 }
 0x1b6   : > { %v1695_v1 = vcombine.low %v1637_v60, %v1638_v62  ;;  %v1696_v16 = vcombine.low %v1639_v15, %v1640_v63 }
 0x1b8   : > { %v1703_v2 = vrot.slane %v1695_v1, %v2665_v47  ;;  %v1710_v3 = vrot.slane %v1696_v16, %v2665_v47 }
 0x1ba   : > { %v1711_v4 = vcombine.low %v1703_v2, %v1710_v3 }
 0x1bc   : > { %1735 = vst [vmem:[%s2672_s8 + $0x10] sm:$0xff] %v1711_v4 }
 0x1ce   : > { %v1381_v5 = vpop.f32.mrb[12].mxu0  ;;  %v1422_v18 = vpop.f32.mrb[12].mxu1 }
 0x1cf   : > { %v1441_v8 = vmax.f32 %v1381_v5, 0.0  ;;  %v1383_v19 = vpop.f32.mrb[13].mxu0  ;;  %v1443_v21 = vmax.f32 %v1422_v18, 0.0  ;;  %v1424_v24 = vpop.f32.mrb[13].mxu1 }
 0x1d0   : > { %v1442_v14 = vmax.f32 %v1383_v19, 0.0  ;;  %v1385_v25 = vpop.f32.mrb[14].mxu0  ;;  %v1444_v27 = vmax.f32 %v1424_v24, 0.0  ;;  %v1426_v29 = vpop.f32.mrb[14].mxu1 }
 0x1d1   : > { %v1541_v26 = vmul.f32 %v1500_v12, %v1441_v8  ;;  %v1386_v30 = vpop.f32.mrb[15].mxu0  ;;  %v1543_v31 = vmul.f32 %v1508_v6, %v1443_v21  ;;  %v1427_v33 = vpop.f32.mrb[15].mxu1 }
 0x1d2   : > { %v1542_v32 = vmul.f32 %v1504_v7, %v1442_v14  ;;  %v1544_v34 = vmul.f32 %v1512_v20, %v1444_v27 }
 0x1d3   : > { %v1641_v54 = vadd.f32 %v1600_v11, %v1541_v26  ;;  %v1643_v17 = vadd.f32 %v1608_v22, %v1543_v31 }
 0x1d4   : > { %v1642_v55 = vadd.f32 %v1604_v23, %v1542_v32  ;;  %v1644_v35 = vadd.f32 %v1612_v28, %v1544_v34 }
 0x1d6   : > { %v1712_v36 = vcombine.low %v1641_v54, %v1642_v55  ;;  %v1713_v37 = vcombine.low %v1643_v17, %v1644_v35 }
 0x1d8   : > { %v1720_v38 = vrot.slane %v1712_v36, %v2665_v47  ;;  %v1727_v56 = vrot.slane %v1713_v37, %v2665_v47 }
 0x1da   : > { %v1728_v39 = vcombine.low %v1720_v38, %v1727_v56 }
 0x1dc   : > { %1736 = vst [vmem:[%s2672_s8 + $0x18] sm:$0xff] %v1728_v39 }
 0x1dd PF: > { %s20_s20 = sadd.s32 1, %s2251_s20   ;;  %s2775_s21 = sld [smem:[#allocation9_spill]] }
 0x1de   : > { %p17_p1 = scmp.ge.s32.totalorder %s20_s20, 4   ;;  %s2776_s15 = smov %s2235_s16 }
 0x1df   : > { %s2777_s16 = smov %s2239_s17  ;;  %s2778_s17 = smov %s2333_s26 }
 0x1e0   : > { %s2779_s18 = smov %s2247_s19  ;;  %19 = sbr.rel (!%p17_p1) target bundleno = 9 (0x9), region = 103 }
 0x1e3   : > { %s2780_s19 = smov %s2775_s21 }
 0x1e7   :  { %1767 = vsyncpa [#allocation3], 1 }
 0x1e8   :  { %1769 = vsyncpa [#allocation3 + $0x1], 1 }
 0x1e9   :  { %1770 = vsyncpa [#allocation5], 1 }
 0x1ea   :  { %1772 = vsyncpa [#allocation5 + $0x1], 1 }

// kernel: position_gan_forward.5
= control target key start
LH: loop header
LB: loop body
LE: loop exit
PB: predicated region body
PF: predicated region fallthrough
CT: control target
= control target key end

     0   :  { %s4785_s0 = inlined_call_operand.vmem [shape: bf16[32,2304], index: 0, kind: input, shape index: {}]   ;;  %s4786_s1 = inlined_call_operand.hbm [shape: bf16[2304,512], index: 1, kind: input, shape index: {}]   ;;  %s4787_s2 = inlined_call_operand.hbm [shape: f32[1,512], index: 2, kind: input, shape index: {}]   ;;  %s4788_s3 = inlined_call_operand.hbm [shape: f32[1,512], index: 3, kind: input, shape index: {}]   ;;  %s4789_s4 = inlined_call_operand.vmem [shape: f32[32,512], index: 4, kind: output, shape index: {}]  }
   0x1   :  { %4795 = sst [smem:[#allocation13_spill]] %s4786_s1 }
   0x2   :  { %4796 = sst [smem:[#allocation14_spill]] %s4787_s2 }
   0x3   :  { %9 = vsyncpa [#allocation3], 0 }
   0x4   :  { %11 = vsyncpa [#allocation3 + $0x1], 0 }
   0x5   :  { %12 = vsyncpa [#allocation5], 0 }
   0x6   :  { %14 = vsyncpa [#allocation5 + $0x1], 0  ;;  %s4160_s15 = smov 0   ;;  %s4162_s16 = smov 0  }
   0x7   :  { %s4164_s17 = smov 0   ;;  %s4166_s18 = smov 0  }
   0x8   :  { %s4168_s19 = smov 0   ;;  %s4170_s20 = smov 0  }
   0x9 LB: > { %4797 = sst [smem:[#allocation10_spill]] %s4123_s19  ;;  %s4189_s21 = sadd.s32 4294967295, %s4127_s20   ;;  %s4127_s20 = sphi %s4170_s20, %s20_s20   ;;  %s4123_s19 = sphi %s4168_s19, %s4815_s19   ;;  %s4119_s18 = sphi %s4166_s18, %s4819_s18   ;;  %s4115_s17 = sphi %s4164_s17, %s4818_s17   ;;  %s4111_s16 = sphi %s4162_s16, %s4817_s16   ;;  %s4107_s15 = sphi %s4160_s15, %s4816_s15  }
   0xa   : > { %s29_s22 = sadd.s32 1, %s4123_s19  ;;  %s65_s23 = sadd.s32 1, %s4115_s17 }
   0xb   : > { %p30_p0 = scmp.ge.s32.totalorder %s29_s22, 2  ;;  %p72_p1 = scmp.ne.s32.totalorder %s4115_s17, %s4111_s16 }
   0xc   : > { %p73_p2 = scmp.eq.s32.totalorder %s4127_s20, 0  ;;  %p78_p4 = scmp.ne.s32.totalorder %s4111_s16, %s4107_s15 }
   0xd   : > { %s4821_s22 = smov (%p30_p0, %s29_s22), 0  ;;  %p79_p5 = scmp.eq.s32.totalorder %s4189_s21, 0 }
   0xe   : > { %4798 = sst [smem:[#allocation11_spill]] %s4821_s22  ;;  %p4198_p3 = por %p73_p2, %p72_p1 }
   0xf   : > { %s62_s25 = ssub.s32 %s4123_s19, %s4821_s22  ;;  %p156_p7 = scmp.eq.s32.totalorder %s4189_s21, 1 }
  0x10   : > { %p63_p6 = scmp.eq.s32.totalorder %s62_s25, 0  ;;  %p4207_p8 = por %p79_p5, %p78_p4 }
  0x11   : > { %p4214_p9 = por %p156_p7, %p72_p1  ;;  %p3445_p10 = scmp.lt.s32.totalorder %s4127_s20, 2 }
  0x12   : > { %s4800_s26 = scalar_select %p4207_p8, 1, 0 }
  0x13   : > { %s4212_s27 = scalar_select %p63_p6, %s4115_s17, %s65_s23  }
  0x14   : > { %s4802_s28 = scalar_select %p4214_p9, 1, 0 }
  0x15   : > { %4801 = sst [smem:[#allocation12_spill]] %s4212_s27  ;;  %s4220_s29 = sand.u32 1, %s4115_s17  }
  0x16   : > { %s213_s30 = sand.u32 1, %s4127_s20   ;;  %s3427_s5 = smul.u32 2304, %s4220_s29 }
  0x17   : > { %p4226_p11 = pnand %p3445_p10, %p4198_p3  ;;  %s4791_s7 = sshll.u32 %s4220_s29, 1 }
  0x18   : > { %s196_s8 = scalar_lea.vmem [#allocation2], %s3427_s5  ;;  %s3328_s10 = sshll.u32 %s4123_s19, 5 }
  0x19   : > { %s4803_s6 = scalar_select %p4226_p11, 1, 0 }
  0x1a   : > { %s203_s9 = sshll.u32 %s196_s8, 4  ;;  %s217_s11 = scalar_lea.vmem [#allocation4], %s4791_s7  ;;  %s4231_s9 = int_to_ptr.vmem [resolvable:$true] %s203_s9 }
  0x1b   : > { %s225_s12 = sshll.u32 %s217_s11, 4  ;;  %s4804_s2 = sld [smem:[#allocation14_spill]]  ;;  %s4243_s12 = int_to_ptr.vmem [resolvable:$true] %s225_s12 }
  0x1c   : > { %s4245_s23 = scalar_lea.sflag [#allocation5], %s213_s30  ;;  %p4251_p13 = pneg %p4226_p11 }
  0x21   : > { %s4241_s15 = scalar_lea.hbm %s4804_s2, %s3328_s10  ;;  %s3988_s11 = scalar_lea.hbm %s4804_s2, 64 }
  0x22   : > { %s3983_s24 = scalar_lea.hbm %s4241_s15, 32  ;;  %p3989_p2 = scmp.lt.u32.totalorder %s4241_s15, %s4804_s2 }
  0x23   : > { %p3984_p12 = scmp.ne.s32.totalorder %s4241_s15, %s3983_s24  ;;  %p3990_p3 = scmp.lt.u32.totalorder %s3988_s11, %s3983_s24 }
  0x24   : > { %p3992_p5 = scmp.lt.u32.totalorder %s3983_s24, %s4241_s15 }
  0x25   : > { %p3986_p0 = pnand %p4251_p13, %p3984_p12  ;;  %p3991_p4 = por %p3990_p3, %p3989_p2 }
  0x27   : > { %p3987_p1 = pneg %p3986_p0  ;;  %p3993_p6 = por %p3992_p5, %p3991_p4 }
  0x29   : > { %p3994_p7 = pnand %p3993_p6, %p3987_p1 }
  0x2b   : > { %3997 = shalt.err (!%p3994_p7)
}
  0x2c   : > { %s3998_s30 = scalar_lea.vmem %s4243_s12, 32  ;;  %s4129_s5 = smov [#allocation4]  }
  0x2d   : > { %p3999_p10 = scmp.ne.s32.totalorder %s4243_s12, %s3998_s30  ;;  %s4003_s8 = sshll.u32 %s4129_s5, 4  ;;  %s4004_s8 = int_to_ptr.vmem [resolvable:$false] %s4003_s8 }
  0x2e   : > { %s4005_s13 = scalar_lea.vmem %s4004_s8, 64  ;;  %p4006_p9 = scmp.lt.s32.totalorder %s4243_s12, %s4004_s8 }
  0x2f   : > { %p4001_p12 = pnand %p3999_p10, %p4251_p13  ;;  %p4007_p8 = scmp.lt.s32.totalorder %s4005_s13, %s3998_s30 }
  0x31   : > { %p4002_p0 = pneg %p4001_p12  ;;  %p4008_p2 = por %p4007_p8, %p4006_p9 }
  0x33   : > { %p4009_p3 = pnand %p4008_p2, %p4002_p0 }
  0x35   : > { %4012 = shalt.err (!%p4009_p3)
}
  0x36   : > { %3441 = dma.hbm_to_vmem [thread:$0]  (!%p4226_p11), %s4241_s15, 32, %s4243_s12, %s4245_s23  }
  0x37   : > { %s4280_s14 = scalar_lea.hbm %s4788_s3, %s3328_s10  ;;  %p2994_p8 = scmp.ge.s32.totalorder %s4127_s20, 1 }
  0x38   : > { %p249_p9 = scmp.lt.s32.totalorder %s4127_s20, 3  ;;  %s3327_s30 = sshll.u32 %s4123_s19, 7 }
  0x39   : > { %s4807_s1 = sld [smem:[#allocation13_spill]]  ;;  %s193_s12 = scalar_lea.sflag [#allocation3], %s4220_s29 }
  0x3a   : > { %p4285_p1 = pnand %p2994_p8, %p249_p9 }
  0x3c   : > { %s4806_s5 = scalar_select %p4285_p1, 1, 0 }
  0x3f   : > { %s4292_s7 = scalar_lea.hbm %s4807_s1, %s3327_s30  ;;  %s4018_s11 = scalar_lea.hbm %s4807_s1, 73728 }
  0x40   : > { %s4013_s15 = scalar_lea.hbm %s4292_s7, 36864  ;;  %p4019_p7 = scmp.lt.u32.totalorder %s4292_s7, %s4807_s1 }
  0x41   : > { %p4014_p4 = scmp.ne.s32.totalorder %s4292_s7, %s4013_s15  ;;  %p4020_p10 = scmp.lt.u32.totalorder %s4018_s11, %s4013_s15 }
  0x42   : > { %p4022_p0 = scmp.lt.u32.totalorder %s4013_s15, %s4292_s7 }
  0x43   : > { %p4016_p5 = pnand %p4014_p4, %p4251_p13  ;;  %p4021_p12 = por %p4020_p10, %p4019_p7 }
  0x45   : > { %p4017_p6 = pneg %p4016_p5  ;;  %p4023_p2 = por %p4022_p0, %p4021_p12 }
  0x47   : > { %p4024_p3 = pnand %p4023_p2, %p4017_p6 }
  0x49   : > { %4027 = shalt.err (!%p4024_p3)
}
  0x4a   : > { %s4028_s30 = scalar_lea.vmem %s4231_s9, 36864  ;;  %s4130_s8 = smov [#allocation2]  }
  0x4b   : > { %p4029_p8 = scmp.ne.s32.totalorder %s4231_s9, %s4028_s30  ;;  %s4033_s13 = sshll.u32 %s4130_s8, 4  ;;  %s4034_s13 = int_to_ptr.vmem [resolvable:$false] %s4033_s13 }
  0x4c   : > { %s4035_s2 = scalar_lea.vmem %s4034_s13, 73728  ;;  %p4036_p5 = scmp.lt.s32.totalorder %s4231_s9, %s4034_s13 }
  0x4d   : > { %p4031_p9 = pnand %p4029_p8, %p4251_p13  ;;  %p4037_p1 = scmp.lt.s32.totalorder %s4035_s2, %s4028_s30 }
  0x4f   : > { %p4032_p4 = pneg %p4031_p9  ;;  %p4038_p7 = por %p4037_p1, %p4036_p5 }
  0x51   : > { %p4039_p10 = pnand %p4038_p7, %p4032_p4 }
  0x53   : > { %4042 = shalt.err (!%p4039_p10)
}
  0x54   : > { %s4131_s22 = smov 256   ;;  %s4132_s15 = smov 128  }
  0x55   : > { %s4133_s10 = smov 8   ;;  %s4808_s24 = sshll.u32 %s4220_s29, 1 }
  0x56   : > { %3438 = dma.hbm_to_vmem [thread:$0]  (!%p4226_p11), %s4292_s7, 36864, %s4231_s9, %s193_s12, %s4131_s22, %s4132_s15, %s4133_s10  }
  0x57   : > { %s236_s11 = scalar_lea.vmem [#allocation6], %s4808_s24  ;;  %s4043_s8 = scalar_lea.hbm %s4280_s14, 32 }
  0x58   : > { %s244_s30 = sshll.u32 %s236_s11, 4  ;;  %p4044_p1 = scmp.ne.s32.totalorder %s4280_s14, %s4043_s8  ;;  %s245_s30 = int_to_ptr.vmem [resolvable:$true] %s244_s30 }
  0x59   : > { %s4048_s1 = scalar_lea.hbm %s4788_s3, 64  ;;  %p4049_p0 = scmp.lt.u32.totalorder %s4280_s14, %s4788_s3 }
  0x5a   : > { %p4046_p6 = pnand %p4044_p1, %p4251_p13  ;;  %p4050_p2 = scmp.lt.u32.totalorder %s4048_s1, %s4043_s8 }
  0x5b   : > { %p4052_p8 = scmp.lt.u32.totalorder %s4043_s8, %s4280_s14 }
  0x5c   : > { %p4047_p12 = pneg %p4046_p6  ;;  %p4051_p3 = por %p4050_p2, %p4049_p0 }
  0x5e   : > { %p4053_p9 = por %p4052_p8, %p4051_p3 }
  0x60   : > { %p4054_p4 = pnand %p4053_p9, %p4047_p12 }
  0x62   : > { %4057 = shalt.err (!%p4054_p4)
}
  0x63   : > { %s4058_s29 = scalar_lea.vmem %s245_s30, 32  ;;  %s4134_s7 = smov [#allocation6]  }
  0x64   : > { %p4059_p5 = scmp.ne.s32.totalorder %s245_s30, %s4058_s29  ;;  %s4063_s9 = sshll.u32 %s4134_s7, 4  ;;  %s4064_s9 = int_to_ptr.vmem [resolvable:$false] %s4063_s9 }
  0x65   : > { %s4065_s12 = scalar_lea.vmem %s4064_s9, 64  ;;  %p4066_p1 = scmp.lt.s32.totalorder %s245_s30, %s4064_s9 }
  0x66   : > { %p4061_p7 = pnand %p4059_p5, %p4251_p13  ;;  %p4067_p6 = scmp.lt.s32.totalorder %s4065_s12, %s4058_s29 }
  0x68   : > { %p4062_p10 = pneg %p4061_p7  ;;  %p4068_p11 = por %p4067_p6, %p4066_p1 }
  0x6a   : > { %p4069_p0 = pnand %p4068_p11, %p4062_p10 }
  0x6c   : > { %4072 = shalt.err (!%p4069_p0)
}
  0x6d   : > { %p4809_p2 = scmp.ne.s32.totalorder %s4803_s6, 0  ;;  %p4810_p12 = scmp.ne.s32.totalorder %s4806_s5, 0 }
  0x6e   : > { %s4341_s1 = sand.u32 (!%p4810_p12), 1, %s4111_s16   ;;  %p4811_p11 = scmp.ne.s32.totalorder (!%p4810_p12), %s4800_s26, 0 }
  0x6f   : > { %3444 = dma.hbm_to_vmem [thread:$0]  (!%p4809_p2), %s4280_s14, 32, %s245_s30, %s4245_s23  }
  0x70   : > { %253 = sbr.rel (%p4810_p12) target bundleno = 677 (0x2a5), region = 36  ;;  %s256_s27 = scalar_lea.sflag (!%p4810_p12), [#allocation3], %s4341_s1 }
  0x71   : > { %s3428_s19 = smul.u32 (!%p4810_p12), 2304, %s4341_s1 }
  0x73   : > { %s4345_s25 = scalar_lea.vmem (!%p4810_p12), [#allocation2], %s3428_s19 }
  0x77   : > { %4098 = dma.done.wait (%p4811_p11), %s256_s27, 36864  }
  0x78   : > { %4100 = vsyncadd (%p4811_p11), %s256_s27, 4294930432  ;;  %s264_s6 = sand.u32 1, %s4189_s21   ;;  %s2995_s23 = sshll.u32 %s4341_s1, 1 }
  0x79   : > { %s265_s14 = scalar_lea.sflag [#allocation5], %s264_s6  ;;  %s4355_s5 = scalar_lea.vmem [#allocation4], %s2995_s23 }
  0x7a   : > { %4102 = dma.done.wait (%p4811_p11), %s265_s14, 64  }
  0x7b   : > { %4104 = vsyncadd (%p4811_p11), %s265_s14, 4294967232  ;;  %v3497_v0 = vld [vmem:[%s4345_s25 + $0x4] ss:$8 sps:$4 sm:$0xff]   ;;  %v3501_v2 = vld [vmem:[%s4345_s25] ss:$8 sps:$4 sm:$0xff]   ;;  %s2997_s19 = sshll.u32 %s4341_s1, 6 }
  0x7c   : > { %v3499_v1 = vld [vmem:[%s4345_s25 + $0x404] ss:$8 sps:$4 sm:$0xff]   ;;  %2273 = vmatprep.subr.bf16.mxu1 %v3497_v0  ;;  %v3502_v3 = vld [vmem:[%s4345_s25 + $0x400] ss:$8 sps:$4 sm:$0xff]   ;;  %v3503_v4 = vld [vmem:[%s4345_s25 + $0x14] ss:$8 sps:$4 sm:$0xff]  }
  0x7d   : > { %2485 = vmatprep.subr.bf16.mxu0 %v3499_v1  ;;  %2274 = vmatpush1.bf16.msra.mxu1 %v3501_v2  ;;  %v3505_v5 = vld [vmem:[%s4345_s25 + $0x414] ss:$8 sps:$4 sm:$0xff]   ;;  %v3507_v6 = vld [vmem:[%s4345_s25 + $0x10] ss:$8 sps:$4 sm:$0xff]   ;;  %v3509_v8 = vld [vmem:[%s4345_s25 + $0x24] ss:$8 sps:$4 sm:$0xff]  }
  0x7e   : > { %2486 = vmatpush1.bf16.msra.mxu0 %v3502_v3  ;;  %2275 = vmatprep.subr.bf16.mxu1 %v3503_v4  ;;  %v3508_v7 = vld [vmem:[%s4345_s25 + $0x410] ss:$8 sps:$4 sm:$0xff]   ;;  %v3511_v9 = vld [vmem:[%s4345_s25 + $0x424] ss:$8 sps:$4 sm:$0xff]   ;;  %v3513_v10 = vld [vmem:[%s4345_s25 + $0x20] ss:$8 sps:$4 sm:$0xff]  }
  0x7f   : > { %2487 = vmatprep.subr.bf16.mxu0 %v3505_v5  ;;  %v3514_v11 = vld [vmem:[%s4345_s25 + $0x420] ss:$8 sps:$4 sm:$0xff]   ;;  %v3515_v12 = vld [vmem:[%s4345_s25 + $0x34] ss:$8 sps:$4 sm:$0xff]   ;;  %v3519_v14 = vld [vmem:[%s4345_s25 + $0x30] ss:$8 sps:$4 sm:$0xff]  }
  0x80   : > { %v3517_v13 = vld [vmem:[%s4345_s25 + $0x434] ss:$8 sps:$4 sm:$0xff]   ;;  %v3520_v15 = vld [vmem:[%s4345_s25 + $0x430] ss:$8 sps:$4 sm:$0xff]   ;;  %v3521_v16 = vld [vmem:[%s4345_s25 + $0x44] ss:$8 sps:$4 sm:$0xff]  }
  0x81   : > { %2276 = vmatpush1.bf16.msra.mxu1 %v3507_v6  ;;  %v3523_v17 = vld [vmem:[%s4345_s25 + $0x444] ss:$8 sps:$4 sm:$0xff]   ;;  %v3525_v18 = vld [vmem:[%s4345_s25 + $0x40] ss:$8 sps:$4 sm:$0xff]   ;;  %v3527_v20 = vld [vmem:[%s4345_s25 + $0x54] ss:$8 sps:$4 sm:$0xff]  }
  0x82   : > { %2488 = vmatpush1.bf16.msra.mxu0 %v3508_v7  ;;  %2277 = vmatprep.subr.bf16.mxu1 %v3509_v8  ;;  %v3526_v19 = vld [vmem:[%s4345_s25 + $0x440] ss:$8 sps:$4 sm:$0xff]   ;;  %v3529_v21 = vld [vmem:[%s4345_s25 + $0x454] ss:$8 sps:$4 sm:$0xff]   ;;  %v3531_v22 = vld [vmem:[%s4345_s25 + $0x50] ss:$8 sps:$4 sm:$0xff]  }
  0x83   : > { %2489 = vmatprep.subr.bf16.mxu0 %v3511_v9  ;;  %v3532_v23 = vld [vmem:[%s4345_s25 + $0x450] ss:$8 sps:$4 sm:$0xff]   ;;  %v3533_v24 = vld [vmem:[%s4345_s25 + $0x64] ss:$8 sps:$4 sm:$0xff]   ;;  %v3537_v26 = vld [vmem:[%s4345_s25 + $0x60] ss:$8 sps:$4 sm:$0xff]  }
  0x84   : > { %v3535_v25 = vld [vmem:[%s4345_s25 + $0x464] ss:$8 sps:$4 sm:$0xff]   ;;  %v3538_v27 = vld [vmem:[%s4345_s25 + $0x460] ss:$8 sps:$4 sm:$0xff]   ;;  %v3539_v28 = vld [vmem:[%s4345_s25 + $0x74] ss:$8 sps:$4 sm:$0xff]  }
  0x85   : > { %2278 = vmatpush1.bf16.msra.mxu1 %v3513_v10  ;;  %v3541_v29 = vld [vmem:[%s4345_s25 + $0x474] ss:$8 sps:$4 sm:$0xff]   ;;  %v3543_v30 = vld [vmem:[%s4345_s25 + $0x70] ss:$8 sps:$4 sm:$0xff]   ;;  %v3545_v32 = vld [vmem:[%s4345_s25 + $0x84] ss:$8 sps:$4 sm:$0xff]  }
  0x86   : > { %2490 = vmatpush1.bf16.msra.mxu0 %v3514_v11  ;;  %2279 = vmatprep.subr.bf16.mxu1 %v3515_v12  ;;  %v3544_v31 = vld [vmem:[%s4345_s25 + $0x470] ss:$8 sps:$4 sm:$0xff]   ;;  %v3547_v33 = vld [vmem:[%s4345_s25 + $0x484] ss:$8 sps:$4 sm:$0xff]   ;;  %v3549_v34 = vld [vmem:[%s4345_s25 + $0x80] ss:$8 sps:$4 sm:$0xff]  }
  0x87   : > { %2491 = vmatprep.subr.bf16.mxu0 %v3517_v13  ;;  %v3550_v35 = vld [vmem:[%s4345_s25 + $0x480] ss:$8 sps:$4 sm:$0xff]   ;;  %v3551_v36 = vld [vmem:[%s4345_s25 + $0x94] ss:$8 sps:$4 sm:$0xff]   ;;  %v3555_v38 = vld [vmem:[%s4345_s25 + $0x90] ss:$8 sps:$4 sm:$0xff]  }
  0x88   : > { %v3553_v37 = vld [vmem:[%s4345_s25 + $0x494] ss:$8 sps:$4 sm:$0xff]   ;;  %v3556_v39 = vld [vmem:[%s4345_s25 + $0x490] ss:$8 sps:$4 sm:$0xff]   ;;  %v3557_v40 = vld [vmem:[%s4345_s25 + $0xa4] ss:$8 sps:$4 sm:$0xff]  }
  0x89   : > { %2280 = vmatpush1.bf16.msra.mxu1 %v3519_v14  ;;  %v3559_v41 = vld [vmem:[%s4345_s25 + $0x4a4] ss:$8 sps:$4 sm:$0xff]   ;;  %v3561_v42 = vld [vmem:[%s4345_s25 + $0xa0] ss:$8 sps:$4 sm:$0xff]   ;;  %v3563_v44 = vld [vmem:[%s4345_s25 + $0xb4] ss:$8 sps:$4 sm:$0xff]  }
  0x8a   : > { %2492 = vmatpush1.bf16.msra.mxu0 %v3520_v15  ;;  %2281 = vmatprep.subr.bf16.mxu1 %v3521_v16  ;;  %v3562_v43 = vld [vmem:[%s4345_s25 + $0x4a0] ss:$8 sps:$4 sm:$0xff]   ;;  %v3565_v45 = vld [vmem:[%s4345_s25 + $0x4b4] ss:$8 sps:$4 sm:$0xff]   ;;  %v3567_v46 = vld [vmem:[%s4345_s25 + $0xb0] ss:$8 sps:$4 sm:$0xff]  }
  0x8b   : > { %2493 = vmatprep.subr.bf16.mxu0 %v3523_v17  ;;  %v3568_v47 = vld [vmem:[%s4345_s25 + $0x4b0] ss:$8 sps:$4 sm:$0xff]   ;;  %v3595_v48 = vld [vmem:[%s4785_s0 + $0x4] ss:$72 sps:$4 sm:$0xff]   ;;  %v3573_v52 = vld [vmem:[%s4345_s25 + $0xc0] ss:$8 sps:$4 sm:$0xff]  }
  0x8c   : > { %v3569_v49 = vld [vmem:[%s4345_s25 + $0xc4] ss:$8 sps:$4 sm:$0xff]   ;;  %2305 = vmatprep.mubr.bf16.mxu1 %v3595_v48  ;;  %v3574_v53 = vld [vmem:[%s4345_s25 + $0x4c0] ss:$8 sps:$4 sm:$0xff]   ;;  %v3575_v54 = vld [vmem:[%s4345_s25 + $0xd4] ss:$8 sps:$4 sm:$0xff]  }
  0x8d   : > { %2282 = vmatpush1.bf16.msra.mxu1 %v3525_v18  ;;  %v3571_v50 = vld [vmem:[%s4345_s25 + $0x4c4] ss:$8 sps:$4 sm:$0xff]   ;;  %v3577_v55 = vld [vmem:[%s4345_s25 + $0x4d4] ss:$8 sps:$4 sm:$0xff]   ;;  %v3579_v56 = vld [vmem:[%s4345_s25 + $0xd0] ss:$8 sps:$4 sm:$0xff]  }
  0x8e   : > { %2494 = vmatpush1.bf16.msra.mxu0 %v3526_v19  ;;  %2283 = vmatprep.subr.bf16.mxu1 %v3527_v20  ;;  %v3601_v51 = vld [vmem:[%s4785_s0 + $0x24] ss:$72 sps:$4 sm:$0xff]   ;;  %v3580_v57 = vld [vmem:[%s4345_s25 + $0x4d0] ss:$8 sps:$4 sm:$0xff]   ;;  %v3585_v60 = vld [vmem:[%s4345_s25 + $0xe0] ss:$8 sps:$4 sm:$0xff]  }
  0x8f   : > { %2495 = vmatprep.subr.bf16.mxu0 %v3529_v21  ;;  %2517 = vmatprep.mubr.bf16.mxu0 %v3601_v51  ;;  %v3581_v58 = vld [vmem:[%s4345_s25 + $0xe4] ss:$8 sps:$4 sm:$0xff]   ;;  %v3586_v61 = vld [vmem:[%s4345_s25 + $0x4e0] ss:$8 sps:$4 sm:$0xff]   ;;  %v3587_v62 = vld [vmem:[%s4345_s25 + $0xf4] ss:$8 sps:$4 sm:$0xff]  }
  0x90   : > { %v3583_v59 = vld [vmem:[%s4345_s25 + $0x4e4] ss:$8 sps:$4 sm:$0xff]   ;;  %v3589_v63 = vld [vmem:[%s4345_s25 + $0x4f4] ss:$8 sps:$4 sm:$0xff]   ;;  %v3591_v0 = vld [vmem:[%s4345_s25 + $0xf0] ss:$8 sps:$4 sm:$0xff]  }
  0x91   : > { %2284 = vmatpush1.bf16.msra.mxu1 %v3531_v22  ;;  %v3592_v1 = vld [vmem:[%s4345_s25 + $0x4f0] ss:$8 sps:$4 sm:$0xff]   ;;  %v3598_v2 = vld [vmem:[%s4345_s25 + $0x104] ss:$8 sps:$4 sm:$0xff]   ;;  %v3593_v4 = vld [vmem:[%s4785_s0] ss:$72 sps:$4 sm:$0xff]  }
  0x92   : > { %2496 = vmatpush1.bf16.msra.mxu0 %v3532_v23  ;;  %2285 = vmatprep.subr.bf16.mxu1 %v3533_v24  ;;  %v3604_v3 = vld [vmem:[%s4345_s25 + $0x504] ss:$8 sps:$4 sm:$0xff]   ;;  %v3596_v5 = vld [vmem:[%s4345_s25 + $0x100] ss:$8 sps:$4 sm:$0xff]   ;;  %v3607_v8 = vld [vmem:[%s4345_s25 + $0x114] ss:$8 sps:$4 sm:$0xff]  }
  0x93   : > { %2497 = vmatprep.subr.bf16.mxu0 %v3535_v25  ;;  %v3599_v6 = vld [vmem:[%s4785_s0 + $0x20] ss:$72 sps:$4 sm:$0xff]   ;;  %v3610_v9 = vld [vmem:[%s4345_s25 + $0x514] ss:$8 sps:$4 sm:$0xff]   ;;  %v3605_v10 = vld [vmem:[%s4345_s25 + $0x110] ss:$8 sps:$4 sm:$0xff]  }
  0x94   : > { %v3602_v7 = vld [vmem:[%s4345_s25 + $0x500] ss:$8 sps:$4 sm:$0xff]   ;;  %v3608_v11 = vld [vmem:[%s4345_s25 + $0x510] ss:$8 sps:$4 sm:$0xff]   ;;  %v3613_v12 = vld [vmem:[%s4345_s25 + $0x124] ss:$8 sps:$4 sm:$0xff]  }
  0x95   : > { %2286 = vmatpush1.bf16.msra.mxu1 %v3537_v26  ;;  %v3616_v13 = vld [vmem:[%s4345_s25 + $0x524] ss:$8 sps:$4 sm:$0xff]   ;;  %v3611_v14 = vld [vmem:[%s4345_s25 + $0x120] ss:$8 sps:$4 sm:$0xff]   ;;  %v3619_v16 = vld [vmem:[%s4345_s25 + $0x134] ss:$8 sps:$4 sm:$0xff]  }
  0x96   : > { %2498 = vmatpush1.bf16.msra.mxu0 %v3538_v27  ;;  %2287 = vmatprep.subr.bf16.mxu1 %v3539_v28  ;;  %v3614_v15 = vld [vmem:[%s4345_s25 + $0x520] ss:$8 sps:$4 sm:$0xff]   ;;  %v3622_v17 = vld [vmem:[%s4345_s25 + $0x534] ss:$8 sps:$4 sm:$0xff]   ;;  %v3617_v18 = vld [vmem:[%s4345_s25 + $0x130] ss:$8 sps:$4 sm:$0xff]  }
  0x97   : > { %2499 = vmatprep.subr.bf16.mxu0 %v3541_v29  ;;  %v3620_v19 = vld [vmem:[%s4345_s25 + $0x530] ss:$8 sps:$4 sm:$0xff]   ;;  %v3625_v20 = vld [vmem:[%s4345_s25 + $0x144] ss:$8 sps:$4 sm:$0xff]   ;;  %v3623_v22 = vld [vmem:[%s4345_s25 + $0x140] ss:$8 sps:$4 sm:$0xff]  }
  0x98   : > { %v3628_v21 = vld [vmem:[%s4345_s25 + $0x544] ss:$8 sps:$4 sm:$0xff]   ;;  %v3626_v23 = vld [vmem:[%s4345_s25 + $0x540] ss:$8 sps:$4 sm:$0xff]   ;;  %v3631_v24 = vld [vmem:[%s4345_s25 + $0x154] ss:$8 sps:$4 sm:$0xff]  }
  0x99   : > { %2288 = vmatpush1.bf16.msra.mxu1 %v3543_v30  ;;  %v3634_v25 = vld [vmem:[%s4345_s25 + $0x554] ss:$8 sps:$4 sm:$0xff]   ;;  %v3629_v26 = vld [vmem:[%s4345_s25 + $0x150] ss:$8 sps:$4 sm:$0xff]   ;;  %v3637_v29 = vld [vmem:[%s4345_s25 + $0x164] ss:$8 sps:$4 sm:$0xff]  }
  0x9a   : > { %2500 = vmatpush1.bf16.msra.mxu0 %v3544_v31  ;;  %2289 = vmatprep.subr.bf16.mxu1 %v3545_v32  ;;  %v3632_v27 = vld [vmem:[%s4345_s25 + $0x550] ss:$8 sps:$4 sm:$0xff]   ;;  %v3683_v28 = vld [vmem:[%s4785_s0 + $0x94] ss:$72 sps:$4 sm:$0xff]   ;;  %v3640_v30 = vld [vmem:[%s4345_s25 + $0x564] ss:$8 sps:$4 sm:$0xff]  }
  0x9b   : > { %2501 = vmatprep.subr.bf16.mxu0 %v3547_v33  ;;  %v3688_v31 = vld [vmem:[%s4785_s0 + $0xb4] ss:$72 sps:$4 sm:$0xff]   ;;  %v3635_v32 = vld [vmem:[%s4345_s25 + $0x160] ss:$8 sps:$4 sm:$0xff]   ;;  %v3653_v48 = vld [vmem:[%s4345_s25 + $0x190] ss:$8 sps:$4 sm:$0xff]  }
  0x9c   : > { %v3638_v33 = vld [vmem:[%s4345_s25 + $0x560] ss:$8 sps:$4 sm:$0xff]   ;;  %v3664_v51 = vld [vmem:[%s4345_s25 + $0x5a4] ss:$8 sps:$4 sm:$0xff]   ;;  %s316_s1 = scalar_lea.vmem [#allocation7], %s2997_s19  ;;  %p4812_p13 = scmp.ne.s32.totalorder %s4802_s28, 0 }
  0x9d   : > { %2290 = vmatpush1.bf16.msra.mxu1 %v3549_v34  ;;  %v3693_v34 = vld [vmem:[%s4785_s0 + $0x90] ss:$72 sps:$4 sm:$0xff]  }
  0x9e   : > { %2502 = vmatpush1.bf16.msra.mxu0 %v3550_v35  ;;  %2291 = vmatprep.subr.bf16.mxu1 %v3551_v36  ;;  %v3694_v35 = vld [vmem:[%s4785_s0 + $0xb0] ss:$72 sps:$4 sm:$0xff]   ;;  %v3643_v36 = vld [vmem:[%s4345_s25 + $0x174] ss:$8 sps:$4 sm:$0xff]  }
  0x9f   : > { %2503 = vmatprep.subr.bf16.mxu0 %v3553_v37  ;;  %v3646_v37 = vld [vmem:[%s4345_s25 + $0x574] ss:$8 sps:$4 sm:$0xff]  }
  0xa1   : > { %2292 = vmatpush1.bf16.msra.mxu1 %v3555_v38  ;;  %v3641_v38 = vld [vmem:[%s4345_s25 + $0x170] ss:$8 sps:$4 sm:$0xff]  }
  0xa2   : > { %2504 = vmatpush1.bf16.msra.mxu0 %v3556_v39  ;;  %2293 = vmatprep.subr.bf16.mxu1 %v3557_v40  ;;  %v3644_v39 = vld [vmem:[%s4345_s25 + $0x570] ss:$8 sps:$4 sm:$0xff]   ;;  %v3703_v40 = vld [vmem:[%s4785_s0 + $0xc] ss:$72 sps:$4 sm:$0xff]  }
  0xa3   : > { %2505 = vmatprep.subr.bf16.mxu0 %v3559_v41  ;;  %v3649_v41 = vld [vmem:[%s4345_s25 + $0x184] ss:$8 sps:$4 sm:$0xff]  }
  0xa5   : > { %2294 = vmatpush1.bf16.msra.mxu1 %v3561_v42  ;;  %v3652_v42 = vld [vmem:[%s4345_s25 + $0x584] ss:$8 sps:$4 sm:$0xff]  }
  0xa6   : > { %2506 = vmatpush1.bf16.msra.mxu0 %v3562_v43  ;;  %2295 = vmatprep.subr.bf16.mxu1 %v3563_v44  ;;  %v3709_v43 = vld [vmem:[%s4785_s0 + $0x2c] ss:$72 sps:$4 sm:$0xff]   ;;  %v3647_v44 = vld [vmem:[%s4345_s25 + $0x180] ss:$8 sps:$4 sm:$0xff]  }
  0xa7   : > { %2507 = vmatprep.subr.bf16.mxu0 %v3565_v45  ;;  %v3650_v45 = vld [vmem:[%s4345_s25 + $0x580] ss:$8 sps:$4 sm:$0xff]  }
  0xa9   : > { %2296 = vmatpush1.bf16.msra.mxu1 %v3567_v46  ;;  %v3655_v46 = vld [vmem:[%s4345_s25 + $0x194] ss:$8 sps:$4 sm:$0xff]  }
  0xaa   : > { %2508 = vmatpush1.bf16.msra.mxu0 %v3568_v47  ;;  %2297 = vmatprep.subr.bf16.mxu1 %v3569_v49  ;;  %v3658_v47 = vld [vmem:[%s4345_s25 + $0x594] ss:$8 sps:$4 sm:$0xff]   ;;  %v3656_v49 = vld [vmem:[%s4345_s25 + $0x590] ss:$8 sps:$4 sm:$0xff]  }
  0xab   : > { %2509 = vmatprep.subr.bf16.mxu0 %v3571_v50  ;;  %v3661_v50 = vld [vmem:[%s4345_s25 + $0x1a4] ss:$8 sps:$4 sm:$0xff]  }
  0xad   : > { %2298 = vmatpush1.bf16.msra.mxu1 %v3573_v52  ;;  %v3659_v52 = vld [vmem:[%s4345_s25 + $0x1a0] ss:$8 sps:$4 sm:$0xff]  }
  0xae   : > { %2510 = vmatpush1.bf16.msra.mxu0 %v3574_v53  ;;  %2299 = vmatprep.subr.bf16.mxu1 %v3575_v54  ;;  %v3662_v53 = vld [vmem:[%s4345_s25 + $0x5a0] ss:$8 sps:$4 sm:$0xff]   ;;  %v3667_v54 = vld [vmem:[%s4345_s25 + $0x1b4] ss:$8 sps:$4 sm:$0xff]  }
  0xaf   : > { %2511 = vmatprep.subr.bf16.mxu0 %v3577_v55  ;;  %v3670_v55 = vld [vmem:[%s4345_s25 + $0x5b4] ss:$8 sps:$4 sm:$0xff]  }
  0xb1   : > { %2300 = vmatpush1.bf16.msra.mxu1 %v3579_v56  ;;  %v3665_v56 = vld [vmem:[%s4345_s25 + $0x1b0] ss:$8 sps:$4 sm:$0xff]  }
  0xb2   : > { %2512 = vmatpush1.bf16.msra.mxu0 %v3580_v57  ;;  %2301 = vmatprep.subr.bf16.mxu1 %v3581_v58  ;;  %v3668_v57 = vld [vmem:[%s4345_s25 + $0x5b0] ss:$8 sps:$4 sm:$0xff]   ;;  %v3673_v58 = vld [vmem:[%s4345_s25 + $0x1c4] ss:$8 sps:$4 sm:$0xff]  }
  0xb3   : > { %2513 = vmatprep.subr.bf16.mxu0 %v3583_v59  ;;  %v3676_v59 = vld [vmem:[%s4345_s25 + $0x5c4] ss:$8 sps:$4 sm:$0xff]  }
  0xb5   : > { %2302 = vmatpush1.bf16.msra.mxu1 %v3585_v60  ;;  %v3671_v60 = vld [vmem:[%s4345_s25 + $0x1c0] ss:$8 sps:$4 sm:$0xff]  }
  0xb6   : > { %2514 = vmatpush1.bf16.msra.mxu0 %v3586_v61  ;;  %2303 = vmatprep.subr.bf16.mxu1 %v3587_v62  ;;  %v3674_v61 = vld [vmem:[%s4345_s25 + $0x5c0] ss:$8 sps:$4 sm:$0xff]   ;;  %v3679_v62 = vld [vmem:[%s4345_s25 + $0x1d4] ss:$8 sps:$4 sm:$0xff]  }
  0xb7   : > { %2515 = vmatprep.subr.bf16.mxu0 %v3589_v63  ;;  %v3682_v63 = vld [vmem:[%s4345_s25 + $0x5d4] ss:$8 sps:$4 sm:$0xff]  }
  0xb9   : > { %2304 = vmatpush1.bf16.msra.mxu1 %v3591_v0  ;;  %v3677_v0 = vld [vmem:[%s4345_s25 + $0x1d0] ss:$8 sps:$4 sm:$0xff]  }
  0xba   : > { %2516 = vmatpush1.bf16.msra.mxu0 %v3592_v1  ;;  %2326 = vmatprep.subr.bf16.mxu1 %v3598_v2  ;;  %v3680_v1 = vld [vmem:[%s4345_s25 + $0x5d0] ss:$8 sps:$4 sm:$0xff]   ;;  %v3687_v2 = vld [vmem:[%s4345_s25 + $0x1e4] ss:$8 sps:$4 sm:$0xff]  }
  0xbb   : > { %2538 = vmatprep.subr.bf16.mxu0 %v3604_v3  ;;  %v3692_v3 = vld [vmem:[%s4345_s25 + $0x5e4] ss:$8 sps:$4 sm:$0xff]  }
  0xbc   : > { %2306 = vmatmul.mubr.bf16.vlgmr.msra.gmra.mrb[0].mxu1 %v3593_v4  ;;  %v3685_v4 = vld [vmem:[%s4345_s25 + $0x1e0] ss:$8 sps:$4 sm:$0xff]  }
  0xbd   : > { %2518 = vmatmul.mubr.bf16.vlgmr.msra.gmra.mrb[0].mxu0 %v3599_v6  ;;  %2327 = vmatpush1.bf16.msra.mxu1 %v3596_v5  ;;  %v3690_v5 = vld [vmem:[%s4345_s25 + $0x5e0] ss:$8 sps:$4 sm:$0xff]   ;;  %v3697_v6 = vld [vmem:[%s4345_s25 + $0x1f4] ss:$8 sps:$4 sm:$0xff]  }
  0xbe   : > { %2539 = vmatpush1.bf16.msra.mxu0 %v3602_v7  ;;  %2328 = vmatprep.subr.bf16.mxu1 %v3607_v8  ;;  %v3700_v7 = vld [vmem:[%s4345_s25 + $0x5f4] ss:$8 sps:$4 sm:$0xff]   ;;  %v3695_v8 = vld [vmem:[%s4345_s25 + $0x1f0] ss:$8 sps:$4 sm:$0xff]  }
  0xbf   : > { %2540 = vmatprep.subr.bf16.mxu0 %v3610_v9  ;;  %2315 = vmatprep.mubr.bf16.mxu1 %v3683_v28  ;;  %v3698_v9 = vld [vmem:[%s4345_s25 + $0x5f0] ss:$8 sps:$4 sm:$0xff]   ;;  %v3727_v28 = vld [vmem:[%s4345_s25 + $0x234] ss:$8 sps:$4 sm:$0xff]  }
  0xc0   : > { %2527 = vmatprep.mubr.bf16.mxu0 %v3688_v31  ;;  %v3728_v31 = vld [vmem:[%s4345_s25 + $0x630] ss:$8 sps:$4 sm:$0xff]  }
  0xc1   : > { %2329 = vmatpush1.bf16.msra.mxu1 %v3605_v10  ;;  %v3706_v10 = vld [vmem:[%s4345_s25 + $0x204] ss:$8 sps:$4 sm:$0xff]  }
  0xc2   : > { %2541 = vmatpush1.bf16.msra.mxu0 %v3608_v11  ;;  %2330 = vmatprep.subr.bf16.mxu1 %v3613_v12  ;;  %v3712_v11 = vld [vmem:[%s4345_s25 + $0x604] ss:$8 sps:$4 sm:$0xff]   ;;  %v3701_v12 = vld [vmem:[%s4785_s0 + $0x8] ss:$72 sps:$4 sm:$0xff]  }
  0xc3   : > { %2542 = vmatprep.subr.bf16.mxu0 %v3616_v13  ;;  %v3704_v13 = vld [vmem:[%s4345_s25 + $0x200] ss:$8 sps:$4 sm:$0xff]  }
  0xc4   : > { %2316 = vmatmul.mubr.bf16.gmra.mrb[4].mxu1 %v3693_v34  ;;  %v3736_v34 = vld [vmem:[%s4345_s25 + $0x644] ss:$8 sps:$4 sm:$0xff]  }
  0xc5   : > { %2331 = vmatpush1.bf16.msra.mxu1 %v3611_v14  ;;  %2528 = vmatmul.mubr.bf16.gmra.mrb[4].mxu0 %v3694_v35  ;;  %v3707_v14 = vld [vmem:[%s4785_s0 + $0x28] ss:$72 sps:$4 sm:$0xff]   ;;  %v3817_v35 = vld [vmem:[%s4785_s0 + $0x34] ss:$72 sps:$4 sm:$0xff]  }
  0xc6   : > { %2543 = vmatpush1.bf16.msra.mxu0 %v3614_v15  ;;  %2332 = vmatprep.subr.bf16.mxu1 %v3619_v16  ;;  %v3710_v15 = vld [vmem:[%s4345_s25 + $0x600] ss:$8 sps:$4 sm:$0xff]   ;;  %v3715_v16 = vld [vmem:[%s4345_s25 + $0x214] ss:$8 sps:$4 sm:$0xff]  }
  0xc7   : > { %2544 = vmatprep.subr.bf16.mxu0 %v3622_v17  ;;  %2358 = vmatprep.mubr.bf16.mxu1 %v3703_v40  ;;  %v3718_v17 = vld [vmem:[%s4345_s25 + $0x614] ss:$8 sps:$4 sm:$0xff]   ;;  %v3737_v40 = vld [vmem:[%s4345_s25 + $0x250] ss:$8 sps:$4 sm:$0xff]  }
  0xc8   : > { %2570 = vmatprep.mubr.bf16.mxu0 %v3709_v43  ;;  %v3748_v43 = vld [vmem:[%s4345_s25 + $0x664] ss:$8 sps:$4 sm:$0xff]  }
  0xc9   : > { %2333 = vmatpush1.bf16.msra.mxu1 %v3617_v18  ;;  %v3713_v18 = vld [vmem:[%s4345_s25 + $0x210] ss:$8 sps:$4 sm:$0xff]  }
  0xca   : > { %2545 = vmatpush1.bf16.msra.mxu0 %v3620_v19  ;;  %2334 = vmatprep.subr.bf16.mxu1 %v3625_v20  ;;  %v3716_v19 = vld [vmem:[%s4345_s25 + $0x610] ss:$8 sps:$4 sm:$0xff]   ;;  %v3791_v20 = vld [vmem:[%s4785_s0 + $0x9c] ss:$72 sps:$4 sm:$0xff]  }
  0xcb   : > { %2546 = vmatprep.subr.bf16.mxu0 %v3628_v21  ;;  %v3721_v21 = vld [vmem:[%s4345_s25 + $0x224] ss:$8 sps:$4 sm:$0xff]  }
  0xcd   : > { %2335 = vmatpush1.bf16.msra.mxu1 %v3623_v22  ;;  %v3724_v22 = vld [vmem:[%s4345_s25 + $0x624] ss:$8 sps:$4 sm:$0xff]  }
  0xce   : > { %2547 = vmatpush1.bf16.msra.mxu0 %v3626_v23  ;;  %2336 = vmatprep.subr.bf16.mxu1 %v3631_v24  ;;  %v3796_v23 = vld [vmem:[%s4785_s0 + $0xbc] ss:$72 sps:$4 sm:$0xff]   ;;  %v3719_v24 = vld [vmem:[%s4345_s25 + $0x220] ss:$8 sps:$4 sm:$0xff]  }
  0xcf   : > { %2548 = vmatprep.subr.bf16.mxu0 %v3634_v25  ;;  %v3722_v25 = vld [vmem:[%s4345_s25 + $0x620] ss:$8 sps:$4 sm:$0xff]  }
  0xd1   : > { %2337 = vmatpush1.bf16.msra.mxu1 %v3629_v26  ;;  %v3801_v26 = vld [vmem:[%s4785_s0 + $0x98] ss:$72 sps:$4 sm:$0xff]  }
  0xd2   : > { %2549 = vmatpush1.bf16.msra.mxu0 %v3632_v27  ;;  %2338 = vmatprep.subr.bf16.mxu1 %v3637_v29  ;;  %v3802_v27 = vld [vmem:[%s4785_s0 + $0xb8] ss:$72 sps:$4 sm:$0xff]   ;;  %v3730_v29 = vld [vmem:[%s4345_s25 + $0x634] ss:$8 sps:$4 sm:$0xff]  }
  0xd3   : > { %2550 = vmatprep.subr.bf16.mxu0 %v3640_v30  ;;  %v3725_v30 = vld [vmem:[%s4345_s25 + $0x230] ss:$8 sps:$4 sm:$0xff]  }
  0xd5   : > { %2339 = vmatpush1.bf16.msra.mxu1 %v3635_v32  ;;  %v3811_v32 = vld [vmem:[%s4785_s0 + $0x14] ss:$72 sps:$4 sm:$0xff]  }
  0xd6   : > { %2551 = vmatpush1.bf16.msra.mxu0 %v3638_v33  ;;  %2340 = vmatprep.subr.bf16.mxu1 %v3643_v36  ;;  %v3733_v33 = vld [vmem:[%s4345_s25 + $0x244] ss:$8 sps:$4 sm:$0xff]   ;;  %v3731_v36 = vld [vmem:[%s4345_s25 + $0x240] ss:$8 sps:$4 sm:$0xff]  }
  0xd7   : > { %2552 = vmatprep.subr.bf16.mxu0 %v3646_v37  ;;  %v3734_v37 = vld [vmem:[%s4345_s25 + $0x640] ss:$8 sps:$4 sm:$0xff]  }
  0xd9   : > { %2341 = vmatpush1.bf16.msra.mxu1 %v3641_v38  ;;  %v3739_v38 = vld [vmem:[%s4345_s25 + $0x254] ss:$8 sps:$4 sm:$0xff]  }
  0xda   : > { %2553 = vmatpush1.bf16.msra.mxu0 %v3644_v39  ;;  %2342 = vmatprep.subr.bf16.mxu1 %v3649_v41  ;;  %v3742_v39 = vld [vmem:[%s4345_s25 + $0x654] ss:$8 sps:$4 sm:$0xff]   ;;  %v3740_v41 = vld [vmem:[%s4345_s25 + $0x650] ss:$8 sps:$4 sm:$0xff]  }
  0xdb   : > { %2554 = vmatprep.subr.bf16.mxu0 %v3652_v42  ;;  %v3745_v42 = vld [vmem:[%s4345_s25 + $0x264] ss:$8 sps:$4 sm:$0xff]  }
  0xdd   : > { %2343 = vmatpush1.bf16.msra.mxu1 %v3647_v44  ;;  %v3743_v44 = vld [vmem:[%s4345_s25 + $0x260] ss:$8 sps:$4 sm:$0xff]  }
  0xde   : > { %2555 = vmatpush1.bf16.msra.mxu0 %v3650_v45  ;;  %2344 = vmatprep.subr.bf16.mxu1 %v3655_v46  ;;  %v3746_v45 = vld [vmem:[%s4345_s25 + $0x660] ss:$8 sps:$4 sm:$0xff]   ;;  %v3751_v46 = vld [vmem:[%s4345_s25 + $0x274] ss:$8 sps:$4 sm:$0xff]  }
  0xdf   : > { %2556 = vmatprep.subr.bf16.mxu0 %v3658_v47  ;;  %v3754_v47 = vld [vmem:[%s4345_s25 + $0x674] ss:$8 sps:$4 sm:$0xff]  }
  0xe1   : > { %2345 = vmatpush1.bf16.msra.mxu1 %v3653_v48  ;;  %v3749_v48 = vld [vmem:[%s4345_s25 + $0x270] ss:$8 sps:$4 sm:$0xff]  }
  0xe2   : > { %2557 = vmatpush1.bf16.msra.mxu0 %v3656_v49  ;;  %2346 = vmatprep.subr.bf16.mxu1 %v3661_v50  ;;  %v3752_v49 = vld [vmem:[%s4345_s25 + $0x670] ss:$8 sps:$4 sm:$0xff]   ;;  %v3757_v50 = vld [vmem:[%s4345_s25 + $0x284] ss:$8 sps:$4 sm:$0xff]  }
  0xe3   : > { %2558 = vmatprep.subr.bf16.mxu0 %v3664_v51  ;;  %v3760_v51 = vld [vmem:[%s4345_s25 + $0x684] ss:$8 sps:$4 sm:$0xff]  }
  0xe5   : > { %2347 = vmatpush1.bf16.msra.mxu1 %v3659_v52  ;;  %v3755_v52 = vld [vmem:[%s4345_s25 + $0x280] ss:$8 sps:$4 sm:$0xff]  }
  0xe6   : > { %2559 = vmatpush1.bf16.msra.mxu0 %v3662_v53  ;;  %2348 = vmatprep.subr.bf16.mxu1 %v3667_v54  ;;  %v3758_v53 = vld [vmem:[%s4345_s25 + $0x680] ss:$8 sps:$4 sm:$0xff]   ;;  %v3763_v54 = vld [vmem:[%s4345_s25 + $0x294] ss:$8 sps:$4 sm:$0xff]  }
  0xe7   : > { %2560 = vmatprep.subr.bf16.mxu0 %v3670_v55  ;;  %v3766_v55 = vld [vmem:[%s4345_s25 + $0x694] ss:$8 sps:$4 sm:$0xff]  }
  0xe9   : > { %2349 = vmatpush1.bf16.msra.mxu1 %v3665_v56  ;;  %v3761_v56 = vld [vmem:[%s4345_s25 + $0x290] ss:$8 sps:$4 sm:$0xff]  }
  0xea   : > { %2561 = vmatpush1.bf16.msra.mxu0 %v3668_v57  ;;  %2350 = vmatprep.subr.bf16.mxu1 %v3673_v58  ;;  %v3764_v57 = vld [vmem:[%s4345_s25 + $0x690] ss:$8 sps:$4 sm:$0xff]   ;;  %v3769_v58 = vld [vmem:[%s4345_s25 + $0x2a4] ss:$8 sps:$4 sm:$0xff]  }
  0xeb   : > { %2562 = vmatprep.subr.bf16.mxu0 %v3676_v59  ;;  %v3772_v59 = vld [vmem:[%s4345_s25 + $0x6a4] ss:$8 sps:$4 sm:$0xff]  }
  0xed   : > { %2351 = vmatpush1.bf16.msra.mxu1 %v3671_v60  ;;  %v3767_v60 = vld [vmem:[%s4345_s25 + $0x2a0] ss:$8 sps:$4 sm:$0xff]  }
  0xee   : > { %2563 = vmatpush1.bf16.msra.mxu0 %v3674_v61  ;;  %2352 = vmatprep.subr.bf16.mxu1 %v3679_v62  ;;  %v3770_v61 = vld [vmem:[%s4345_s25 + $0x6a0] ss:$8 sps:$4 sm:$0xff]   ;;  %v3775_v62 = vld [vmem:[%s4345_s25 + $0x2b4] ss:$8 sps:$4 sm:$0xff]  }
  0xef   : > { %2564 = vmatprep.subr.bf16.mxu0 %v3682_v63  ;;  %v3778_v63 = vld [vmem:[%s4345_s25 + $0x6b4] ss:$8 sps:$4 sm:$0xff]  }
  0xf1   : > { %2353 = vmatpush1.bf16.msra.mxu1 %v3677_v0  ;;  %v3773_v0 = vld [vmem:[%s4345_s25 + $0x2b0] ss:$8 sps:$4 sm:$0xff]  }
  0xf2   : > { %2565 = vmatpush1.bf16.msra.mxu0 %v3680_v1  ;;  %2354 = vmatprep.subr.bf16.mxu1 %v3687_v2  ;;  %v3776_v1 = vld [vmem:[%s4345_s25 + $0x6b0] ss:$8 sps:$4 sm:$0xff]   ;;  %v3781_v2 = vld [vmem:[%s4345_s25 + $0x2c4] ss:$8 sps:$4 sm:$0xff]  }
  0xf3   : > { %2566 = vmatprep.subr.bf16.mxu0 %v3692_v3  ;;  %v3784_v3 = vld [vmem:[%s4345_s25 + $0x6c4] ss:$8 sps:$4 sm:$0xff]  }
  0xf5   : > { %2355 = vmatpush1.bf16.msra.mxu1 %v3685_v4  ;;  %v3779_v4 = vld [vmem:[%s4345_s25 + $0x2c0] ss:$8 sps:$4 sm:$0xff]  }
  0xf6   : > { %2567 = vmatpush1.bf16.msra.mxu0 %v3690_v5  ;;  %2356 = vmatprep.subr.bf16.mxu1 %v3697_v6  ;;  %v3782_v5 = vld [vmem:[%s4345_s25 + $0x6c0] ss:$8 sps:$4 sm:$0xff]   ;;  %v3787_v6 = vld [vmem:[%s4345_s25 + $0x2d4] ss:$8 sps:$4 sm:$0xff]  }
  0xf7   : > { %2568 = vmatprep.subr.bf16.mxu0 %v3700_v7  ;;  %v3790_v7 = vld [vmem:[%s4345_s25 + $0x6d4] ss:$8 sps:$4 sm:$0xff]  }
  0xf9   : > { %2357 = vmatpush1.bf16.msra.mxu1 %v3695_v8  ;;  %v3785_v8 = vld [vmem:[%s4345_s25 + $0x2d0] ss:$8 sps:$4 sm:$0xff]  }
  0xfa   : > { %2569 = vmatpush1.bf16.msra.mxu0 %v3698_v9  ;;  %2379 = vmatprep.subr.bf16.mxu1 %v3706_v10  ;;  %v3788_v9 = vld [vmem:[%s4345_s25 + $0x6d0] ss:$8 sps:$4 sm:$0xff]   ;;  %v3795_v10 = vld [vmem:[%s4345_s25 + $0x2e4] ss:$8 sps:$4 sm:$0xff]  }
  0xfb   : > { %2591 = vmatprep.subr.bf16.mxu0 %v3712_v11  ;;  %v3800_v11 = vld [vmem:[%s4345_s25 + $0x6e4] ss:$8 sps:$4 sm:$0xff]  }
  0xfc   : > { %2359 = vmatmul.mubr.bf16.vlgmr.msra.gmra.mrb[0].mxu1 %v3701_v12  ;;  %v3793_v12 = vld [vmem:[%s4345_s25 + $0x2e0] ss:$8 sps:$4 sm:$0xff]  }
  0xfd   : > { %2571 = vmatmul.mubr.bf16.vlgmr.msra.gmra.mrb[0].mxu0 %v3707_v14  ;;  %2380 = vmatpush1.bf16.msra.mxu1 %v3704_v13  ;;  %v3798_v13 = vld [vmem:[%s4345_s25 + $0x6e0] ss:$8 sps:$4 sm:$0xff]   ;;  %v3805_v14 = vld [vmem:[%s4345_s25 + $0x2f4] ss:$8 sps:$4 sm:$0xff]  }
  0xfe   : > { %2592 = vmatpush1.bf16.msra.mxu0 %v3710_v15  ;;  %2381 = vmatprep.subr.bf16.mxu1 %v3715_v16  ;;  %v3808_v15 = vld [vmem:[%s4345_s25 + $0x6f4] ss:$8 sps:$4 sm:$0xff]   ;;  %v3803_v16 = vld [vmem:[%s4345_s25 + $0x2f0] ss:$8 sps:$4 sm:$0xff]  }
  0xff   : > { %2593 = vmatprep.subr.bf16.mxu0 %v3718_v17  ;;  %2368 = vmatprep.mubr.bf16.mxu1 %v3791_v20  ;;  %v3806_v17 = vld [vmem:[%s4345_s25 + $0x6f0] ss:$8 sps:$4 sm:$0xff]  }
 0x100   : > { %2580 = vmatprep.mubr.bf16.mxu0 %v3796_v23  ;;  %v3809_v20 = vld [vmem:[%s4785_s0 + $0x10] ss:$72 sps:$4 sm:$0xff]   ;;  %v3818_v23 = vld [vmem:[%s4345_s25 + $0x700] ss:$8 sps:$4 sm:$0xff]  }
 0x101   : > { %2382 = vmatpush1.bf16.msra.mxu1 %v3713_v18  ;;  %v3814_v18 = vld [vmem:[%s4345_s25 + $0x304] ss:$8 sps:$4 sm:$0xff]  }
 0x102   : > { %2594 = vmatpush1.bf16.msra.mxu0 %v3716_v19  ;;  %2383 = vmatprep.subr.bf16.mxu1 %v3721_v21  ;;  %v3820_v19 = vld [vmem:[%s4345_s25 + $0x704] ss:$8 sps:$4 sm:$0xff]   ;;  %v3812_v21 = vld [vmem:[%s4345_s25 + $0x300] ss:$8 sps:$4 sm:$0xff]  }
 0x103   : > { %2595 = vmatprep.subr.bf16.mxu0 %v3724_v22  ;;  %v3815_v22 = vld [vmem:[%s4785_s0 + $0x30] ss:$72 sps:$4 sm:$0xff]  }
 0x104   : > { %2369 = vmatmul.mubr.bf16.gmra.mrb[4].mxu1 %v3801_v26  ;;  %v3899_v26 = vld [vmem:[%s4785_s0 + $0xa4] ss:$72 sps:$4 sm:$0xff]  }
 0x105   : > { %2581 = vmatmul.mubr.bf16.gmra.mrb[4].mxu0 %v3802_v27  ;;  %2384 = vmatpush1.bf16.msra.mxu1 %v3719_v24  ;;  %v3823_v24 = vld [vmem:[%s4345_s25 + $0x314] ss:$8 sps:$4 sm:$0xff]   ;;  %v3901_v27 = vld [vmem:[%s4785_s0 + $0xc4] ss:$72 sps:$4 sm:$0xff]  }
 0x106   : > { %2596 = vmatpush1.bf16.msra.mxu0 %v3722_v25  ;;  %2385 = vmatprep.subr.bf16.mxu1 %v3727_v28  ;;  %v3826_v25 = vld [vmem:[%s4345_s25 + $0x714] ss:$8 sps:$4 sm:$0xff]   ;;  %v3821_v28 = vld [vmem:[%s4345_s25 + $0x310] ss:$8 sps:$4 sm:$0xff]  }
 0x107   : > { %2597 = vmatprep.subr.bf16.mxu0 %v3730_v29  ;;  %2411 = vmatprep.mubr.bf16.mxu1 %v3811_v32  ;;  %v3824_v29 = vld [vmem:[%s4345_s25 + $0x710] ss:$8 sps:$4 sm:$0xff]   ;;  %v3827_v32 = vld [vmem:[%s4345_s25 + $0x320] ss:$8 sps:$4 sm:$0xff]  }
 0x108   : > { %2623 = vmatprep.mubr.bf16.mxu0 %v3817_v35  ;;  %v3907_v35 = vld [vmem:[%s4785_s0 + $0xc0] ss:$72 sps:$4 sm:$0xff]  }
 0x109   : > { %2386 = vmatpush1.bf16.msra.mxu1 %v3725_v30  ;;  %v3829_v30 = vld [vmem:[%s4345_s25 + $0x324] ss:$8 sps:$4 sm:$0xff]  }
 0x10a   : > { %2598 = vmatpush1.bf16.msra.mxu0 %v3728_v31  ;;  %2387 = vmatprep.subr.bf16.mxu1 %v3733_v33  ;;  %v3832_v31 = vld [vmem:[%s4345_s25 + $0x724] ss:$8 sps:$4 sm:$0xff]   ;;  %v3830_v33 = vld [vmem:[%s4345_s25 + $0x720] ss:$8 sps:$4 sm:$0xff]  }
 0x10b   : > { %2599 = vmatprep.subr.bf16.mxu0 %v3736_v34  ;;  %v3903_v34 = vld [vmem:[%s4785_s0 + $0xa0] ss:$72 sps:$4 sm:$0xff]  }
 0x10d   : > { %2388 = vmatpush1.bf16.msra.mxu1 %v3731_v36  ;;  %v3835_v36 = vld [vmem:[%s4345_s25 + $0x334] ss:$8 sps:$4 sm:$0xff]  }
 0x10e   : > { %2600 = vmatpush1.bf16.msra.mxu0 %v3734_v37  ;;  %2389 = vmatprep.subr.bf16.mxu1 %v3739_v38  ;;  %v3838_v37 = vld [vmem:[%s4345_s25 + $0x734] ss:$8 sps:$4 sm:$0xff]  }
 0x10f   : > { %2601 = vmatprep.subr.bf16.mxu0 %v3742_v39  ;;  %v3919_v38 = vld [vmem:[%s4785_s0 + $0x1c] ss:$72 sps:$4 sm:$0xff]  }
 0x110   : > { %v3922_v39 = vld [vmem:[%s4785_s0 + $0x3c] ss:$72 sps:$4 sm:$0xff]  }
 0x111   : > { %2390 = vmatpush1.bf16.msra.mxu1 %v3737_v40  ;;  %v3833_v40 = vld [vmem:[%s4345_s25 + $0x330] ss:$8 sps:$4 sm:$0xff]  }
 0x112   : > { %2602 = vmatpush1.bf16.msra.mxu0 %v3740_v41  ;;  %2391 = vmatprep.subr.bf16.mxu1 %v3745_v42  ;;  %v3836_v41 = vld [vmem:[%s4345_s25 + $0x730] ss:$8 sps:$4 sm:$0xff]   ;;  %v3841_v42 = vld [vmem:[%s4345_s25 + $0x344] ss:$8 sps:$4 sm:$0xff]  }
 0x113   : > { %2603 = vmatprep.subr.bf16.mxu0 %v3748_v43  ;;  %v3844_v43 = vld [vmem:[%s4345_s25 + $0x744] ss:$8 sps:$4 sm:$0xff]  }
 0x115   : > { %2392 = vmatpush1.bf16.msra.mxu1 %v3743_v44  ;;  %v3839_v44 = vld [vmem:[%s4345_s25 + $0x340] ss:$8 sps:$4 sm:$0xff]  }
 0x116   : > { %2604 = vmatpush1.bf16.msra.mxu0 %v3746_v45  ;;  %2393 = vmatprep.subr.bf16.mxu1 %v3751_v46  ;;  %v3842_v45 = vld [vmem:[%s4345_s25 + $0x740] ss:$8 sps:$4 sm:$0xff]   ;;  %v3847_v46 = vld [vmem:[%s4345_s25 + $0x354] ss:$8 sps:$4 sm:$0xff]  }
 0x117   : > { %2605 = vmatprep.subr.bf16.mxu0 %v3754_v47  ;;  %v3850_v47 = vld [vmem:[%s4345_s25 + $0x754] ss:$8 sps:$4 sm:$0xff]  }
 0x119   : > { %2394 = vmatpush1.bf16.msra.mxu1 %v3749_v48  ;;  %v3845_v48 = vld [vmem:[%s4345_s25 + $0x350] ss:$8 sps:$4 sm:$0xff]  }
 0x11a   : > { %2606 = vmatpush1.bf16.msra.mxu0 %v3752_v49  ;;  %2395 = vmatprep.subr.bf16.mxu1 %v3757_v50  ;;  %v3848_v49 = vld [vmem:[%s4345_s25 + $0x750] ss:$8 sps:$4 sm:$0xff]   ;;  %v3853_v50 = vld [vmem:[%s4345_s25 + $0x364] ss:$8 sps:$4 sm:$0xff]  }
 0x11b   : > { %2607 = vmatprep.subr.bf16.mxu0 %v3760_v51  ;;  %v3856_v51 = vld [vmem:[%s4345_s25 + $0x764] ss:$8 sps:$4 sm:$0xff]  }
 0x11d   : > { %2396 = vmatpush1.bf16.msra.mxu1 %v3755_v52  ;;  %v3851_v52 = vld [vmem:[%s4345_s25 + $0x360] ss:$8 sps:$4 sm:$0xff]  }
 0x11e   : > { %2608 = vmatpush1.bf16.msra.mxu0 %v3758_v53  ;;  %2397 = vmatprep.subr.bf16.mxu1 %v3763_v54  ;;  %v3854_v53 = vld [vmem:[%s4345_s25 + $0x760] ss:$8 sps:$4 sm:$0xff]   ;;  %v3859_v54 = vld [vmem:[%s4345_s25 + $0x374] ss:$8 sps:$4 sm:$0xff]  }
 0x11f   : > { %2609 = vmatprep.subr.bf16.mxu0 %v3766_v55  ;;  %v3862_v55 = vld [vmem:[%s4345_s25 + $0x774] ss:$8 sps:$4 sm:$0xff]  }
 0x121   : > { %2398 = vmatpush1.bf16.msra.mxu1 %v3761_v56  ;;  %v3857_v56 = vld [vmem:[%s4345_s25 + $0x370] ss:$8 sps:$4 sm:$0xff]  }
 0x122   : > { %2610 = vmatpush1.bf16.msra.mxu0 %v3764_v57  ;;  %2399 = vmatprep.subr.bf16.mxu1 %v3769_v58  ;;  %v3860_v57 = vld [vmem:[%s4345_s25 + $0x770] ss:$8 sps:$4 sm:$0xff]   ;;  %v3865_v58 = vld [vmem:[%s4345_s25 + $0x384] ss:$8 sps:$4 sm:$0xff]  }
 0x123   : > { %2611 = vmatprep.subr.bf16.mxu0 %v3772_v59  ;;  %v3868_v59 = vld [vmem:[%s4345_s25 + $0x784] ss:$8 sps:$4 sm:$0xff]  }
 0x125   : > { %2400 = vmatpush1.bf16.msra.mxu1 %v3767_v60  ;;  %v3863_v60 = vld [vmem:[%s4345_s25 + $0x380] ss:$8 sps:$4 sm:$0xff]  }
 0x126   : > { %2612 = vmatpush1.bf16.msra.mxu0 %v3770_v61  ;;  %2401 = vmatprep.subr.bf16.mxu1 %v3775_v62  ;;  %v3866_v61 = vld [vmem:[%s4345_s25 + $0x780] ss:$8 sps:$4 sm:$0xff]   ;;  %v3871_v62 = vld [vmem:[%s4345_s25 + $0x394] ss:$8 sps:$4 sm:$0xff]  }
 0x127   : > { %2613 = vmatprep.subr.bf16.mxu0 %v3778_v63  ;;  %v3874_v63 = vld [vmem:[%s4345_s25 + $0x794] ss:$8 sps:$4 sm:$0xff]  }
 0x129   : > { %2402 = vmatpush1.bf16.msra.mxu1 %v3773_v0  ;;  %v3869_v0 = vld [vmem:[%s4345_s25 + $0x390] ss:$8 sps:$4 sm:$0xff]  }
 0x12a   : > { %2614 = vmatpush1.bf16.msra.mxu0 %v3776_v1  ;;  %2403 = vmatprep.subr.bf16.mxu1 %v3781_v2  ;;  %v3872_v1 = vld [vmem:[%s4345_s25 + $0x790] ss:$8 sps:$4 sm:$0xff]   ;;  %v3877_v2 = vld [vmem:[%s4345_s25 + $0x3a4] ss:$8 sps:$4 sm:$0xff]  }
 0x12b   : > { %2615 = vmatprep.subr.bf16.mxu0 %v3784_v3  ;;  %v3880_v3 = vld [vmem:[%s4345_s25 + $0x7a4] ss:$8 sps:$4 sm:$0xff]  }
 0x12d   : > { %2404 = vmatpush1.bf16.msra.mxu1 %v3779_v4  ;;  %v3875_v4 = vld [vmem:[%s4345_s25 + $0x3a0] ss:$8 sps:$4 sm:$0xff]  }
 0x12e   : > { %2616 = vmatpush1.bf16.msra.mxu0 %v3782_v5  ;;  %2405 = vmatprep.subr.bf16.mxu1 %v3787_v6  ;;  %v3878_v5 = vld [vmem:[%s4345_s25 + $0x7a0] ss:$8 sps:$4 sm:$0xff]   ;;  %v3883_v6 = vld [vmem:[%s4345_s25 + $0x3b4] ss:$8 sps:$4 sm:$0xff]  }
 0x12f   : > { %2617 = vmatprep.subr.bf16.mxu0 %v3790_v7  ;;  %v3886_v7 = vld [vmem:[%s4345_s25 + $0x7b4] ss:$8 sps:$4 sm:$0xff]  }
 0x131   : > { %2406 = vmatpush1.bf16.msra.mxu1 %v3785_v8  ;;  %v3881_v8 = vld [vmem:[%s4345_s25 + $0x3b0] ss:$8 sps:$4 sm:$0xff]  }
 0x132   : > { %2618 = vmatpush1.bf16.msra.mxu0 %v3788_v9  ;;  %2407 = vmatprep.subr.bf16.mxu1 %v3795_v10  ;;  %v3884_v9 = vld [vmem:[%s4345_s25 + $0x7b0] ss:$8 sps:$4 sm:$0xff]   ;;  %v3889_v10 = vld [vmem:[%s4345_s25 + $0x3c4] ss:$8 sps:$4 sm:$0xff]  }
 0x133   : > { %2619 = vmatprep.subr.bf16.mxu0 %v3800_v11  ;;  %v3892_v11 = vld [vmem:[%s4345_s25 + $0x7c4] ss:$8 sps:$4 sm:$0xff]  }
 0x135   : > { %2408 = vmatpush1.bf16.msra.mxu1 %v3793_v12  ;;  %v3887_v12 = vld [vmem:[%s4345_s25 + $0x3c0] ss:$8 sps:$4 sm:$0xff]  }
 0x136   : > { %2620 = vmatpush1.bf16.msra.mxu0 %v3798_v13  ;;  %2409 = vmatprep.subr.bf16.mxu1 %v3805_v14  ;;  %v3890_v13 = vld [vmem:[%s4345_s25 + $0x7c0] ss:$8 sps:$4 sm:$0xff]   ;;  %v3895_v14 = vld [vmem:[%s4345_s25 + $0x3d4] ss:$8 sps:$4 sm:$0xff]  }
 0x137   : > { %2621 = vmatprep.subr.bf16.mxu0 %v3808_v15  ;;  %v3898_v15 = vld [vmem:[%s4345_s25 + $0x7d4] ss:$8 sps:$4 sm:$0xff]  }
 0x139   : > { %2410 = vmatpush1.bf16.msra.mxu1 %v3803_v16  ;;  %v3893_v16 = vld [vmem:[%s4345_s25 + $0x3d0] ss:$8 sps:$4 sm:$0xff]  }
 0x13a   : > { %2622 = vmatpush1.bf16.msra.mxu0 %v3806_v17  ;;  %2432 = vmatprep.subr.bf16.mxu1 %v3814_v18  ;;  %v3896_v17 = vld [vmem:[%s4345_s25 + $0x7d0] ss:$8 sps:$4 sm:$0xff]   ;;  %v3906_v18 = vld [vmem:[%s4345_s25 + $0x3e4] ss:$8 sps:$4 sm:$0xff]  }
 0x13b   : > { %2644 = vmatprep.subr.bf16.mxu0 %v3820_v19  ;;  %v3910_v19 = vld [vmem:[%s4345_s25 + $0x7e4] ss:$8 sps:$4 sm:$0xff]  }
 0x13c   : > { %2412 = vmatmul.mubr.bf16.vlgmr.msra.gmra.mrb[0].mxu1 %v3809_v20  ;;  %v3904_v20 = vld [vmem:[%s4345_s25 + $0x3e0] ss:$8 sps:$4 sm:$0xff]  }
 0x13d   : > { %2624 = vmatmul.mubr.bf16.vlgmr.msra.gmra.mrb[0].mxu0 %v3815_v22  ;;  %2433 = vmatpush1.bf16.msra.mxu1 %v3812_v21  ;;  %v3908_v21 = vld [vmem:[%s4345_s25 + $0x7e0] ss:$8 sps:$4 sm:$0xff]   ;;  %v3913_v22 = vld [vmem:[%s4345_s25 + $0x3f4] ss:$8 sps:$4 sm:$0xff]  }
 0x13e   : > { %2645 = vmatpush1.bf16.msra.mxu0 %v3818_v23  ;;  %2434 = vmatprep.subr.bf16.mxu1 %v3823_v24  ;;  %v3916_v23 = vld [vmem:[%s4345_s25 + $0x7f4] ss:$8 sps:$4 sm:$0xff]   ;;  %v3911_v24 = vld [vmem:[%s4345_s25 + $0x3f0] ss:$8 sps:$4 sm:$0xff]  }
 0x13f   : > { %2646 = vmatprep.subr.bf16.mxu0 %v3826_v25  ;;  %2421 = vmatprep.mubr.bf16.mxu1 %v3899_v26  ;;  %v3914_v25 = vld [vmem:[%s4345_s25 + $0x7f0] ss:$8 sps:$4 sm:$0xff]   ;;  %v3925_v26 = vld [vmem:[%s4345_s25 + $0x804] ss:$8 sps:$4 sm:$0xff]  }
 0x140   : > { %2633 = vmatprep.mubr.bf16.mxu0 %v3901_v27  ;;  %v3917_v27 = vld [vmem:[%s4785_s0 + $0x18] ss:$72 sps:$4 sm:$0xff]  }
 0x141   : > { %2435 = vmatpush1.bf16.msra.mxu1 %v3821_v28  ;;  %v3920_v28 = vld [vmem:[%s4785_s0 + $0x38] ss:$72 sps:$4 sm:$0xff]  }
 0x142   : > { %2647 = vmatpush1.bf16.msra.mxu0 %v3824_v29  ;;  %2436 = vmatprep.subr.bf16.mxu1 %v3829_v30  ;;  %v3923_v29 = vld [vmem:[%s4345_s25 + $0x800] ss:$8 sps:$4 sm:$0xff]   ;;  %v3928_v30 = vld [vmem:[%s4345_s25 + $0x814] ss:$8 sps:$4 sm:$0xff]  }
 0x143   : > { %2648 = vmatprep.subr.bf16.mxu0 %v3832_v31  ;;  %v3929_v31 = vld [vmem:[%s4785_s0 + $0xac] ss:$72 sps:$4 sm:$0xff]  }
 0x144   : > { %2422 = vmatmul.mubr.bf16.gmra.mrb[4].mxu1 %v3903_v34  ;;  %v3937_v34 = vld [vmem:[%s4345_s25 + $0x824] ss:$8 sps:$4 sm:$0xff]  }
 0x145   : > { %2634 = vmatmul.mubr.bf16.gmra.mrb[4].mxu0 %v3907_v35  ;;  %2437 = vmatpush1.bf16.msra.mxu1 %v3827_v32  ;;  %v3931_v32 = vld [vmem:[%s4785_s0 + $0xcc] ss:$72 sps:$4 sm:$0xff]   ;;  %v3933_v35 = vld [vmem:[%s4785_s0 + $0xa8] ss:$72 sps:$4 sm:$0xff]  }
 0x146   : > { %2649 = vmatpush1.bf16.msra.mxu0 %v3830_v33  ;;  %2438 = vmatprep.subr.bf16.mxu1 %v3835_v36  ;;  %v3926_v33 = vld [vmem:[%s4345_s25 + $0x810] ss:$8 sps:$4 sm:$0xff]  }
 0x147   : > { %2650 = vmatprep.subr.bf16.mxu0 %v3838_v37  ;;  %2464 = vmatprep.mubr.bf16.mxu1 %v3919_v38  ;;  %v3934_v36 = vld [vmem:[%s4785_s0 + $0xc8] ss:$72 sps:$4 sm:$0xff]   ;;  %v3940_v38 = vld [vmem:[%s4345_s25 + $0x834] ss:$8 sps:$4 sm:$0xff]  }
 0x148   : > { %2676 = vmatprep.mubr.bf16.mxu0 %v3922_v39  ;;  %v3935_v37 = vld [vmem:[%s4345_s25 + $0x820] ss:$8 sps:$4 sm:$0xff]   ;;  %v3979_v39 = vld [vmem:[%s4785_s0 + $0x44] ss:$72 sps:$4 sm:$0xff]  }
 0x149   : > { %2439 = vmatpush1.bf16.msra.mxu1 %v3833_v40  ;;  %v3982_v40 = vld [vmem:[%s4785_s0 + $0xd4] ss:$72 sps:$4 sm:$0xff]  }
 0x14a   : > { %2651 = vmatpush1.bf16.msra.mxu0 %v3836_v41  ;;  %2440 = vmatprep.subr.bf16.mxu1 %v3841_v42  ;;  %v3938_v41 = vld [vmem:[%s4345_s25 + $0x830] ss:$8 sps:$4 sm:$0xff]   ;;  %v3943_v42 = vld [vmem:[%s4345_s25 + $0x844] ss:$8 sps:$4 sm:$0xff]  }
 0x14b   : > { %2652 = vmatprep.subr.bf16.mxu0 %v3844_v43  ;;  %v3941_v43 = vld [vmem:[%s4345_s25 + $0x840] ss:$8 sps:$4 sm:$0xff]  }
 0x14d   : > { %2441 = vmatpush1.bf16.msra.mxu1 %v3839_v44  ;;  %v3946_v44 = vld [vmem:[%s4345_s25 + $0x854] ss:$8 sps:$4 sm:$0xff]  }
 0x14e   : > { %2653 = vmatpush1.bf16.msra.mxu0 %v3842_v45  ;;  %2442 = vmatprep.subr.bf16.mxu1 %v3847_v46  ;;  %v3944_v45 = vld [vmem:[%s4345_s25 + $0x850] ss:$8 sps:$4 sm:$0xff]   ;;  %v3949_v46 = vld [vmem:[%s4345_s25 + $0x864] ss:$8 sps:$4 sm:$0xff]  }
 0x14f   : > { %2654 = vmatprep.subr.bf16.mxu0 %v3850_v47  ;;  %v3947_v47 = vld [vmem:[%s4345_s25 + $0x860] ss:$8 sps:$4 sm:$0xff]  }
 0x151   : > { %2443 = vmatpush1.bf16.msra.mxu1 %v3845_v48  ;;  %v3952_v48 = vld [vmem:[%s4345_s25 + $0x874] ss:$8 sps:$4 sm:$0xff]  }
 0x152   : > { %2655 = vmatpush1.bf16.msra.mxu0 %v3848_v49  ;;  %2444 = vmatprep.subr.bf16.mxu1 %v3853_v50  ;;  %v3950_v49 = vld [vmem:[%s4345_s25 + $0x870] ss:$8 sps:$4 sm:$0xff]   ;;  %v3955_v50 = vld [vmem:[%s4345_s25 + $0x884] ss:$8 sps:$4 sm:$0xff]  }
 0x153   : > { %2656 = vmatprep.subr.bf16.mxu0 %v3856_v51  ;;  %v3953_v51 = vld [vmem:[%s4345_s25 + $0x880] ss:$8 sps:$4 sm:$0xff]  }
 0x155   : > { %2445 = vmatpush1.bf16.msra.mxu1 %v3851_v52  ;;  %v3958_v52 = vld [vmem:[%s4345_s25 + $0x894] ss:$8 sps:$4 sm:$0xff]  }
 0x156   : > { %2657 = vmatpush1.bf16.msra.mxu0 %v3854_v53  ;;  %2446 = vmatprep.subr.bf16.mxu1 %v3859_v54  ;;  %v3956_v53 = vld [vmem:[%s4345_s25 + $0x890] ss:$8 sps:$4 sm:$0xff]   ;;  %v3961_v54 = vld [vmem:[%s4345_s25 + $0x8a4] ss:$8 sps:$4 sm:$0xff]  }
 0x157   : > { %2658 = vmatprep.subr.bf16.mxu0 %v3862_v55  ;;  %v3959_v55 = vld [vmem:[%s4345_s25 + $0x8a0] ss:$8 sps:$4 sm:$0xff]  }
 0x159   : > { %2447 = vmatpush1.bf16.msra.mxu1 %v3857_v56  ;;  %v3964_v56 = vld [vmem:[%s4345_s25 + $0x8b4] ss:$8 sps:$4 sm:$0xff]  }
 0x15a   : > { %2659 = vmatpush1.bf16.msra.mxu0 %v3860_v57  ;;  %2448 = vmatprep.subr.bf16.mxu1 %v3865_v58  ;;  %v3962_v57 = vld [vmem:[%s4345_s25 + $0x8b0] ss:$8 sps:$4 sm:$0xff]   ;;  %v3967_v58 = vld [vmem:[%s4345_s25 + $0x8c4] ss:$8 sps:$4 sm:$0xff]  }
 0x15b   : > { %2660 = vmatprep.subr.bf16.mxu0 %v3868_v59  ;;  %v3965_v59 = vld [vmem:[%s4345_s25 + $0x8c0] ss:$8 sps:$4 sm:$0xff]  }
 0x15d   : > { %2449 = vmatpush1.bf16.msra.mxu1 %v3863_v60  ;;  %v3970_v60 = vld [vmem:[%s4345_s25 + $0x8d4] ss:$8 sps:$4 sm:$0xff]  }
 0x15e   : > { %2661 = vmatpush1.bf16.msra.mxu0 %v3866_v61  ;;  %2450 = vmatprep.subr.bf16.mxu1 %v3871_v62  ;;  %v3968_v61 = vld [vmem:[%s4345_s25 + $0x8d0] ss:$8 sps:$4 sm:$0xff]   ;;  %v3973_v62 = vld [vmem:[%s4345_s25 + $0x8e4] ss:$8 sps:$4 sm:$0xff]  }
 0x15f   : > { %2662 = vmatprep.subr.bf16.mxu0 %v3874_v63  ;;  %v3971_v63 = vld [vmem:[%s4345_s25 + $0x8e0] ss:$8 sps:$4 sm:$0xff]  }
 0x161   : > { %2451 = vmatpush1.bf16.msra.mxu1 %v3869_v0  ;;  %v3976_v0 = vld [vmem:[%s4345_s25 + $0x8f4] ss:$8 sps:$4 sm:$0xff]  }
 0x162   : > { %2663 = vmatpush1.bf16.msra.mxu0 %v3872_v1  ;;  %2452 = vmatprep.subr.bf16.mxu1 %v3877_v2  ;;  %v3974_v1 = vld [vmem:[%s4345_s25 + $0x8f0] ss:$8 sps:$4 sm:$0xff]   ;;  %v3977_v2 = vld [vmem:[%s4785_s0 + $0x40] ss:$72 sps:$4 sm:$0xff]   ;;  %s277_s25 = scalar_lea.vmem [#allocation6], %s2995_s23  ;;  %s3330_s23 = sshll.u32 (%p4812_p13), %s4119_s18, 4 }
 0x163   : > { %2664 = vmatprep.subr.bf16.mxu0 %v3880_v3  ;;  %v3980_v3 = vld [vmem:[%s4785_s0 + $0xd0] ss:$72 sps:$4 sm:$0xff]   ;;  %s2818_s6 = scalar_lea.vmem (%p4812_p13), %s4789_s4, %s3330_s23 }
 0x165   : > { %2453 = vmatpush1.bf16.msra.mxu1 %v3875_v4 }
 0x166   : > { %2665 = vmatpush1.bf16.msra.mxu0 %v3878_v5  ;;  %2454 = vmatprep.subr.bf16.mxu1 %v3883_v6 }
 0x167   : > { %2666 = vmatprep.subr.bf16.mxu0 %v3886_v7 }
 0x169   : > { %2455 = vmatpush1.bf16.msra.mxu1 %v3881_v8 }
 0x16a   : > { %2667 = vmatpush1.bf16.msra.mxu0 %v3884_v9  ;;  %2456 = vmatprep.subr.bf16.mxu1 %v3889_v10 }
 0x16b   : > { %2668 = vmatprep.subr.bf16.mxu0 %v3892_v11 }
 0x16d   : > { %2457 = vmatpush1.bf16.msra.mxu1 %v3887_v12 }
 0x16e   : > { %2669 = vmatpush1.bf16.msra.mxu0 %v3890_v13  ;;  %2458 = vmatprep.subr.bf16.mxu1 %v3895_v14 }
 0x16f   : > { %2670 = vmatprep.subr.bf16.mxu0 %v3898_v15 }
 0x171   : > { %2459 = vmatpush1.bf16.msra.mxu1 %v3893_v16 }
 0x172   : > { %2671 = vmatpush1.bf16.msra.mxu0 %v3896_v17  ;;  %2460 = vmatprep.subr.bf16.mxu1 %v3906_v18 }
 0x173   : > { %2672 = vmatprep.subr.bf16.mxu0 %v3910_v19 }
 0x175   : > { %2461 = vmatpush1.bf16.msra.mxu1 %v3904_v20  ;;  %v2760_v20 = vlaneseq }
 0x176   : > { %2673 = vmatpush1.bf16.msra.mxu0 %v3908_v21  ;;  %2462 = vmatprep.subr.bf16.mxu1 %v3913_v22 }
 0x177   : > { %2674 = vmatprep.subr.bf16.mxu0 %v3916_v23  ;;  %v2761_v21 = vshrl.u32 %v2760_v20, 7 }
 0x179   : > { %2463 = vmatpush1.bf16.msra.mxu1 %v3911_v24  ;;  %v2762_v22 = vsub.s32 0, %v2761_v21  ;;  %v2766_v23 = vsub.s32 1, %v2761_v21  ;;  %v2758_v24 = vld [vmem:[%s4355_s5] sm:$0x3] }
 0x17a   : > { %2675 = vmatpush1.bf16.msra.mxu0 %v3914_v25  ;;  %3331 = vmatprep.subr.bf16.mxu1 %v3925_v26  ;;  %v2778_v25 = vld [vmem:[%s277_s25] sm:$0x3] }
 0x17b   : > { %2697 = vmatprep.subr.bf16.mxu0 %v3925_v26 }
 0x17c   : > { %2465 = vmatmul.mubr.bf16.vlgmr.msra.gmra.mrb[0].mxu1 %v3917_v27 }
 0x17d   : > { %2677 = vmatmul.mubr.bf16.vlgmr.msra.gmra.mrb[0].mxu0 %v3920_v28  ;;  %3347 = vmatpush1.bf16.msra.mxu1 %v3923_v29 }
 0x17e   : > { %2698 = vmatpush1.bf16.msra.mxu0 %v3923_v29  ;;  %3332 = vmatprep.subr.bf16.mxu1 %v3928_v30  ;;  %v2763_v29 = vrot.slane %v2758_v24, %v2762_v22 }
 0x17f   : > { %2699 = vmatprep.subr.bf16.mxu0 %v3928_v30  ;;  %2474 = vmatprep.mubr.bf16.mxu1 %v3929_v31 }
 0x180   : > { %2686 = vmatprep.mubr.bf16.mxu0 %v3931_v32  ;;  %v2767_v32 = vrot.slane %v2758_v24, %v2766_v23 }
 0x181   : > { %3348 = vmatpush1.bf16.msra.mxu1 %v3926_v33 }
 0x182   : > { %2700 = vmatpush1.bf16.msra.mxu0 %v3926_v33  ;;  %3333 = vmatprep.subr.bf16.mxu1 %v3937_v34 }
 0x183   : > { %2701 = vmatprep.subr.bf16.mxu0 %v3937_v34  ;;  %v2783_v34 = vrot.slane %v2778_v25, %v2762_v22 }
 0x184   : > { %2475 = vmatmul.mubr.bf16.gmra.mrb[4].mxu1 %v3933_v35 }
 0x185   : > { %2687 = vmatmul.mubr.bf16.gmra.mrb[4].mxu0 %v3934_v36  ;;  %3349 = vmatpush1.bf16.msra.mxu1 %v3935_v37  ;;  %v2787_v36 = vrot.slane %v2778_v25, %v2766_v23 }
 0x186   : > { %2702 = vmatpush1.bf16.msra.mxu0 %v3935_v37  ;;  %3334 = vmatprep.subr.bf16.mxu1 %v3940_v38 }
 0x187   : > { %2703 = vmatprep.subr.bf16.mxu0 %v3940_v38  ;;  %2729 = vmatprep.mubr.bf16.mxu0 %v3979_v39 }
 0x188   : > { %2739 = vmatprep.mubr.bf16.mxu1 %v3982_v40 }
 0x189   : > { %3350 = vmatpush1.bf16.msra.mxu1 %v3938_v41 }
 0x18a   : > { %2704 = vmatpush1.bf16.msra.mxu0 %v3938_v41  ;;  %3335 = vmatprep.subr.bf16.mxu1 %v3943_v42 }
 0x18b   : > { %2705 = vmatprep.subr.bf16.mxu0 %v3943_v42 }
 0x18d   : > { %3351 = vmatpush1.bf16.msra.mxu1 %v3941_v43 }
 0x18e   : > { %2706 = vmatpush1.bf16.msra.mxu0 %v3941_v43  ;;  %3336 = vmatprep.subr.bf16.mxu1 %v3946_v44 }
 0x18f   : > { %2707 = vmatprep.subr.bf16.mxu0 %v3946_v44 }
 0x191   : > { %3352 = vmatpush1.bf16.msra.mxu1 %v3944_v45 }
 0x192   : > { %2708 = vmatpush1.bf16.msra.mxu0 %v3944_v45  ;;  %3337 = vmatprep.subr.bf16.mxu1 %v3949_v46 }
 0x193   : > { %2709 = vmatprep.subr.bf16.mxu0 %v3949_v46 }
 0x195   : > { %3353 = vmatpush1.bf16.msra.mxu1 %v3947_v47 }
 0x196   : > { %2710 = vmatpush1.bf16.msra.mxu0 %v3947_v47  ;;  %3338 = vmatprep.subr.bf16.mxu1 %v3952_v48 }
 0x197   : > { %2711 = vmatprep.subr.bf16.mxu0 %v3952_v48 }
 0x199   : > { %3354 = vmatpush1.bf16.msra.mxu1 %v3950_v49 }
 0x19a   : > { %2712 = vmatpush1.bf16.msra.mxu0 %v3950_v49  ;;  %3339 = vmatprep.subr.bf16.mxu1 %v3955_v50 }
 0x19b   : > { %2713 = vmatprep.subr.bf16.mxu0 %v3955_v50 }
 0x19d   : > { %3355 = vmatpush1.bf16.msra.mxu1 %v3953_v51 }
 0x19e   : > { %2714 = vmatpush1.bf16.msra.mxu0 %v3953_v51  ;;  %3340 = vmatprep.subr.bf16.mxu1 %v3958_v52 }
 0x19f   : > { %2715 = vmatprep.subr.bf16.mxu0 %v3958_v52 }
 0x1a1   : > { %3356 = vmatpush1.bf16.msra.mxu1 %v3956_v53 }
 0x1a2   : > { %2716 = vmatpush1.bf16.msra.mxu0 %v3956_v53  ;;  %3341 = vmatprep.subr.bf16.mxu1 %v3961_v54 }
 0x1a3   : > { %2717 = vmatprep.subr.bf16.mxu0 %v3961_v54 }
 0x1a5   : > { %3357 = vmatpush1.bf16.msra.mxu1 %v3959_v55 }
 0x1a6   : > { %2718 = vmatpush1.bf16.msra.mxu0 %v3959_v55  ;;  %3342 = vmatprep.subr.bf16.mxu1 %v3964_v56 }
 0x1a7   : > { %2719 = vmatprep.subr.bf16.mxu0 %v3964_v56 }
 0x1a9   : > { %3358 = vmatpush1.bf16.msra.mxu1 %v3962_v57 }
 0x1aa   : > { %2720 = vmatpush1.bf16.msra.mxu0 %v3962_v57  ;;  %3343 = vmatprep.subr.bf16.mxu1 %v3967_v58 }
 0x1ab   : > { %2721 = vmatprep.subr.bf16.mxu0 %v3967_v58 }
 0x1ad   : > { %3359 = vmatpush1.bf16.msra.mxu1 %v3965_v59 }
 0x1ae   : > { %2722 = vmatpush1.bf16.msra.mxu0 %v3965_v59  ;;  %3344 = vmatprep.subr.bf16.mxu1 %v3970_v60 }
 0x1af   : > { %2723 = vmatprep.subr.bf16.mxu0 %v3970_v60 }
 0x1b1   : > { %3360 = vmatpush1.bf16.msra.mxu1 %v3968_v61 }
 0x1b2   : > { %2724 = vmatpush1.bf16.msra.mxu0 %v3968_v61  ;;  %3345 = vmatprep.subr.bf16.mxu1 %v3973_v62 }
 0x1b3   : > { %2725 = vmatprep.subr.bf16.mxu0 %v3973_v62 }
 0x1b5   : > { %3361 = vmatpush1.bf16.msra.mxu1 %v3971_v63 }
 0x1b6   : > { %2726 = vmatpush1.bf16.msra.mxu0 %v3971_v63  ;;  %3346 = vmatprep.subr.bf16.mxu1 %v3976_v0 }
 0x1b7   : > { %2727 = vmatprep.subr.bf16.mxu0 %v3976_v0 }
 0x1b9   : > { %3362 = vmatpush1.bf16.msra.mxu1 %v3974_v1 }
 0x1ba   : > { %2728 = vmatpush1.bf16.msra.mxu0 %v3974_v1 }
 0x1bc   : > { %2740 = vmatmul.mubr.bf16.vlgmr.msra.gmra.mrb[8].mxu1 %v3980_v3 }
 0x1bd   : > { %2730 = vmatmul.mubr.bf16.vlgmr.msra.gmra.mrb[0].mxu0 %v3977_v2 }
 0x24f   : > { %v2466_v4 = vpop.f32.mrb[0].mxu1 }
 0x250   : > { %v2468_v5 = vpop.f32.mrb[1].mxu1 }
 0x251   : > { %v2470_v6 = vpop.f32.mrb[2].mxu1 }
 0x252   : > { %v2472_v7 = vpop.f32.mrb[3].mxu1 }
 0x257   : > { %v2476_v8 = vpop.f32.mrb[4].mxu1 }
 0x258   : > { %v2688_v9 = vpop.f32.mrb[4].mxu0  ;;  %v2478_v11 = vpop.f32.mrb[5].mxu1 }
 0x259   : > { %v3367_v10 = vadd.f32 %v2688_v9, %v2476_v8  ;;  %v2690_v12 = vpop.f32.mrb[5].mxu0  ;;  %v2480_v14 = vpop.f32.mrb[6].mxu1 }
 0x25a   : > { %v3369_v13 = vadd.f32 %v2690_v12, %v2478_v11  ;;  %v2692_v15 = vpop.f32.mrb[6].mxu0  ;;  %v2482_v17 = vpop.f32.mrb[7].mxu1 }
 0x25b   : > { %v3371_v16 = vadd.f32 %v2692_v15, %v2480_v14  ;;  %v2694_v18 = vpop.f32.mrb[7].mxu0 }
 0x25c   : > { %v3373_v19 = vadd.f32 %v2694_v18, %v2482_v17 }
 0x28f   : > { %v2741_v27 = vpop.f32.mrb[8].mxu1 }
 0x290   : > { %v2731_v26 = vpop.f32.mrb[0].mxu0  ;;  %v3368_v30 = vadd.f32 %v3367_v10, %v2741_v27  ;;  %v2743_v33 = vpop.f32.mrb[9].mxu1 }
 0x291   : > { %v3363_v28 = vadd.f32 %v2731_v26, %v2466_v4  ;;  %v2733_v31 = vpop.f32.mrb[1].mxu0  ;;  %v3370_v37 = vadd.f32 %v3369_v13, %v2743_v33  ;;  %v2745_v39 = vpop.f32.mrb[10].mxu1 }
 0x292   : > { %v3364_v35 = vadd.f32 %v2733_v31, %v2468_v5  ;;  %v2735_v38 = vpop.f32.mrb[2].mxu0  ;;  %v2754_v41 = vmax.f32 %v3368_v30, 0.0  ;;  %v3372_v43 = vadd.f32 %v3371_v16, %v2745_v39  ;;  %v2747_v45 = vpop.f32.mrb[11].mxu1 }
 0x293   : > { %v2750_v40 = vmax.f32 %v3363_v28, 0.0  ;;  %v3365_v42 = vadd.f32 %v2735_v38, %v2470_v6  ;;  %v2737_v44 = vpop.f32.mrb[3].mxu0  ;;  %v2755_v47 = vmax.f32 %v3370_v37, 0.0  ;;  %v3374_v49 = vadd.f32 %v3373_v19, %v2747_v45 }
 0x294   : > { %v2751_v46 = vmax.f32 %v3364_v35, 0.0  ;;  %v3366_v48 = vadd.f32 %v2737_v44, %v2472_v7  ;;  %v2774_v51 = vmul.f32 %v2763_v29, %v2754_v41  ;;  %v2756_v53 = vmax.f32 %v3372_v43, 0.0 }
 0x295   : > { %v2770_v50 = vmul.f32 %v2763_v29, %v2750_v40  ;;  %v2752_v52 = vmax.f32 %v3365_v42, 0.0  ;;  %v2775_v55 = vmul.f32 %v2767_v32, %v2755_v47  ;;  %v2757_v57 = vmax.f32 %v3374_v49, 0.0 }
 0x296   : > { %v2771_v54 = vmul.f32 %v2767_v32, %v2751_v46  ;;  %v2753_v56 = vmax.f32 %v3366_v48, 0.0  ;;  %v2794_v59 = vadd.f32 %v2783_v34, %v2774_v51  ;;  %v2776_v61 = vmul.f32 %v2763_v29, %v2756_v53  ;;  %2812 = sbr.rel (!%p4812_p13) target bundleno = 677 (0x2a5), region = 52 }
 0x297   : > { %v2790_v58 = vadd.f32 %v2783_v34, %v2770_v50  ;;  %v2772_v60 = vmul.f32 %v2763_v29, %v2752_v52  ;;  %v2795_v63 = vadd.f32 %v2787_v36, %v2775_v55  ;;  %v2777_v1 = vmul.f32 %v2767_v32, %v2757_v57 }
 0x298   : > { %v2791_v62 = vadd.f32 %v2787_v36, %v2771_v54  ;;  %v2773_v0 = vmul.f32 %v2767_v32, %v2753_v56  ;;  %2802 = vst [vmem:[%s316_s1 + $0x20] sm:$0xff] %v2794_v59  ;;  %v2796_v3 = vadd.f32 %v2783_v34, %v2776_v61 }
 0x299   : > { %2798 = vst [vmem:[%s316_s1] sm:$0xff] %v2790_v58  ;;  %v2792_v2 = vadd.f32 %v2783_v34, %v2772_v60  ;;  %2803 = vst [vmem:[%s316_s1 + $0x28] sm:$0xff] %v2795_v63  ;;  %v2797_v5 = vadd.f32 %v2787_v36, %v2777_v1 }
 0x29a   : > { %2799 = vst [vmem:[%s316_s1 + $0x8] sm:$0xff] %v2791_v62  ;;  %v2793_v4 = vadd.f32 %v2787_v36, %v2773_v0  ;;  %2804 = vst [vmem:[%s316_s1 + $0x30] sm:$0xff] %v2796_v3 }
 0x29b   : > { %2800 = vst [vmem:[%s316_s1 + $0x10] sm:$0xff] %v2792_v2  ;;  %2805 = vst [vmem:[%s316_s1 + $0x38] sm:$0xff] %v2797_v5 }
 0x29c   : > { %2801 = vst [vmem:[%s316_s1 + $0x18] sm:$0xff] %v2793_v4 }
 0x29f   : > { %v2839_v10 = vld [vmem:[%s316_s1 + $0x20] sm:$0xff] }
 0x2a0   : > { %v2831_v6 = vld [vmem:[%s316_s1] sm:$0xff]  ;;  %v2841_v11 = vld [vmem:[%s316_s1 + $0x28] sm:$0xff]  ;;  %2840 = vst [vmem:[%s2818_s6 + $0x40] sm:$0xff] %v2839_v10 }
 0x2a1   : > { %v2833_v7 = vld [vmem:[%s316_s1 + $0x8] sm:$0xff]  ;;  %2832 = vst [vmem:[%s2818_s6] sm:$0xff] %v2831_v6  ;;  %2842 = vst [vmem:[%s2818_s6 + $0x48] sm:$0xff] %v2841_v11  ;;  %v2843_v12 = vld [vmem:[%s316_s1 + $0x30] sm:$0xff] }
 0x2a2   : > { %v2835_v8 = vld [vmem:[%s316_s1 + $0x10] sm:$0xff]  ;;  %2834 = vst [vmem:[%s2818_s6 + $0x8] sm:$0xff] %v2833_v7  ;;  %v2845_v13 = vld [vmem:[%s316_s1 + $0x38] sm:$0xff]  ;;  %2844 = vst [vmem:[%s2818_s6 + $0x60] sm:$0xff] %v2843_v12 }
 0x2a3   : > { %v2837_v9 = vld [vmem:[%s316_s1 + $0x18] sm:$0xff]  ;;  %2836 = vst [vmem:[%s2818_s6 + $0x20] sm:$0xff] %v2835_v8  ;;  %2846 = vst [vmem:[%s2818_s6 + $0x68] sm:$0xff] %v2845_v13 }
 0x2a4   : > { %2838 = vst [vmem:[%s2818_s6 + $0x28] sm:$0xff] %v2837_v9 }
 0x2a5 PF: > { %s20_s20 = sadd.s32 1, %s4127_s20   ;;  %s4813_s18 = sld [smem:[#allocation12_spill]] }
 0x2a6   : > { %p17_p3 = scmp.ge.s32.totalorder %s20_s20, 4   ;;  %s4814_s28 = sld [smem:[#allocation10_spill]] }
 0x2a7   : > { %s4815_s19 = sld [smem:[#allocation11_spill]]  ;;  %s4816_s15 = smov %s4111_s16 }
 0x2a8   : > { %s4817_s16 = smov %s4115_s17  ;;  %19 = sbr.rel (!%p17_p3) target bundleno = 9 (0x9), region = 126 }
 0x2ab   : > { %s4818_s17 = smov %s4813_s18 }
 0x2ac   : > { %s4819_s18 = smov %s4814_s28 }
 0x2af   :  { %2862 = vsyncpa [#allocation3], 1 }
 0x2b0   :  { %2864 = vsyncpa [#allocation3 + $0x1], 1 }
 0x2b1   :  { %2865 = vsyncpa [#allocation5], 1 }
 0x2b2   :  { %2867 = vsyncpa [#allocation5 + $0x1], 1 }

// kernel: position_gan_forward.6
= control target key start
LH: loop header
LB: loop body
LE: loop exit
PB: predicated region body
PF: predicated region fallthrough
CT: control target
= control target key end

     0   :  { %s3426_s15 = smov 0   ;;  %s3428_s16 = smov 0   ;;  %s4249_s0 = inlined_call_operand.vmem [shape: bf16[128,1152], index: 0, kind: input, shape index: {}]   ;;  %s4250_s1 = inlined_call_operand.vmem [shape: bf16[1152,256], index: 1, kind: input, shape index: {}]   ;;  %s4251_s2 = inlined_call_operand.vmem [shape: f32[1,256], index: 2, kind: input, shape index: {}]   ;;  %s4252_s3 = inlined_call_operand.vmem [shape: f32[1,256], index: 3, kind: input, shape index: {}]   ;;  %s4253_s4 = inlined_call_operand.vmem [shape: f32[128,256], index: 4, kind: output, shape index: {}]  }
   0x1   :  { %s3430_s17 = smov 0   ;;  %s3432_s18 = smov 0  }
   0x2   :  { %s3434_s19 = smov 0  }
   0x3 LB: > { %s23_s20 = sadd.s32 1, %s3395_s18  ;;  %s2665_s21 = sadd.s32 4294967295, %s3399_s19   ;;  %s3399_s19 = sphi %s3434_s19, %s14_s19   ;;  %s3395_s18 = sphi %s3432_s18, %s4258_s18   ;;  %s3391_s17 = sphi %s3430_s17, %s4257_s17   ;;  %s3387_s16 = sphi %s3428_s16, %s4256_s16   ;;  %s3383_s15 = sphi %s3426_s15, %s4255_s15  }
   0x4   : > { %p24_p0 = scmp.ge.s32.totalorder %s23_s20, 2  ;;  %p66_p1 = scmp.ne.s32.totalorder %s3387_s16, %s3383_s15 }
   0x5   : > { %p67_p2 = scmp.eq.s32.totalorder %s3399_s19, 0  ;;  %p150_p4 = scmp.eq.s32.totalorder %s2665_s21, 1 }
   0x6   : > { %s4260_s20 = smov (%p24_p0, %s23_s20), 0  ;;  %s59_s23 = sadd.s32 1, %s3387_s16 }
   0x7   : > { %p68_p3 = por %p67_p2, %p66_p1  ;;  %s56_s22 = ssub.s32 %s3395_s18, %s4260_s20 }
   0x8   : > { %p57_p5 = scmp.eq.s32.totalorder %s56_s22, 0  ;;  %p3461_p6 = por %p150_p4, %p66_p1 }
   0x9   : > { %p2669_p7 = scmp.ge.s32.totalorder %s3399_s19, 2 }
   0xa   : > { %s3466_s25 = scalar_select %p57_p5, %s3387_s16, %s59_s23  }
   0xb   : > { %182 = sbr.rel (%p2669_p7) target bundleno = 118 (0x76), region = 20 }
  0x12   : > { %185 = sbr.rel (!%p68_p3) target bundleno = 118 (0x76), region = 24  ;;  %s187_s26 = sand.u32 (%p68_p3), 1, %s3387_s16  }
  0x13   : > { %s2670_s27 = sshll.u32 (%p68_p3), %s3395_s18, 2  ;;  %s3143_s28 = smul.u32 (%p68_p3), 576, %s187_s26 }
  0x14   : > { %s3474_s5 = scalar_lea.vmem (%p68_p3), %s4250_s1, %s2670_s27 }
  0x15   : > { %v207_v0 = vld [vmem:[%s3474_s5] sm:$0xf] (%p68_p3)  ;;  %v209_v1 = vld [vmem:[%s3474_s5 + $0x8] sm:$0xf] (%p68_p3)  ;;  %v211_v2 = vld [vmem:[%s3474_s5 + $0x10] sm:$0xf] (%p68_p3) }
  0x16   : > { %v213_v3 = vld [vmem:[%s3474_s5 + $0x18] sm:$0xf] (%p68_p3)  ;;  %v215_v4 = vld [vmem:[%s3474_s5 + $0x20] sm:$0xf] (%p68_p3)  ;;  %s3481_s6 = scalar_lea.vmem (%p68_p3), [#allocation2], %s3143_s28 }
  0x17   : > { %208 = vst [vmem:[%s3481_s6] sm:$0xf] (%p68_p3), %v207_v0  ;;  %210 = vst [vmem:[%s3481_s6 + $0x4] sm:$0xf] (%p68_p3), %v209_v1  ;;  %v217_v5 = vld [vmem:[%s3474_s5 + $0x28] sm:$0xf] (%p68_p3) }
  0x18   : > { %212 = vst [vmem:[%s3481_s6 + $0x8] sm:$0xf] (%p68_p3), %v211_v2  ;;  %214 = vst [vmem:[%s3481_s6 + $0xc] sm:$0xf] (%p68_p3), %v213_v3  ;;  %v219_v6 = vld [vmem:[%s3474_s5 + $0x30] sm:$0xf] (%p68_p3) }
  0x19   : > { %216 = vst [vmem:[%s3481_s6 + $0x10] sm:$0xf] %v215_v4  ;;  %v221_v7 = vld [vmem:[%s3474_s5 + $0x38] sm:$0xf]  ;;  %218 = vst [vmem:[%s3481_s6 + $0x14] sm:$0xf] %v217_v5 }
  0x1a   : > { %220 = vst [vmem:[%s3481_s6 + $0x18] sm:$0xf] %v219_v6  ;;  %222 = vst [vmem:[%s3481_s6 + $0x1c] sm:$0xf] %v221_v7  ;;  %v223_v8 = vld [vmem:[%s3474_s5 + $0x40] sm:$0xf] }
  0x1b   : > { %v225_v9 = vld [vmem:[%s3474_s5 + $0x48] sm:$0xf]  ;;  %v227_v10 = vld [vmem:[%s3474_s5 + $0x50] sm:$0xf]  ;;  %224 = vst [vmem:[%s3481_s6 + $0x20] sm:$0xf] %v223_v8 }
  0x1c   : > { %226 = vst [vmem:[%s3481_s6 + $0x24] sm:$0xf] %v225_v9  ;;  %228 = vst [vmem:[%s3481_s6 + $0x28] sm:$0xf] %v227_v10  ;;  %v229_v11 = vld [vmem:[%s3474_s5 + $0x58] sm:$0xf] }
  0x1d   : > { %v231_v12 = vld [vmem:[%s3474_s5 + $0x60] sm:$0xf]  ;;  %v233_v13 = vld [vmem:[%s3474_s5 + $0x68] sm:$0xf]  ;;  %230 = vst [vmem:[%s3481_s6 + $0x2c] sm:$0xf] %v229_v11 }
  0x1e   : > { %232 = vst [vmem:[%s3481_s6 + $0x30] sm:$0xf] %v231_v12  ;;  %234 = vst [vmem:[%s3481_s6 + $0x34] sm:$0xf] %v233_v13  ;;  %v235_v14 = vld [vmem:[%s3474_s5 + $0x70] sm:$0xf] }
  0x1f   : > { %v237_v15 = vld [vmem:[%s3474_s5 + $0x78] sm:$0xf]  ;;  %v239_v16 = vld [vmem:[%s3474_s5 + $0x80] sm:$0xf]  ;;  %236 = vst [vmem:[%s3481_s6 + $0x38] sm:$0xf] %v235_v14 }
  0x20   : > { %238 = vst [vmem:[%s3481_s6 + $0x3c] sm:$0xf] %v237_v15  ;;  %240 = vst [vmem:[%s3481_s6 + $0x40] sm:$0xf] %v239_v16  ;;  %v241_v17 = vld [vmem:[%s3474_s5 + $0x88] sm:$0xf] }
  0x21   : > { %v243_v18 = vld [vmem:[%s3474_s5 + $0x90] sm:$0xf]  ;;  %v245_v19 = vld [vmem:[%s3474_s5 + $0x98] sm:$0xf]  ;;  %242 = vst [vmem:[%s3481_s6 + $0x44] sm:$0xf] %v241_v17 }
  0x22   : > { %244 = vst [vmem:[%s3481_s6 + $0x48] sm:$0xf] %v243_v18  ;;  %246 = vst [vmem:[%s3481_s6 + $0x4c] sm:$0xf] %v245_v19  ;;  %v247_v20 = vld [vmem:[%s3474_s5 + $0xa0] sm:$0xf] }
  0x23   : > { %v249_v21 = vld [vmem:[%s3474_s5 + $0xa8] sm:$0xf]  ;;  %v251_v22 = vld [vmem:[%s3474_s5 + $0xb0] sm:$0xf]  ;;  %248 = vst [vmem:[%s3481_s6 + $0x50] sm:$0xf] %v247_v20 }
  0x24   : > { %250 = vst [vmem:[%s3481_s6 + $0x54] sm:$0xf] %v249_v21  ;;  %252 = vst [vmem:[%s3481_s6 + $0x58] sm:$0xf] %v251_v22  ;;  %v253_v23 = vld [vmem:[%s3474_s5 + $0xb8] sm:$0xf] }
  0x25   : > { %v255_v24 = vld [vmem:[%s3474_s5 + $0xc0] sm:$0xf]  ;;  %v257_v25 = vld [vmem:[%s3474_s5 + $0xc8] sm:$0xf]  ;;  %254 = vst [vmem:[%s3481_s6 + $0x5c] sm:$0xf] %v253_v23 }
  0x26   : > { %256 = vst [vmem:[%s3481_s6 + $0x60] sm:$0xf] %v255_v24  ;;  %258 = vst [vmem:[%s3481_s6 + $0x64] sm:$0xf] %v257_v25  ;;  %v259_v26 = vld [vmem:[%s3474_s5 + $0xd0] sm:$0xf] }
  0x27   : > { %v261_v27 = vld [vmem:[%s3474_s5 + $0xd8] sm:$0xf]  ;;  %v263_v28 = vld [vmem:[%s3474_s5 + $0xe0] sm:$0xf]  ;;  %260 = vst [vmem:[%s3481_s6 + $0x68] sm:$0xf] %v259_v26 }
  0x28   : > { %262 = vst [vmem:[%s3481_s6 + $0x6c] sm:$0xf] %v261_v27  ;;  %264 = vst [vmem:[%s3481_s6 + $0x70] sm:$0xf] %v263_v28  ;;  %v265_v29 = vld [vmem:[%s3474_s5 + $0xe8] sm:$0xf] }
  0x29   : > { %v267_v30 = vld [vmem:[%s3474_s5 + $0xf0] sm:$0xf]  ;;  %v269_v31 = vld [vmem:[%s3474_s5 + $0xf8] sm:$0xf]  ;;  %266 = vst [vmem:[%s3481_s6 + $0x74] sm:$0xf] %v265_v29 }
  0x2a   : > { %268 = vst [vmem:[%s3481_s6 + $0x78] sm:$0xf] %v267_v30  ;;  %270 = vst [vmem:[%s3481_s6 + $0x7c] sm:$0xf] %v269_v31  ;;  %v271_v32 = vld [vmem:[%s3474_s5 + $0x100] sm:$0xf] }
  0x2b   : > { %v273_v33 = vld [vmem:[%s3474_s5 + $0x108] sm:$0xf]  ;;  %v275_v34 = vld [vmem:[%s3474_s5 + $0x110] sm:$0xf]  ;;  %272 = vst [vmem:[%s3481_s6 + $0x80] sm:$0xf] %v271_v32 }
  0x2c   : > { %274 = vst [vmem:[%s3481_s6 + $0x84] sm:$0xf] %v273_v33  ;;  %276 = vst [vmem:[%s3481_s6 + $0x88] sm:$0xf] %v275_v34  ;;  %v277_v35 = vld [vmem:[%s3474_s5 + $0x118] sm:$0xf] }
  0x2d   : > { %v279_v36 = vld [vmem:[%s3474_s5 + $0x120] sm:$0xf]  ;;  %v281_v37 = vld [vmem:[%s3474_s5 + $0x128] sm:$0xf]  ;;  %278 = vst [vmem:[%s3481_s6 + $0x8c] sm:$0xf] %v277_v35 }
  0x2e   : > { %280 = vst [vmem:[%s3481_s6 + $0x90] sm:$0xf] %v279_v36  ;;  %282 = vst [vmem:[%s3481_s6 + $0x94] sm:$0xf] %v281_v37  ;;  %v283_v38 = vld [vmem:[%s3474_s5 + $0x130] sm:$0xf] }
  0x2f   : > { %v285_v39 = vld [vmem:[%s3474_s5 + $0x138] sm:$0xf]  ;;  %v287_v40 = vld [vmem:[%s3474_s5 + $0x140] sm:$0xf]  ;;  %284 = vst [vmem:[%s3481_s6 + $0x98] sm:$0xf] %v283_v38 }
  0x30   : > { %286 = vst [vmem:[%s3481_s6 + $0x9c] sm:$0xf] %v285_v39  ;;  %288 = vst [vmem:[%s3481_s6 + $0xa0] sm:$0xf] %v287_v40  ;;  %v289_v41 = vld [vmem:[%s3474_s5 + $0x148] sm:$0xf] }
  0x31   : > { %v291_v42 = vld [vmem:[%s3474_s5 + $0x150] sm:$0xf]  ;;  %v293_v43 = vld [vmem:[%s3474_s5 + $0x158] sm:$0xf]  ;;  %290 = vst [vmem:[%s3481_s6 + $0xa4] sm:$0xf] %v289_v41 }
  0x32   : > { %292 = vst [vmem:[%s3481_s6 + $0xa8] sm:$0xf] %v291_v42  ;;  %294 = vst [vmem:[%s3481_s6 + $0xac] sm:$0xf] %v293_v43  ;;  %v295_v44 = vld [vmem:[%s3474_s5 + $0x160] sm:$0xf] }
  0x33   : > { %v297_v45 = vld [vmem:[%s3474_s5 + $0x168] sm:$0xf]  ;;  %v299_v46 = vld [vmem:[%s3474_s5 + $0x170] sm:$0xf]  ;;  %296 = vst [vmem:[%s3481_s6 + $0xb0] sm:$0xf] %v295_v44 }
  0x34   : > { %298 = vst [vmem:[%s3481_s6 + $0xb4] sm:$0xf] %v297_v45  ;;  %300 = vst [vmem:[%s3481_s6 + $0xb8] sm:$0xf] %v299_v46  ;;  %v301_v47 = vld [vmem:[%s3474_s5 + $0x178] sm:$0xf] }
  0x35   : > { %v303_v48 = vld [vmem:[%s3474_s5 + $0x180] sm:$0xf]  ;;  %v305_v49 = vld [vmem:[%s3474_s5 + $0x188] sm:$0xf]  ;;  %302 = vst [vmem:[%s3481_s6 + $0xbc] sm:$0xf] %v301_v47 }
  0x36   : > { %304 = vst [vmem:[%s3481_s6 + $0xc0] sm:$0xf] %v303_v48  ;;  %306 = vst [vmem:[%s3481_s6 + $0xc4] sm:$0xf] %v305_v49  ;;  %v307_v50 = vld [vmem:[%s3474_s5 + $0x190] sm:$0xf] }
  0x37   : > { %v309_v51 = vld [vmem:[%s3474_s5 + $0x198] sm:$0xf]  ;;  %v311_v52 = vld [vmem:[%s3474_s5 + $0x1a0] sm:$0xf]  ;;  %308 = vst [vmem:[%s3481_s6 + $0xc8] sm:$0xf] %v307_v50 }
  0x38   : > { %310 = vst [vmem:[%s3481_s6 + $0xcc] sm:$0xf] %v309_v51  ;;  %312 = vst [vmem:[%s3481_s6 + $0xd0] sm:$0xf] %v311_v52  ;;  %v313_v53 = vld [vmem:[%s3474_s5 + $0x1a8] sm:$0xf] }
  0x39   : > { %v315_v54 = vld [vmem:[%s3474_s5 + $0x1b0] sm:$0xf]  ;;  %v317_v55 = vld [vmem:[%s3474_s5 + $0x1b8] sm:$0xf]  ;;  %314 = vst [vmem:[%s3481_s6 + $0xd4] sm:$0xf] %v313_v53 }
  0x3a   : > { %316 = vst [vmem:[%s3481_s6 + $0xd8] sm:$0xf] %v315_v54  ;;  %318 = vst [vmem:[%s3481_s6 + $0xdc] sm:$0xf] %v317_v55  ;;  %v319_v56 = vld [vmem:[%s3474_s5 + $0x1c0] sm:$0xf] }
  0x3b   : > { %v321_v57 = vld [vmem:[%s3474_s5 + $0x1c8] sm:$0xf]  ;;  %v323_v58 = vld [vmem:[%s3474_s5 + $0x1d0] sm:$0xf]  ;;  %320 = vst [vmem:[%s3481_s6 + $0xe0] sm:$0xf] %v319_v56 }
  0x3c   : > { %322 = vst [vmem:[%s3481_s6 + $0xe4] sm:$0xf] %v321_v57  ;;  %324 = vst [vmem:[%s3481_s6 + $0xe8] sm:$0xf] %v323_v58  ;;  %v325_v59 = vld [vmem:[%s3474_s5 + $0x1d8] sm:$0xf] }
  0x3d   : > { %v327_v60 = vld [vmem:[%s3474_s5 + $0x1e0] sm:$0xf]  ;;  %v329_v61 = vld [vmem:[%s3474_s5 + $0x1e8] sm:$0xf]  ;;  %326 = vst [vmem:[%s3481_s6 + $0xec] sm:$0xf] %v325_v59 }
  0x3e   : > { %328 = vst [vmem:[%s3481_s6 + $0xf0] sm:$0xf] %v327_v60  ;;  %330 = vst [vmem:[%s3481_s6 + $0xf4] sm:$0xf] %v329_v61  ;;  %v331_v62 = vld [vmem:[%s3474_s5 + $0x1f0] sm:$0xf] }
  0x3f   : > { %v333_v63 = vld [vmem:[%s3474_s5 + $0x1f8] sm:$0xf]  ;;  %v335_v0 = vld [vmem:[%s3474_s5 + $0x200] sm:$0xf]  ;;  %332 = vst [vmem:[%s3481_s6 + $0xf8] sm:$0xf] %v331_v62 }
  0x40   : > { %334 = vst [vmem:[%s3481_s6 + $0xfc] sm:$0xf] %v333_v63  ;;  %336 = vst [vmem:[%s3481_s6 + $0x100] sm:$0xf] %v335_v0  ;;  %v337_v1 = vld [vmem:[%s3474_s5 + $0x208] sm:$0xf] }
  0x41   : > { %v339_v2 = vld [vmem:[%s3474_s5 + $0x210] sm:$0xf]  ;;  %v341_v3 = vld [vmem:[%s3474_s5 + $0x218] sm:$0xf]  ;;  %338 = vst [vmem:[%s3481_s6 + $0x104] sm:$0xf] %v337_v1 }
  0x42   : > { %340 = vst [vmem:[%s3481_s6 + $0x108] sm:$0xf] %v339_v2  ;;  %342 = vst [vmem:[%s3481_s6 + $0x10c] sm:$0xf] %v341_v3  ;;  %v343_v4 = vld [vmem:[%s3474_s5 + $0x220] sm:$0xf] }
  0x43   : > { %v345_v5 = vld [vmem:[%s3474_s5 + $0x228] sm:$0xf]  ;;  %v347_v6 = vld [vmem:[%s3474_s5 + $0x230] sm:$0xf]  ;;  %344 = vst [vmem:[%s3481_s6 + $0x110] sm:$0xf] %v343_v4 }
  0x44   : > { %346 = vst [vmem:[%s3481_s6 + $0x114] sm:$0xf] %v345_v5  ;;  %348 = vst [vmem:[%s3481_s6 + $0x118] sm:$0xf] %v347_v6  ;;  %v349_v7 = vld [vmem:[%s3474_s5 + $0x238] sm:$0xf] }
  0x45   : > { %v351_v8 = vld [vmem:[%s3474_s5 + $0x240] sm:$0xf]  ;;  %v353_v9 = vld [vmem:[%s3474_s5 + $0x248] sm:$0xf]  ;;  %350 = vst [vmem:[%s3481_s6 + $0x11c] sm:$0xf] %v349_v7 }
  0x46   : > { %352 = vst [vmem:[%s3481_s6 + $0x120] sm:$0xf] %v351_v8  ;;  %354 = vst [vmem:[%s3481_s6 + $0x124] sm:$0xf] %v353_v9  ;;  %v355_v10 = vld [vmem:[%s3474_s5 + $0x250] sm:$0xf] }
  0x47   : > { %v357_v11 = vld [vmem:[%s3474_s5 + $0x258] sm:$0xf]  ;;  %v359_v12 = vld [vmem:[%s3474_s5 + $0x260] sm:$0xf]  ;;  %356 = vst [vmem:[%s3481_s6 + $0x128] sm:$0xf] %v355_v10 }
  0x48   : > { %358 = vst [vmem:[%s3481_s6 + $0x12c] sm:$0xf] %v357_v11  ;;  %360 = vst [vmem:[%s3481_s6 + $0x130] sm:$0xf] %v359_v12  ;;  %v361_v13 = vld [vmem:[%s3474_s5 + $0x268] sm:$0xf] }
  0x49   : > { %v363_v14 = vld [vmem:[%s3474_s5 + $0x270] sm:$0xf]  ;;  %v365_v15 = vld [vmem:[%s3474_s5 + $0x278] sm:$0xf]  ;;  %362 = vst [vmem:[%s3481_s6 + $0x134] sm:$0xf] %v361_v13 }
  0x4a   : > { %364 = vst [vmem:[%s3481_s6 + $0x138] sm:$0xf] %v363_v14  ;;  %366 = vst [vmem:[%s3481_s6 + $0x13c] sm:$0xf] %v365_v15  ;;  %v367_v16 = vld [vmem:[%s3474_s5 + $0x280] sm:$0xf] }
  0x4b   : > { %v369_v17 = vld [vmem:[%s3474_s5 + $0x288] sm:$0xf]  ;;  %v371_v18 = vld [vmem:[%s3474_s5 + $0x290] sm:$0xf]  ;;  %368 = vst [vmem:[%s3481_s6 + $0x140] sm:$0xf] %v367_v16 }
  0x4c   : > { %370 = vst [vmem:[%s3481_s6 + $0x144] sm:$0xf] %v369_v17  ;;  %372 = vst [vmem:[%s3481_s6 + $0x148] sm:$0xf] %v371_v18  ;;  %v373_v19 = vld [vmem:[%s3474_s5 + $0x298] sm:$0xf] }
  0x4d   : > { %v375_v20 = vld [vmem:[%s3474_s5 + $0x2a0] sm:$0xf]  ;;  %v377_v21 = vld [vmem:[%s3474_s5 + $0x2a8] sm:$0xf]  ;;  %374 = vst [vmem:[%s3481_s6 + $0x14c] sm:$0xf] %v373_v19 }
  0x4e   : > { %376 = vst [vmem:[%s3481_s6 + $0x150] sm:$0xf] %v375_v20  ;;  %378 = vst [vmem:[%s3481_s6 + $0x154] sm:$0xf] %v377_v21  ;;  %v379_v22 = vld [vmem:[%s3474_s5 + $0x2b0] sm:$0xf] }
  0x4f   : > { %v381_v23 = vld [vmem:[%s3474_s5 + $0x2b8] sm:$0xf]  ;;  %v383_v24 = vld [vmem:[%s3474_s5 + $0x2c0] sm:$0xf]  ;;  %380 = vst [vmem:[%s3481_s6 + $0x158] sm:$0xf] %v379_v22 }
  0x50   : > { %382 = vst [vmem:[%s3481_s6 + $0x15c] sm:$0xf] %v381_v23  ;;  %384 = vst [vmem:[%s3481_s6 + $0x160] sm:$0xf] %v383_v24  ;;  %v385_v25 = vld [vmem:[%s3474_s5 + $0x2c8] sm:$0xf] }
  0x51   : > { %v387_v26 = vld [vmem:[%s3474_s5 + $0x2d0] sm:$0xf]  ;;  %v389_v27 = vld [vmem:[%s3474_s5 + $0x2d8] sm:$0xf]  ;;  %386 = vst [vmem:[%s3481_s6 + $0x164] sm:$0xf] %v385_v25 }
  0x52   : > { %388 = vst [vmem:[%s3481_s6 + $0x168] sm:$0xf] %v387_v26  ;;  %390 = vst [vmem:[%s3481_s6 + $0x16c] sm:$0xf] %v389_v27  ;;  %v391_v28 = vld [vmem:[%s3474_s5 + $0x2e0] sm:$0xf] }
  0x53   : > { %v393_v29 = vld [vmem:[%s3474_s5 + $0x2e8] sm:$0xf]  ;;  %v395_v30 = vld [vmem:[%s3474_s5 + $0x2f0] sm:$0xf]  ;;  %392 = vst [vmem:[%s3481_s6 + $0x170] sm:$0xf] %v391_v28 }
  0x54   : > { %394 = vst [vmem:[%s3481_s6 + $0x174] sm:$0xf] %v393_v29  ;;  %396 = vst [vmem:[%s3481_s6 + $0x178] sm:$0xf] %v395_v30  ;;  %v397_v31 = vld [vmem:[%s3474_s5 + $0x2f8] sm:$0xf] }
  0x55   : > { %v399_v32 = vld [vmem:[%s3474_s5 + $0x300] sm:$0xf]  ;;  %v401_v33 = vld [vmem:[%s3474_s5 + $0x308] sm:$0xf]  ;;  %398 = vst [vmem:[%s3481_s6 + $0x17c] sm:$0xf] %v397_v31 }
  0x56   : > { %400 = vst [vmem:[%s3481_s6 + $0x180] sm:$0xf] %v399_v32  ;;  %402 = vst [vmem:[%s3481_s6 + $0x184] sm:$0xf] %v401_v33  ;;  %v403_v34 = vld [vmem:[%s3474_s5 + $0x310] sm:$0xf] }
  0x57   : > { %v405_v35 = vld [vmem:[%s3474_s5 + $0x318] sm:$0xf]  ;;  %v407_v36 = vld [vmem:[%s3474_s5 + $0x320] sm:$0xf]  ;;  %404 = vst [vmem:[%s3481_s6 + $0x188] sm:$0xf] %v403_v34 }
  0x58   : > { %406 = vst [vmem:[%s3481_s6 + $0x18c] sm:$0xf] %v405_v35  ;;  %408 = vst [vmem:[%s3481_s6 + $0x190] sm:$0xf] %v407_v36  ;;  %v409_v37 = vld [vmem:[%s3474_s5 + $0x328] sm:$0xf] }
  0x59   : > { %v411_v38 = vld [vmem:[%s3474_s5 + $0x330] sm:$0xf]  ;;  %v413_v39 = vld [vmem:[%s3474_s5 + $0x338] sm:$0xf]  ;;  %410 = vst [vmem:[%s3481_s6 + $0x194] sm:$0xf] %v409_v37 }
  0x5a   : > { %412 = vst [vmem:[%s3481_s6 + $0x198] sm:$0xf] %v411_v38  ;;  %414 = vst [vmem:[%s3481_s6 + $0x19c] sm:$0xf] %v413_v39  ;;  %v415_v40 = vld [vmem:[%s3474_s5 + $0x340] sm:$0xf] }
  0x5b   : > { %v417_v41 = vld [vmem:[%s3474_s5 + $0x348] sm:$0xf]  ;;  %v419_v42 = vld [vmem:[%s3474_s5 + $0x350] sm:$0xf]  ;;  %416 = vst [vmem:[%s3481_s6 + $0x1a0] sm:$0xf] %v415_v40 }
  0x5c   : > { %418 = vst [vmem:[%s3481_s6 + $0x1a4] sm:$0xf] %v417_v41  ;;  %420 = vst [vmem:[%s3481_s6 + $0x1a8] sm:$0xf] %v419_v42  ;;  %v421_v43 = vld [vmem:[%s3474_s5 + $0x358] sm:$0xf] }
  0x5d   : > { %v423_v44 = vld [vmem:[%s3474_s5 + $0x360] sm:$0xf]  ;;  %v425_v45 = vld [vmem:[%s3474_s5 + $0x368] sm:$0xf]  ;;  %422 = vst [vmem:[%s3481_s6 + $0x1ac] sm:$0xf] %v421_v43 }
  0x5e   : > { %424 = vst [vmem:[%s3481_s6 + $0x1b0] sm:$0xf] %v423_v44  ;;  %426 = vst [vmem:[%s3481_s6 + $0x1b4] sm:$0xf] %v425_v45  ;;  %v427_v46 = vld [vmem:[%s3474_s5 + $0x370] sm:$0xf] }
  0x5f   : > { %v429_v47 = vld [vmem:[%s3474_s5 + $0x378] sm:$0xf]  ;;  %v431_v48 = vld [vmem:[%s3474_s5 + $0x380] sm:$0xf]  ;;  %428 = vst [vmem:[%s3481_s6 + $0x1b8] sm:$0xf] %v427_v46 }
  0x60   : > { %430 = vst [vmem:[%s3481_s6 + $0x1bc] sm:$0xf] %v429_v47  ;;  %432 = vst [vmem:[%s3481_s6 + $0x1c0] sm:$0xf] %v431_v48  ;;  %v433_v49 = vld [vmem:[%s3474_s5 + $0x388] sm:$0xf] }
  0x61   : > { %v435_v50 = vld [vmem:[%s3474_s5 + $0x390] sm:$0xf]  ;;  %v437_v51 = vld [vmem:[%s3474_s5 + $0x398] sm:$0xf]  ;;  %434 = vst [vmem:[%s3481_s6 + $0x1c4] sm:$0xf] %v433_v49 }
  0x62   : > { %436 = vst [vmem:[%s3481_s6 + $0x1c8] sm:$0xf] %v435_v50  ;;  %438 = vst [vmem:[%s3481_s6 + $0x1cc] sm:$0xf] %v437_v51  ;;  %v439_v52 = vld [vmem:[%s3474_s5 + $0x3a0] sm:$0xf] }
  0x63   : > { %v441_v53 = vld [vmem:[%s3474_s5 + $0x3a8] sm:$0xf]  ;;  %v443_v54 = vld [vmem:[%s3474_s5 + $0x3b0] sm:$0xf]  ;;  %440 = vst [vmem:[%s3481_s6 + $0x1d0] sm:$0xf] %v439_v52 }
  0x64   : > { %442 = vst [vmem:[%s3481_s6 + $0x1d4] sm:$0xf] %v441_v53  ;;  %444 = vst [vmem:[%s3481_s6 + $0x1d8] sm:$0xf] %v443_v54  ;;  %v445_v55 = vld [vmem:[%s3474_s5 + $0x3b8] sm:$0xf] }
  0x65   : > { %v447_v56 = vld [vmem:[%s3474_s5 + $0x3c0] sm:$0xf]  ;;  %v449_v57 = vld [vmem:[%s3474_s5 + $0x3c8] sm:$0xf]  ;;  %446 = vst [vmem:[%s3481_s6 + $0x1dc] sm:$0xf] %v445_v55 }
  0x66   : > { %448 = vst [vmem:[%s3481_s6 + $0x1e0] sm:$0xf] %v447_v56  ;;  %450 = vst [vmem:[%s3481_s6 + $0x1e4] sm:$0xf] %v449_v57  ;;  %v451_v58 = vld [vmem:[%s3474_s5 + $0x3d0] sm:$0xf] }
  0x67   : > { %v453_v59 = vld [vmem:[%s3474_s5 + $0x3d8] sm:$0xf]  ;;  %v455_v60 = vld [vmem:[%s3474_s5 + $0x3e0] sm:$0xf]  ;;  %452 = vst [vmem:[%s3481_s6 + $0x1e8] sm:$0xf] %v451_v58 }
  0x68   : > { %454 = vst [vmem:[%s3481_s6 + $0x1ec] sm:$0xf] %v453_v59  ;;  %456 = vst [vmem:[%s3481_s6 + $0x1f0] sm:$0xf] %v455_v60  ;;  %v457_v61 = vld [vmem:[%s3474_s5 + $0x3e8] sm:$0xf] }
  0x69   : > { %v459_v62 = vld [vmem:[%s3474_s5 + $0x3f0] sm:$0xf]  ;;  %v461_v63 = vld [vmem:[%s3474_s5 + $0x3f8] sm:$0xf]  ;;  %458 = vst [vmem:[%s3481_s6 + $0x1f4] sm:$0xf] %v457_v61 }
  0x6a   : > { %460 = vst [vmem:[%s3481_s6 + $0x1f8] sm:$0xf] %v459_v62  ;;  %462 = vst [vmem:[%s3481_s6 + $0x1fc] sm:$0xf] %v461_v63  ;;  %v463_v0 = vld [vmem:[%s3474_s5 + $0x400] sm:$0xf] }
  0x6b   : > { %v465_v1 = vld [vmem:[%s3474_s5 + $0x408] sm:$0xf]  ;;  %v467_v2 = vld [vmem:[%s3474_s5 + $0x410] sm:$0xf]  ;;  %464 = vst [vmem:[%s3481_s6 + $0x200] sm:$0xf] %v463_v0 }
  0x6c   : > { %466 = vst [vmem:[%s3481_s6 + $0x204] sm:$0xf] %v465_v1  ;;  %468 = vst [vmem:[%s3481_s6 + $0x208] sm:$0xf] %v467_v2  ;;  %v469_v3 = vld [vmem:[%s3474_s5 + $0x418] sm:$0xf] }
  0x6d   : > { %v471_v4 = vld [vmem:[%s3474_s5 + $0x420] sm:$0xf]  ;;  %v473_v5 = vld [vmem:[%s3474_s5 + $0x428] sm:$0xf]  ;;  %470 = vst [vmem:[%s3481_s6 + $0x20c] sm:$0xf] %v469_v3 }
  0x6e   : > { %472 = vst [vmem:[%s3481_s6 + $0x210] sm:$0xf] %v471_v4  ;;  %474 = vst [vmem:[%s3481_s6 + $0x214] sm:$0xf] %v473_v5  ;;  %v475_v6 = vld [vmem:[%s3474_s5 + $0x430] sm:$0xf] }
  0x6f   : > { %v477_v7 = vld [vmem:[%s3474_s5 + $0x438] sm:$0xf]  ;;  %v479_v8 = vld [vmem:[%s3474_s5 + $0x440] sm:$0xf]  ;;  %476 = vst [vmem:[%s3481_s6 + $0x218] sm:$0xf] %v475_v6 }
  0x70   : > { %478 = vst [vmem:[%s3481_s6 + $0x21c] sm:$0xf] %v477_v7  ;;  %480 = vst [vmem:[%s3481_s6 + $0x220] sm:$0xf] %v479_v8  ;;  %v481_v9 = vld [vmem:[%s3474_s5 + $0x448] sm:$0xf] }
  0x71   : > { %v483_v10 = vld [vmem:[%s3474_s5 + $0x450] sm:$0xf]  ;;  %v485_v11 = vld [vmem:[%s3474_s5 + $0x458] sm:$0xf]  ;;  %482 = vst [vmem:[%s3481_s6 + $0x224] sm:$0xf] %v481_v9 }
  0x72   : > { %484 = vst [vmem:[%s3481_s6 + $0x228] sm:$0xf] %v483_v10  ;;  %486 = vst [vmem:[%s3481_s6 + $0x22c] sm:$0xf] %v485_v11  ;;  %v487_v12 = vld [vmem:[%s3474_s5 + $0x460] sm:$0xf] }
  0x73   : > { %v489_v13 = vld [vmem:[%s3474_s5 + $0x468] sm:$0xf]  ;;  %v491_v14 = vld [vmem:[%s3474_s5 + $0x470] sm:$0xf]  ;;  %488 = vst [vmem:[%s3481_s6 + $0x230] sm:$0xf] %v487_v12 }
  0x74   : > { %490 = vst [vmem:[%s3481_s6 + $0x234] sm:$0xf] %v489_v13  ;;  %492 = vst [vmem:[%s3481_s6 + $0x238] sm:$0xf] %v491_v14  ;;  %v493_v15 = vld [vmem:[%s3474_s5 + $0x478] sm:$0xf] }
  0x75   : > { %494 = vst [vmem:[%s3481_s6 + $0x23c] sm:$0xf] %v493_v15 }
  0x76 PF: > { %p2671_p8 = scmp.ge.s32.totalorder %s3399_s19, 1  ;;  %p816_p9 = scmp.lt.s32.totalorder %s3399_s19, 3 }
  0x78   : > { %p817_p10 = pnand %p2671_p8, %p816_p9 }
  0x79   : > { %s823_s7 = sand.u32 (!%p817_p10), 1, %s3383_s15   ;;  %v3219_v16 = vld [vmem:[%s4249_s0 + $0x4] ss:$36 sps:$4 sm:$0xff] (!%p817_p10)   ;;  %v3222_v17 = vld [vmem:[%s4249_s0 + $0xc] ss:$36 sps:$4 sm:$0xff] (!%p817_p10)   ;;  %p866_p11 = scmp.lt.s32.totalorder (!%p817_p10), %s3391_s17, 1 }
  0x7a   : > { %820 = sbr.rel (%p817_p10) target bundleno = 530 (0x212), region = 73  ;;  %1930 = vmatprep.mubr.bf16.mxu0 (!%p817_p10), %v3219_v16  ;;  %2027 = vmatprep.mubr.bf16.mxu1 (!%p817_p10), %v3222_v17  ;;  %v3217_v48 = vld [vmem:[%s4249_s0] ss:$36 sps:$4 sm:$0xff] (!%p817_p10)   ;;  %v3220_v50 = vld [vmem:[%s4249_s0 + $0x8] ss:$36 sps:$4 sm:$0xff] (!%p817_p10)   ;;  %s2672_s14 = sshll.u32 (!%p817_p10), %s823_s7, 7 }
  0x7b   : > { %s3144_s8 = smul.u32 (!%p817_p10), 576, %s823_s7  ;;  %v3227_v52 = vld [vmem:[%s4249_s0 + $0x4c] ss:$36 sps:$4 sm:$0xff] (!%p817_p10)   ;;  %v3229_v57 = vld [vmem:[%s4249_s0 + $0x54] ss:$36 sps:$4 sm:$0xff] (!%p817_p10)   ;;  %s4165_s15 = scalar_lea.vmem (!%p817_p10), [#allocation3], %s2672_s14 }
  0x7c   : > { %v3231_v58 = vld [vmem:[%s4249_s0 + $0x48] ss:$36 sps:$4 sm:$0xff] (!%p817_p10)   ;;  %v3232_v59 = vld [vmem:[%s4249_s0 + $0x50] ss:$36 sps:$4 sm:$0xff] (!%p817_p10)   ;;  %v3239_v1 = vld [vmem:[%s4249_s0 + $0x9c] ss:$36 sps:$4 sm:$0xff] (!%p817_p10)  }
  0x7d   : > { %s3777_s13 = scalar_lea.vmem (!%p817_p10), [#allocation2], %s3144_s8  ;;  %v3237_v0 = vld [vmem:[%s4249_s0 + $0x94] ss:$36 sps:$4 sm:$0xff] (!%p817_p10)   ;;  %v3247_v8 = vld [vmem:[%s4249_s0 + $0xdc] ss:$36 sps:$4 sm:$0xff] (!%p817_p10)  }
  0x7e   : > { %v3185_v18 = vld [vmem:[%s3777_s13 + $0x40] sm:$0xff] (!%p817_p10)   ;;  %v3189_v22 = vld [vmem:[%s3777_s13 + $0x48] sm:$0xff] (!%p817_p10)   ;;  %v3193_v26 = vld [vmem:[%s3777_s13 + $0x50] sm:$0xff] (!%p817_p10)  }
  0x7f   : > { %v3186_v19 = vld [vmem:[%s3777_s13 + $0xc0] sm:$0xff] (!%p817_p10)   ;;  %2823 = vmatprep.subr.bf16.mxu0 (!%p817_p10), %v3185_v18  ;;  %v3190_v23 = vld [vmem:[%s3777_s13 + $0xc8] sm:$0xff] (!%p817_p10)   ;;  %v3194_v27 = vld [vmem:[%s3777_s13 + $0xd0] sm:$0xff] (!%p817_p10)  }
  0x80   : > { %v3187_v20 = vld [vmem:[%s3777_s13] sm:$0xff] (!%p817_p10)   ;;  %2887 = vmatprep.subr.bf16.mxu1 (!%p817_p10), %v3186_v19  ;;  %v3191_v24 = vld [vmem:[%s3777_s13 + $0x8] sm:$0xff] (!%p817_p10)   ;;  %v3195_v28 = vld [vmem:[%s3777_s13 + $0x10] sm:$0xff] (!%p817_p10)  }
  0x81   : > { %v3188_v21 = vld [vmem:[%s3777_s13 + $0x80] sm:$0xff]   ;;  %2824 = vmatpush3.bf16.msra.mxu0 %v3187_v20  ;;  %v3192_v25 = vld [vmem:[%s3777_s13 + $0x88] sm:$0xff]   ;;  %v3196_v29 = vld [vmem:[%s3777_s13 + $0x90] sm:$0xff]   ;;  %s867_s5 = scalar_select %p866_p11, %s3391_s17, 1 }
  0x82   : > { %2888 = vmatpush3.bf16.msra.mxu1 %v3188_v21  ;;  %2825 = vmatprep.subr.bf16.mxu0 %v3189_v22  ;;  %v3197_v30 = vld [vmem:[%s3777_s13 + $0x58] sm:$0xff]   ;;  %v3201_v34 = vld [vmem:[%s3777_s13 + $0x60] sm:$0xff]   ;;  %v3205_v38 = vld [vmem:[%s3777_s13 + $0x68] sm:$0xff]   ;;  %s2820_s7 = sshll.u32 (%p3461_p6), %s3391_s17, 3 }
  0x83   : > { %2889 = vmatprep.subr.bf16.mxu1 %v3190_v23  ;;  %v3198_v31 = vld [vmem:[%s3777_s13 + $0xd8] sm:$0xff]   ;;  %v3202_v35 = vld [vmem:[%s3777_s13 + $0xe0] sm:$0xff]   ;;  %v3206_v39 = vld [vmem:[%s3777_s13 + $0xe8] sm:$0xff]   ;;  %s868_s9 = scalar_lea.vmem %s4251_s2, %s867_s5  ;;  %s871_s12 = scalar_lea.vmem %s4252_s3, %s867_s5 }
  0x84   : > { %v3199_v32 = vld [vmem:[%s3777_s13 + $0x18] sm:$0xff]   ;;  %v3203_v36 = vld [vmem:[%s3777_s13 + $0x20] sm:$0xff]   ;;  %v3207_v40 = vld [vmem:[%s3777_s13 + $0x28] sm:$0xff]   ;;  %s2472_s23 = scalar_lea.vmem (%p3461_p6), %s4253_s4, %s2820_s7 }
  0x85   : > { %2826 = vmatpush3.bf16.msra.mxu0 %v3191_v24  ;;  %v3200_v33 = vld [vmem:[%s3777_s13 + $0x98] sm:$0xff]   ;;  %v3204_v37 = vld [vmem:[%s3777_s13 + $0xa0] sm:$0xff]   ;;  %v3208_v41 = vld [vmem:[%s3777_s13 + $0xa8] sm:$0xff]  }
  0x86   : > { %2890 = vmatpush3.bf16.msra.mxu1 %v3192_v25  ;;  %2827 = vmatprep.subr.bf16.mxu0 %v3193_v26  ;;  %v3209_v42 = vld [vmem:[%s3777_s13 + $0x70] sm:$0xff]   ;;  %v3213_v46 = vld [vmem:[%s3777_s13 + $0x78] sm:$0xff]   ;;  %v3223_v53 = vld [vmem:[%s3777_s13 + $0x140] sm:$0xff]  }
  0x87   : > { %2891 = vmatprep.subr.bf16.mxu1 %v3194_v27  ;;  %v3210_v43 = vld [vmem:[%s3777_s13 + $0xf0] sm:$0xff]   ;;  %v3214_v47 = vld [vmem:[%s3777_s13 + $0xf8] sm:$0xff]   ;;  %v3224_v54 = vld [vmem:[%s3777_s13 + $0x1c0] sm:$0xff]  }
  0x88   : > { %v3211_v44 = vld [vmem:[%s3777_s13 + $0x30] sm:$0xff]   ;;  %v3215_v49 = vld [vmem:[%s3777_s13 + $0x38] sm:$0xff]   ;;  %v3225_v55 = vld [vmem:[%s3777_s13 + $0x100] sm:$0xff]  }
  0x89   : > { %2828 = vmatpush3.bf16.msra.mxu0 %v3195_v28  ;;  %v3212_v45 = vld [vmem:[%s3777_s13 + $0xb0] sm:$0xff]   ;;  %v3216_v51 = vld [vmem:[%s3777_s13 + $0xb8] sm:$0xff]   ;;  %v3226_v56 = vld [vmem:[%s3777_s13 + $0x180] sm:$0xff]  }
  0x8a   : > { %2892 = vmatpush3.bf16.msra.mxu1 %v3196_v29  ;;  %2829 = vmatprep.subr.bf16.mxu0 %v3197_v30  ;;  %v3233_v60 = vld [vmem:[%s3777_s13 + $0x148] sm:$0xff]   ;;  %v3243_v2 = vld [vmem:[%s3777_s13 + $0x150] sm:$0xff]   ;;  %v3242_v5 = vld [vmem:[%s4249_s0 + $0x98] ss:$36 sps:$4 sm:$0xff]  }
  0x8b   : > { %2893 = vmatprep.subr.bf16.mxu1 %v3198_v31  ;;  %v3234_v61 = vld [vmem:[%s3777_s13 + $0x1c8] sm:$0xff]   ;;  %v3241_v3 = vld [vmem:[%s4249_s0 + $0x90] ss:$36 sps:$4 sm:$0xff]   ;;  %v3253_v10 = vld [vmem:[%s3777_s13 + $0x158] sm:$0xff]  }
  0x8c   : > { %v3235_v62 = vld [vmem:[%s3777_s13 + $0x108] sm:$0xff]   ;;  %v3244_v4 = vld [vmem:[%s3777_s13 + $0x1d0] sm:$0xff]   ;;  %v3254_v11 = vld [vmem:[%s3777_s13 + $0x1d8] sm:$0xff]  }
  0x8d   : > { %2830 = vmatpush3.bf16.msra.mxu0 %v3199_v32  ;;  %v3236_v63 = vld [vmem:[%s3777_s13 + $0x188] sm:$0xff]   ;;  %v3245_v6 = vld [vmem:[%s3777_s13 + $0x110] sm:$0xff]   ;;  %v3255_v12 = vld [vmem:[%s3777_s13 + $0x118] sm:$0xff]  }
  0x8e   : > { %2894 = vmatpush3.bf16.msra.mxu1 %v3200_v33  ;;  %2831 = vmatprep.subr.bf16.mxu0 %v3201_v34  ;;  %v3246_v7 = vld [vmem:[%s3777_s13 + $0x190] sm:$0xff]   ;;  %v3249_v9 = vld [vmem:[%s4249_s0 + $0xe4] ss:$36 sps:$4 sm:$0xff]   ;;  %v3256_v13 = vld [vmem:[%s3777_s13 + $0x198] sm:$0xff]  }
  0x8f   : > { %2895 = vmatprep.subr.bf16.mxu1 %v3202_v35  ;;  %v3251_v14 = vld [vmem:[%s4249_s0 + $0xd8] ss:$36 sps:$4 sm:$0xff]   ;;  %v3252_v15 = vld [vmem:[%s4249_s0 + $0xe0] ss:$36 sps:$4 sm:$0xff]   ;;  %v3259_v17 = vld [vmem:[%s4249_s0 + $0x12c] ss:$36 sps:$4 sm:$0xff]  }
  0x90   : > { %v3257_v16 = vld [vmem:[%s4249_s0 + $0x124] ss:$36 sps:$4 sm:$0xff]   ;;  %v3267_v24 = vld [vmem:[%s4249_s0 + $0x16c] ss:$36 sps:$4 sm:$0xff]   ;;  %v3269_v25 = vld [vmem:[%s4249_s0 + $0x174] ss:$36 sps:$4 sm:$0xff]  }
  0x91   : > { %2832 = vmatpush3.bf16.msra.mxu0 %v3203_v36  ;;  %v3263_v18 = vld [vmem:[%s3777_s13 + $0x160] sm:$0xff]   ;;  %v3262_v23 = vld [vmem:[%s4249_s0 + $0x128] ss:$36 sps:$4 sm:$0xff]   ;;  %v3272_v31 = vld [vmem:[%s4249_s0 + $0x170] ss:$36 sps:$4 sm:$0xff]  }
  0x92   : > { %2896 = vmatpush3.bf16.msra.mxu1 %v3204_v37  ;;  %2833 = vmatprep.subr.bf16.mxu0 %v3205_v38  ;;  %v3264_v19 = vld [vmem:[%s3777_s13 + $0x1e0] sm:$0xff]   ;;  %v3273_v26 = vld [vmem:[%s3777_s13 + $0x168] sm:$0xff]   ;;  %v3277_v32 = vld [vmem:[%s4249_s0 + $0x1b4] ss:$36 sps:$4 sm:$0xff]  }
  0x93   : > { %2897 = vmatprep.subr.bf16.mxu1 %v3206_v39  ;;  %v3265_v20 = vld [vmem:[%s3777_s13 + $0x120] sm:$0xff]   ;;  %v3274_v27 = vld [vmem:[%s3777_s13 + $0x1e8] sm:$0xff]   ;;  %v3283_v34 = vld [vmem:[%s3777_s13 + $0x170] sm:$0xff]  }
  0x94   : > { %v3266_v21 = vld [vmem:[%s3777_s13 + $0x1a0] sm:$0xff]   ;;  %v3275_v28 = vld [vmem:[%s3777_s13 + $0x128] sm:$0xff]   ;;  %v3284_v35 = vld [vmem:[%s3777_s13 + $0x1f0] sm:$0xff]  }
  0x95   : > { %2834 = vmatpush3.bf16.msra.mxu0 %v3207_v40  ;;  %v3261_v22 = vld [vmem:[%s4249_s0 + $0x120] ss:$36 sps:$4 sm:$0xff]   ;;  %v3276_v29 = vld [vmem:[%s3777_s13 + $0x1a8] sm:$0xff]   ;;  %v3285_v36 = vld [vmem:[%s3777_s13 + $0x130] sm:$0xff]  }
  0x96   : > { %2898 = vmatpush3.bf16.msra.mxu1 %v3208_v41  ;;  %2835 = vmatprep.subr.bf16.mxu0 %v3209_v42  ;;  %v3271_v30 = vld [vmem:[%s4249_s0 + $0x168] ss:$36 sps:$4 sm:$0xff]   ;;  %v3279_v33 = vld [vmem:[%s4249_s0 + $0x1bc] ss:$36 sps:$4 sm:$0xff]   ;;  %v3286_v37 = vld [vmem:[%s3777_s13 + $0x1b0] sm:$0xff]  }
  0x97   : > { %2899 = vmatprep.subr.bf16.mxu1 %v3210_v43  ;;  %v3281_v38 = vld [vmem:[%s4249_s0 + $0x1b0] ss:$36 sps:$4 sm:$0xff]   ;;  %v3282_v39 = vld [vmem:[%s4249_s0 + $0x1b8] ss:$36 sps:$4 sm:$0xff]   ;;  %v3289_v42 = vld [vmem:[%s4249_s0 + $0x204] ss:$36 sps:$4 sm:$0xff]  }
  0x98   : > { %v3287_v40 = vld [vmem:[%s4249_s0 + $0x1fc] ss:$36 sps:$4 sm:$0xff]  }
  0x99   : > { %2836 = vmatpush3.bf16.msra.mxu0 %v3211_v44  ;;  %v3293_v41 = vld [vmem:[%s3777_s13 + $0x178] sm:$0xff]  }
  0x9a   : > { %2900 = vmatpush3.bf16.msra.mxu1 %v3212_v45  ;;  %2837 = vmatprep.subr.bf16.mxu0 %v3213_v46  ;;  %v3294_v43 = vld [vmem:[%s3777_s13 + $0x1f8] sm:$0xff]   ;;  %v3303_v46 = vld [vmem:[%s3777_s13 + $0x200] sm:$0xff]  }
  0x9b   : > { %2901 = vmatprep.subr.bf16.mxu1 %v3214_v47  ;;  %v3295_v44 = vld [vmem:[%s3777_s13 + $0x138] sm:$0xff]  }
  0x9c   : > { %v3296_v45 = vld [vmem:[%s3777_s13 + $0x1b8] sm:$0xff]  }
  0x9d   : > { %2838 = vmatpush3.bf16.msra.mxu0 %v3215_v49  ;;  %v3291_v47 = vld [vmem:[%s4249_s0 + $0x1f8] ss:$36 sps:$4 sm:$0xff]  }
  0x9e   : > { %2902 = vmatpush3.bf16.msra.mxu1 %v3216_v51  ;;  %2951 = vmatprep.subr.bf16.mxu0 %v3223_v53  ;;  %v3299_v49 = vld [vmem:[%s4249_s0 + $0x14] ss:$36 sps:$4 sm:$0xff]   ;;  %v3304_v53 = vld [vmem:[%s4249_s0 + $0x5c] ss:$36 sps:$4 sm:$0xff]  }
  0x9f   : > { %3015 = vmatprep.subr.bf16.mxu1 %v3224_v54  ;;  %v3297_v51 = vld [vmem:[%s4249_s0 + $0x10] ss:$36 sps:$4 sm:$0xff]   ;;  %v3306_v54 = vld [vmem:[%s4249_s0 + $0x64] ss:$36 sps:$4 sm:$0xff]  }
  0xa0   : > { %1931 = vmatmul.mubr.bf16.vlgmr.msra.gmra.mrb[0].mxu0 %v3217_v48  ;;  %v3292_v48 = vld [vmem:[%s4249_s0 + $0x200] ss:$36 sps:$4 sm:$0xff]  }
  0xa1   : > { %2028 = vmatmul.mubr.bf16.vlgmr.msra.gmra.mrb[0].mxu1 %v3220_v50  ;;  %2952 = vmatpush3.bf16.msra.mxu0 %v3225_v55  ;;  %v3302_v50 = vld [vmem:[%s4249_s0 + $0x1c] ss:$36 sps:$4 sm:$0xff]   ;;  %v3310_v55 = vld [vmem:[%s3777_s13 + $0x208] sm:$0xff]  }
  0xa2   : > { %3016 = vmatpush3.bf16.msra.mxu1 %v3226_v56  ;;  %1938 = vmatprep.mubr.bf16.mxu0 %v3227_v52  ;;  %v3300_v52 = vld [vmem:[%s4249_s0 + $0x18] ss:$36 sps:$4 sm:$0xff]   ;;  %v3317_v56 = vld [vmem:[%s3777_s13 + $0x210] sm:$0xff]  }
  0xa3   : > { %2035 = vmatprep.mubr.bf16.mxu1 %v3229_v57  ;;  %2953 = vmatprep.subr.bf16.mxu0 %v3233_v60  ;;  %v3308_v57 = vld [vmem:[%s4249_s0 + $0x58] ss:$36 sps:$4 sm:$0xff]   ;;  %v3313_v60 = vld [vmem:[%s4249_s0 + $0xac] ss:$36 sps:$4 sm:$0xff]  }
  0xa4   : > { %3017 = vmatprep.subr.bf16.mxu1 %v3234_v61  ;;  %v3324_v61 = vld [vmem:[%s3777_s13 + $0x218] sm:$0xff]  }
  0xa5   : > { %2954 = vmatpush3.bf16.msra.mxu0 %v3235_v62  ;;  %v3315_v62 = vld [vmem:[%s4249_s0 + $0xa0] ss:$36 sps:$4 sm:$0xff]  }
  0xa6   : > { %3018 = vmatpush3.bf16.msra.mxu1 %v3236_v63  ;;  %2955 = vmatprep.subr.bf16.mxu0 %v3243_v2  ;;  %v3331_v63 = vld [vmem:[%s3777_s13 + $0x220] sm:$0xff]   ;;  %v3320_v2 = vld [vmem:[%s4249_s0 + $0xf4] ss:$36 sps:$4 sm:$0xff]  }
  0xa7   : > { %3019 = vmatprep.subr.bf16.mxu1 %v3244_v4  ;;  %v3345_v4 = vld [vmem:[%s3777_s13 + $0x230] sm:$0xff]  }
  0xa8   : > { %1939 = vmatmul.mubr.bf16.gmra.mrb[4].mxu0 %v3231_v58  ;;  %v3309_v58 = vld [vmem:[%s4249_s0 + $0x60] ss:$36 sps:$4 sm:$0xff]  }
  0xa9   : > { %2036 = vmatmul.mubr.bf16.gmra.mrb[4].mxu1 %v3232_v59  ;;  %1946 = vmatprep.mubr.bf16.mxu0 %v3237_v0  ;;  %v3311_v59 = vld [vmem:[%s4249_s0 + $0xa4] ss:$36 sps:$4 sm:$0xff]  }
  0xaa   : > { %2043 = vmatprep.mubr.bf16.mxu1 %v3239_v1  ;;  %2956 = vmatpush3.bf16.msra.mxu0 %v3245_v6  ;;  %v3316_v0 = vld [vmem:[%s4249_s0 + $0xa8] ss:$36 sps:$4 sm:$0xff]   ;;  %v3323_v6 = vld [vmem:[%s4249_s0 + $0xf0] ss:$36 sps:$4 sm:$0xff]  }
  0xab   : > { %3020 = vmatpush3.bf16.msra.mxu1 %v3246_v7  ;;  %2957 = vmatprep.subr.bf16.mxu0 %v3253_v10  ;;  %v3318_v1 = vld [vmem:[%s4249_s0 + $0xec] ss:$36 sps:$4 sm:$0xff]   ;;  %v3325_v7 = vld [vmem:[%s4249_s0 + $0x134] ss:$36 sps:$4 sm:$0xff]  }
  0xac   : > { %3021 = vmatprep.subr.bf16.mxu1 %v3254_v11  ;;  %v3329_v10 = vld [vmem:[%s4249_s0 + $0x130] ss:$36 sps:$4 sm:$0xff]   ;;  %v3330_v11 = vld [vmem:[%s4249_s0 + $0x138] ss:$36 sps:$4 sm:$0xff]  }
  0xae   : > { %2958 = vmatpush3.bf16.msra.mxu0 %v3255_v12  ;;  %v3332_v12 = vld [vmem:[%s4249_s0 + $0x17c] ss:$36 sps:$4 sm:$0xff]  }
  0xaf   : > { %3022 = vmatpush3.bf16.msra.mxu1 %v3256_v13  ;;  %2959 = vmatprep.subr.bf16.mxu0 %v3263_v18  ;;  %v3334_v13 = vld [vmem:[%s4249_s0 + $0x184] ss:$36 sps:$4 sm:$0xff]  }
  0xb0   : > { %1947 = vmatmul.mubr.bf16.gmra.mrb[8].mxu0 %v3241_v3  ;;  %3023 = vmatprep.subr.bf16.mxu1 %v3264_v19  ;;  %v3338_v3 = vld [vmem:[%s3777_s13 + $0x228] sm:$0xff]   ;;  %v3343_v18 = vld [vmem:[%s4249_s0 + $0x1c0] ss:$36 sps:$4 sm:$0xff]  }
  0xb1   : > { %2044 = vmatmul.mubr.bf16.gmra.mrb[8].mxu1 %v3242_v5  ;;  %1954 = vmatprep.mubr.bf16.mxu0 %v3247_v8  ;;  %v3322_v5 = vld [vmem:[%s4249_s0 + $0xe8] ss:$36 sps:$4 sm:$0xff]   ;;  %v3327_v8 = vld [vmem:[%s4249_s0 + $0x13c] ss:$36 sps:$4 sm:$0xff]  }
  0xb2   : > { %2051 = vmatprep.mubr.bf16.mxu1 %v3249_v9  ;;  %2960 = vmatpush3.bf16.msra.mxu0 %v3265_v20  ;;  %v3352_v9 = vld [vmem:[%s3777_s13 + $0x238] sm:$0xff]   ;;  %v3344_v19 = vld [vmem:[%s4249_s0 + $0x1c8] ss:$36 sps:$4 sm:$0xff]  }
  0xb3   : > { %3024 = vmatpush3.bf16.msra.mxu1 %v3266_v21  ;;  %2961 = vmatprep.subr.bf16.mxu0 %v3273_v26  ;;  %v3346_v20 = vld [vmem:[%s4249_s0 + $0x20c] ss:$36 sps:$4 sm:$0xff]   ;;  %v3348_v21 = vld [vmem:[%s4249_s0 + $0x214] ss:$36 sps:$4 sm:$0xff]  }
  0xb4   : > { %3025 = vmatprep.subr.bf16.mxu1 %v3274_v27  ;;  %v3355_v26 = vld [vmem:[%s4249_s0 + $0x68] ss:$36 sps:$4 sm:$0xff]  }
  0xb5   : > { %v3356_v27 = vld [vmem:[%s4249_s0 + $0x188] ss:$36 sps:$4 sm:$0xff]  }
  0xb6   : > { %2962 = vmatpush3.bf16.msra.mxu0 %v3275_v28  ;;  %v3357_v28 = vld [vmem:[%s4249_s0 + $0xb0] ss:$36 sps:$4 sm:$0xff]  }
  0xb7   : > { %3026 = vmatpush3.bf16.msra.mxu1 %v3276_v29  ;;  %2963 = vmatprep.subr.bf16.mxu0 %v3283_v34  ;;  %v3358_v29 = vld [vmem:[%s4249_s0 + $0x1d0] ss:$36 sps:$4 sm:$0xff]  }
  0xb8   : > { %1955 = vmatmul.mubr.bf16.gmra.mrb[12].mxu0 %v3251_v14  ;;  %3027 = vmatprep.subr.bf16.mxu1 %v3284_v35  ;;  %v3336_v14 = vld [vmem:[%s4249_s0 + $0x178] ss:$36 sps:$4 sm:$0xff]  }
  0xb9   : > { %2052 = vmatmul.mubr.bf16.gmra.mrb[12].mxu1 %v3252_v15  ;;  %1962 = vmatprep.mubr.bf16.mxu0 %v3257_v16  ;;  %v3337_v15 = vld [vmem:[%s4249_s0 + $0x180] ss:$36 sps:$4 sm:$0xff]  }
  0xba   : > { %2059 = vmatprep.mubr.bf16.mxu1 %v3259_v17  ;;  %2964 = vmatpush3.bf16.msra.mxu0 %v3285_v36  ;;  %v3339_v16 = vld [vmem:[%s4249_s0 + $0x1c4] ss:$36 sps:$4 sm:$0xff]   ;;  %v3341_v17 = vld [vmem:[%s4249_s0 + $0x1cc] ss:$36 sps:$4 sm:$0xff]  }
  0xbb   : > { %3028 = vmatpush3.bf16.msra.mxu1 %v3286_v37  ;;  %2965 = vmatprep.subr.bf16.mxu0 %v3293_v41 }
  0xbc   : > { %3029 = vmatprep.subr.bf16.mxu1 %v3294_v43 }
  0xbe   : > { %2966 = vmatpush3.bf16.msra.mxu0 %v3295_v44 }
  0xbf   : > { %3030 = vmatpush3.bf16.msra.mxu1 %v3296_v45  ;;  %3095 = vmatprep.subr.bf16.mxu0 %v3303_v46 }
  0xc0   : > { %1963 = vmatmul.mubr.bf16.gmra.mrb[16].mxu0 %v3261_v22  ;;  %3127 = vmatprep.subr.bf16.mxu1 %v3303_v46  ;;  %v3350_v22 = vld [vmem:[%s4249_s0 + $0x208] ss:$36 sps:$4 sm:$0xff]  }
  0xc1   : > { %2060 = vmatmul.mubr.bf16.gmra.mrb[16].mxu1 %v3262_v23  ;;  %1970 = vmatprep.mubr.bf16.mxu0 %v3267_v24  ;;  %v3351_v23 = vld [vmem:[%s4249_s0 + $0x210] ss:$36 sps:$4 sm:$0xff]   ;;  %v3353_v24 = vld [vmem:[%s4249_s0 + $0x20] ss:$36 sps:$4 sm:$0xff]  }
  0xc2   : > { %2067 = vmatprep.mubr.bf16.mxu1 %v3269_v25  ;;  %v3354_v25 = vld [vmem:[%s4249_s0 + $0x140] ss:$36 sps:$4 sm:$0xff]  }
  0xc8   : > { %1971 = vmatmul.mubr.bf16.gmra.mrb[20].mxu0 %v3271_v30  ;;  %v3359_v30 = vld [vmem:[%s4249_s0 + $0xf8] ss:$36 sps:$4 sm:$0xff]  }
  0xc9   : > { %2068 = vmatmul.mubr.bf16.gmra.mrb[20].mxu1 %v3272_v31  ;;  %1978 = vmatprep.mubr.bf16.mxu0 %v3277_v32  ;;  %v3360_v31 = vld [vmem:[%s4249_s0 + $0x218] ss:$36 sps:$4 sm:$0xff]  }
  0xca   : > { %2075 = vmatprep.mubr.bf16.mxu1 %v3279_v33 }
  0xd0   : > { %1979 = vmatmul.mubr.bf16.gmra.mrb[24].mxu0 %v3281_v38 }
  0xd1   : > { %2076 = vmatmul.mubr.bf16.gmra.mrb[24].mxu1 %v3282_v39  ;;  %1986 = vmatprep.mubr.bf16.mxu0 %v3287_v40 }
  0xd2   : > { %2083 = vmatprep.mubr.bf16.mxu1 %v3289_v42 }
  0xd8   : > { %1987 = vmatmul.mubr.bf16.gmra.mrb[28].mxu0 %v3291_v47 }
  0xd9   : > { %2084 = vmatmul.mubr.bf16.gmra.mrb[28].mxu1 %v3292_v48  ;;  %2124 = vmatprep.mubr.bf16.mxu0 %v3299_v49 }
  0xda   : > { %2221 = vmatprep.mubr.bf16.mxu1 %v3302_v50 }
  0xe0   : > { %2125 = vmatmul.mubr.bf16.vlgmr.msra.gmra.mrb[32].mxu0 %v3297_v51 }
  0xe1   : > { %2222 = vmatmul.mubr.bf16.vlgmr.msra.gmra.mrb[32].mxu1 %v3300_v52  ;;  %3096 = vmatpush3.bf16.msra.mxu0 %v3303_v46 }
  0xe2   : > { %3135 = vmatpush3.bf16.msra.mxu1 %v3303_v46  ;;  %2132 = vmatprep.mubr.bf16.mxu0 %v3304_v53 }
  0xe3   : > { %2229 = vmatprep.mubr.bf16.mxu1 %v3306_v54  ;;  %3097 = vmatprep.subr.bf16.mxu0 %v3310_v55 }
  0xe4   : > { %3128 = vmatprep.subr.bf16.mxu1 %v3310_v55 }
  0xe5   : > { %3098 = vmatpush3.bf16.msra.mxu0 %v3310_v55 }
  0xe6   : > { %3136 = vmatpush3.bf16.msra.mxu1 %v3310_v55  ;;  %3099 = vmatprep.subr.bf16.mxu0 %v3317_v56 }
  0xe7   : > { %3129 = vmatprep.subr.bf16.mxu1 %v3317_v56 }
  0xe8   : > { %2133 = vmatmul.mubr.bf16.gmra.mrb[36].mxu0 %v3308_v57 }
  0xe9   : > { %2230 = vmatmul.mubr.bf16.gmra.mrb[36].mxu1 %v3309_v58  ;;  %2140 = vmatprep.mubr.bf16.mxu0 %v3311_v59 }
  0xea   : > { %2237 = vmatprep.mubr.bf16.mxu1 %v3313_v60  ;;  %3100 = vmatpush3.bf16.msra.mxu0 %v3317_v56 }
  0xeb   : > { %3137 = vmatpush3.bf16.msra.mxu1 %v3317_v56  ;;  %3101 = vmatprep.subr.bf16.mxu0 %v3324_v61 }
  0xec   : > { %3130 = vmatprep.subr.bf16.mxu1 %v3324_v61 }
  0xee   : > { %3102 = vmatpush3.bf16.msra.mxu0 %v3324_v61 }
  0xef   : > { %3138 = vmatpush3.bf16.msra.mxu1 %v3324_v61  ;;  %3103 = vmatprep.subr.bf16.mxu0 %v3331_v63 }
  0xf0   : > { %2141 = vmatmul.mubr.bf16.gmra.mrb[40].mxu0 %v3315_v62  ;;  %3131 = vmatprep.subr.bf16.mxu1 %v3331_v63 }
  0xf1   : > { %2238 = vmatmul.mubr.bf16.gmra.mrb[40].mxu1 %v3316_v0  ;;  %2148 = vmatprep.mubr.bf16.mxu0 %v3318_v1 }
  0xf2   : > { %2245 = vmatprep.mubr.bf16.mxu1 %v3320_v2  ;;  %3104 = vmatpush3.bf16.msra.mxu0 %v3331_v63 }
  0xf3   : > { %3139 = vmatpush3.bf16.msra.mxu1 %v3331_v63  ;;  %3105 = vmatprep.subr.bf16.mxu0 %v3338_v3 }
  0xf4   : > { %3132 = vmatprep.subr.bf16.mxu1 %v3338_v3 }
  0xf6   : > { %3106 = vmatpush3.bf16.msra.mxu0 %v3338_v3 }
  0xf7   : > { %3140 = vmatpush3.bf16.msra.mxu1 %v3338_v3  ;;  %3107 = vmatprep.subr.bf16.mxu0 %v3345_v4 }
  0xf8   : > { %2149 = vmatmul.mubr.bf16.gmra.mrb[44].mxu0 %v3322_v5  ;;  %3133 = vmatprep.subr.bf16.mxu1 %v3345_v4 }
  0xf9   : > { %2246 = vmatmul.mubr.bf16.gmra.mrb[44].mxu1 %v3323_v6  ;;  %2156 = vmatprep.mubr.bf16.mxu0 %v3325_v7 }
  0xfa   : > { %2253 = vmatprep.mubr.bf16.mxu1 %v3327_v8  ;;  %3108 = vmatpush3.bf16.msra.mxu0 %v3345_v4 }
  0xfb   : > { %3141 = vmatpush3.bf16.msra.mxu1 %v3345_v4  ;;  %3109 = vmatprep.subr.bf16.mxu0 %v3352_v9 }
  0xfc   : > { %3134 = vmatprep.subr.bf16.mxu1 %v3352_v9 }
  0xfe   : > { %3110 = vmatpush3.bf16.msra.mxu0 %v3352_v9 }
  0xff   : > { %3142 = vmatpush3.bf16.msra.mxu1 %v3352_v9 }
 0x100   : > { %2157 = vmatmul.mubr.bf16.gmra.mrb[48].mxu0 %v3329_v10 }
 0x101   : > { %2254 = vmatmul.mubr.bf16.gmra.mrb[48].mxu1 %v3330_v11  ;;  %2164 = vmatprep.mubr.bf16.mxu0 %v3332_v12 }
 0x102   : > { %2261 = vmatprep.mubr.bf16.mxu1 %v3334_v13 }
 0x108   : > { %2165 = vmatmul.mubr.bf16.gmra.mrb[52].mxu0 %v3336_v14 }
 0x109   : > { %2262 = vmatmul.mubr.bf16.gmra.mrb[52].mxu1 %v3337_v15  ;;  %2172 = vmatprep.mubr.bf16.mxu0 %v3339_v16 }
 0x10a   : > { %2269 = vmatprep.mubr.bf16.mxu1 %v3341_v17 }
 0x110   : > { %2173 = vmatmul.mubr.bf16.gmra.mrb[56].mxu0 %v3343_v18 }
 0x111   : > { %2270 = vmatmul.mubr.bf16.gmra.mrb[56].mxu1 %v3344_v19  ;;  %2180 = vmatprep.mubr.bf16.mxu0 %v3346_v20 }
 0x112   : > { %2277 = vmatprep.mubr.bf16.mxu1 %v3348_v21 }
 0x118   : > { %2181 = vmatmul.mubr.bf16.gmra.mrb[60].mxu0 %v3350_v22 }
 0x119   : > { %2278 = vmatmul.mubr.bf16.gmra.mrb[60].mxu1 %v3351_v23  ;;  %3111 = vmatprep.mubr.bf16.mxu0 %v3353_v24 }
 0x11a   : > { %3119 = vmatprep.mubr.bf16.mxu1 %v3354_v25 }
 0x120   : > { %3112 = vmatmul.mubr.bf16.vlgmr.msra.gmra.mrb[64].mxu0 %v3355_v26 }
 0x121   : > { %3120 = vmatmul.mubr.bf16.vlgmr.msra.gmra.mrb[64].mxu1 %v3356_v27  ;;  %3115 = vmatprep.mubr.bf16.mxu0 %v3357_v28 }
 0x122   : > { %3123 = vmatprep.mubr.bf16.mxu1 %v3358_v29 }
 0x128   : > { %3116 = vmatmul.mubr.bf16.gmra.mrb[68].mxu0 %v3359_v30 }
 0x129   : > { %3124 = vmatmul.mubr.bf16.gmra.mrb[68].mxu1 %v3360_v31 }
 0x173   : > { %v2839_v32 = vpop.f32.mrb[0].mxu0 }
 0x174   : > { %v2903_v33 = vpop.f32.mrb[0].mxu1  ;;  %v2840_v34 = vpop.f32.mrb[1].mxu0 }
 0x175   : > { %v2841_v35 = vadd.f32 %v2840_v34, %v2839_v32  ;;  %v2904_v36 = vpop.f32.mrb[1].mxu1  ;;  %v2842_v37 = vpop.f32.mrb[2].mxu0 }
 0x176   : > { %v2905_v38 = vadd.f32 %v2904_v36, %v2903_v33  ;;  %v2906_v39 = vpop.f32.mrb[2].mxu1  ;;  %v2843_v40 = vpop.f32.mrb[3].mxu0 }
 0x177   : > { %v2844_v41 = vadd.f32 %v2843_v40, %v2842_v37  ;;  %v2907_v42 = vpop.f32.mrb[3].mxu1 }
 0x178   : > { %v4061_v43 = vadd.f32 %v2905_v38, %v2841_v35  ;;  %v2908_v44 = vadd.f32 %v2907_v42, %v2906_v39 }
 0x17a   : > { %v4063_v45 = vadd.f32 %v2908_v44, %v2844_v41 }
 0x17b   : > { %v2845_v46 = vpop.f32.mrb[4].mxu0 }
 0x17c   : > { %v2909_v47 = vpop.f32.mrb[4].mxu1  ;;  %v2846_v48 = vpop.f32.mrb[5].mxu0 }
 0x17d   : > { %v2847_v49 = vadd.f32 %v2846_v48, %v2845_v46  ;;  %v2910_v50 = vpop.f32.mrb[5].mxu1  ;;  %v2848_v51 = vpop.f32.mrb[6].mxu0 }
 0x17e   : > { %v2911_v52 = vadd.f32 %v2910_v50, %v2909_v47  ;;  %v2912_v53 = vpop.f32.mrb[6].mxu1  ;;  %v2849_v54 = vpop.f32.mrb[7].mxu0 }
 0x17f   : > { %v2850_v55 = vadd.f32 %v2849_v54, %v2848_v51  ;;  %v2913_v56 = vpop.f32.mrb[7].mxu1 }
 0x180   : > { %v4065_v57 = vadd.f32 %v2911_v52, %v2847_v49  ;;  %v2914_v58 = vadd.f32 %v2913_v56, %v2912_v53 }
 0x182   : > { %v4067_v59 = vadd.f32 %v2914_v58, %v2850_v55 }
 0x183   : > { %v2851_v60 = vpop.f32.mrb[8].mxu0 }
 0x184   : > { %v2915_v61 = vpop.f32.mrb[8].mxu1  ;;  %v2852_v62 = vpop.f32.mrb[9].mxu0 }
 0x185   : > { %v2853_v63 = vadd.f32 %v2852_v62, %v2851_v60  ;;  %v2916_v0 = vpop.f32.mrb[9].mxu1  ;;  %v2854_v1 = vpop.f32.mrb[10].mxu0 }
 0x186   : > { %v2917_v2 = vadd.f32 %v2916_v0, %v2915_v61  ;;  %v2918_v3 = vpop.f32.mrb[10].mxu1  ;;  %v2855_v4 = vpop.f32.mrb[11].mxu0 }
 0x187   : > { %v2856_v5 = vadd.f32 %v2855_v4, %v2854_v1  ;;  %v2919_v6 = vpop.f32.mrb[11].mxu1 }
 0x188   : > { %v4069_v7 = vadd.f32 %v2917_v2, %v2853_v63  ;;  %v2920_v8 = vadd.f32 %v2919_v6, %v2918_v3 }
 0x18a   : > { %v4071_v9 = vadd.f32 %v2920_v8, %v2856_v5 }
 0x18b   : > { %v2857_v10 = vpop.f32.mrb[12].mxu0 }
 0x18c   : > { %v2921_v11 = vpop.f32.mrb[12].mxu1  ;;  %v2858_v12 = vpop.f32.mrb[13].mxu0 }
 0x18d   : > { %v2859_v13 = vadd.f32 %v2858_v12, %v2857_v10  ;;  %v2922_v14 = vpop.f32.mrb[13].mxu1  ;;  %v2860_v15 = vpop.f32.mrb[14].mxu0 }
 0x18e   : > { %v2923_v16 = vadd.f32 %v2922_v14, %v2921_v11  ;;  %v2924_v17 = vpop.f32.mrb[14].mxu1  ;;  %v2861_v18 = vpop.f32.mrb[15].mxu0 }
 0x18f   : > { %v2862_v19 = vadd.f32 %v2861_v18, %v2860_v15  ;;  %v2925_v20 = vpop.f32.mrb[15].mxu1 }
 0x190   : > { %v4073_v21 = vadd.f32 %v2923_v16, %v2859_v13  ;;  %v2926_v22 = vadd.f32 %v2925_v20, %v2924_v17 }
 0x192   : > { %v4075_v23 = vadd.f32 %v2926_v22, %v2862_v19 }
 0x193   : > { %v2863_v24 = vpop.f32.mrb[16].mxu0 }
 0x194   : > { %v2927_v25 = vpop.f32.mrb[16].mxu1  ;;  %v2864_v26 = vpop.f32.mrb[17].mxu0 }
 0x195   : > { %v2865_v27 = vadd.f32 %v2864_v26, %v2863_v24  ;;  %v2928_v28 = vpop.f32.mrb[17].mxu1  ;;  %v2866_v29 = vpop.f32.mrb[18].mxu0 }
 0x196   : > { %v2929_v30 = vadd.f32 %v2928_v28, %v2927_v25  ;;  %v2930_v31 = vpop.f32.mrb[18].mxu1  ;;  %v2867_v32 = vpop.f32.mrb[19].mxu0 }
 0x197   : > { %v2868_v33 = vadd.f32 %v2867_v32, %v2866_v29  ;;  %v2931_v34 = vpop.f32.mrb[19].mxu1 }
 0x198   : > { %v4077_v35 = vadd.f32 %v2929_v30, %v2865_v27  ;;  %v2932_v36 = vadd.f32 %v2931_v34, %v2930_v31 }
 0x19a   : > { %v4079_v37 = vadd.f32 %v2932_v36, %v2868_v33 }
 0x19b   : > { %v2869_v38 = vpop.f32.mrb[20].mxu0 }
 0x19c   : > { %v2933_v39 = vpop.f32.mrb[20].mxu1  ;;  %v2870_v40 = vpop.f32.mrb[21].mxu0 }
 0x19d   : > { %v2871_v41 = vadd.f32 %v2870_v40, %v2869_v38  ;;  %v2934_v42 = vpop.f32.mrb[21].mxu1  ;;  %v2872_v44 = vpop.f32.mrb[22].mxu0 }
 0x19e   : > { %v2935_v46 = vadd.f32 %v2934_v42, %v2933_v39  ;;  %v2936_v47 = vpop.f32.mrb[22].mxu1  ;;  %v2873_v48 = vpop.f32.mrb[23].mxu0 }
 0x19f   : > { %v2874_v49 = vadd.f32 %v2873_v48, %v2872_v44  ;;  %v2937_v50 = vpop.f32.mrb[23].mxu1 }
 0x1a0   : > { %v4081_v51 = vadd.f32 %v2935_v46, %v2871_v41  ;;  %v2938_v52 = vadd.f32 %v2937_v50, %v2936_v47 }
 0x1a2   : > { %v4083_v53 = vadd.f32 %v2938_v52, %v2874_v49 }
 0x1a3   : > { %v2875_v54 = vpop.f32.mrb[24].mxu0 }
 0x1a4   : > { %v2939_v55 = vpop.f32.mrb[24].mxu1  ;;  %v2876_v56 = vpop.f32.mrb[25].mxu0 }
 0x1a5   : > { %v2877_v58 = vadd.f32 %v2876_v56, %v2875_v54  ;;  %v2940_v60 = vpop.f32.mrb[25].mxu1  ;;  %v2878_v61 = vpop.f32.mrb[26].mxu0 }
 0x1a6   : > { %v2941_v62 = vadd.f32 %v2940_v60, %v2939_v55  ;;  %v2942_v63 = vpop.f32.mrb[26].mxu1  ;;  %v2879_v0 = vpop.f32.mrb[27].mxu0 }
 0x1a7   : > { %v2880_v1 = vadd.f32 %v2879_v0, %v2878_v61  ;;  %v2943_v2 = vpop.f32.mrb[27].mxu1 }
 0x1a8   : > { %v4085_v3 = vadd.f32 %v2941_v62, %v2877_v58  ;;  %v2944_v4 = vadd.f32 %v2943_v2, %v2942_v63 }
 0x1aa   : > { %v4087_v5 = vadd.f32 %v2944_v4, %v2880_v1 }
 0x1ab   : > { %v2881_v6 = vpop.f32.mrb[28].mxu0 }
 0x1ac   : > { %v2945_v8 = vpop.f32.mrb[28].mxu1  ;;  %v2882_v10 = vpop.f32.mrb[29].mxu0 }
 0x1ad   : > { %v2883_v11 = vadd.f32 %v2882_v10, %v2881_v6  ;;  %v2946_v12 = vpop.f32.mrb[29].mxu1  ;;  %v2884_v13 = vpop.f32.mrb[30].mxu0 }
 0x1ae   : > { %v2947_v14 = vadd.f32 %v2946_v12, %v2945_v8  ;;  %v2948_v15 = vpop.f32.mrb[30].mxu1  ;;  %v2885_v16 = vpop.f32.mrb[31].mxu0 }
 0x1af   : > { %v2886_v17 = vadd.f32 %v2885_v16, %v2884_v13  ;;  %v2949_v18 = vpop.f32.mrb[31].mxu1 }
 0x1b0   : > { %v4089_v19 = vadd.f32 %v2947_v14, %v2883_v11  ;;  %v2950_v20 = vadd.f32 %v2949_v18, %v2948_v15 }
 0x1b2   : > { %v4091_v22 = vadd.f32 %v2950_v20, %v2886_v17 }
 0x1b3   : > { %v2967_v24 = vpop.f32.mrb[32].mxu0 }
 0x1b4   : > { %v3031_v25 = vpop.f32.mrb[32].mxu1  ;;  %v2968_v26 = vpop.f32.mrb[33].mxu0 }
 0x1b5   : > { %v2969_v27 = vadd.f32 %v2968_v26, %v2967_v24  ;;  %v3032_v28 = vpop.f32.mrb[33].mxu1  ;;  %v2970_v29 = vpop.f32.mrb[34].mxu0 }
 0x1b6   : > { %v3033_v30 = vadd.f32 %v3032_v28, %v3031_v25  ;;  %v3034_v31 = vpop.f32.mrb[34].mxu1  ;;  %v2971_v32 = vpop.f32.mrb[35].mxu0 }
 0x1b7   : > { %v2127_v33 = vadd.f32 %v2969_v27, %v4061_v43  ;;  %v2972_v34 = vadd.f32 %v2971_v32, %v2970_v29  ;;  %v3035_v36 = vpop.f32.mrb[35].mxu1 }
 0x1b8   : > { %v3036_v38 = vadd.f32 %v3035_v36, %v3034_v31 }
 0x1b9   : > { %v2130_v39 = vadd.f32 %v2972_v34, %v4063_v45  ;;  %v4095_v40 = vadd.f32 %v3033_v30, %v2127_v33 }
 0x1bb   : > { %v2973_v41 = vpop.f32.mrb[36].mxu0  ;;  %v4097_v42 = vadd.f32 %v3036_v38, %v2130_v39 }
 0x1bc   : > { %v3037_v44 = vpop.f32.mrb[36].mxu1  ;;  %v2974_v46 = vpop.f32.mrb[37].mxu0 }
 0x1bd   : > { %v2975_v47 = vadd.f32 %v2974_v46, %v2973_v41  ;;  %v3038_v48 = vpop.f32.mrb[37].mxu1  ;;  %v2976_v49 = vpop.f32.mrb[38].mxu0 }
 0x1be   : > { %v3039_v50 = vadd.f32 %v3038_v48, %v3037_v44  ;;  %v3040_v52 = vpop.f32.mrb[38].mxu1  ;;  %v2977_v54 = vpop.f32.mrb[39].mxu0 }
 0x1bf   : > { %v2135_v43 = vadd.f32 %v2975_v47, %v4065_v57  ;;  %v2978_v55 = vadd.f32 %v2977_v54, %v2976_v49  ;;  %v3041_v56 = vpop.f32.mrb[39].mxu1 }
 0x1c0   : > { %v3042_v58 = vadd.f32 %v3041_v56, %v3040_v52 }
 0x1c1   : > { %v2138_v45 = vadd.f32 %v2978_v55, %v4067_v59  ;;  %v4101_v60 = vadd.f32 %v3039_v50, %v2135_v43 }
 0x1c3   : > { %v2979_v61 = vpop.f32.mrb[40].mxu0  ;;  %v4103_v62 = vadd.f32 %v3042_v58, %v2138_v45 }
 0x1c4   : > { %v3043_v63 = vpop.f32.mrb[40].mxu1  ;;  %v2980_v0 = vpop.f32.mrb[41].mxu0 }
 0x1c5   : > { %v2981_v1 = vadd.f32 %v2980_v0, %v2979_v61  ;;  %v3044_v2 = vpop.f32.mrb[41].mxu1  ;;  %v2982_v4 = vpop.f32.mrb[42].mxu0 }
 0x1c6   : > { %v3045_v6 = vadd.f32 %v3044_v2, %v3043_v63  ;;  %v3046_v8 = vpop.f32.mrb[42].mxu1  ;;  %v2983_v10 = vpop.f32.mrb[43].mxu0 }
 0x1c7   : > { %v2143_v57 = vadd.f32 %v2981_v1, %v4069_v7  ;;  %v2984_v11 = vadd.f32 %v2983_v10, %v2982_v4  ;;  %v3047_v12 = vpop.f32.mrb[43].mxu1 }
 0x1c8   : > { %v3048_v13 = vadd.f32 %v3047_v12, %v3046_v8 }
 0x1c9   : > { %v2146_v59 = vadd.f32 %v2984_v11, %v4071_v9  ;;  %v4107_v14 = vadd.f32 %v3045_v6, %v2143_v57 }
 0x1cb   : > { %v2985_v15 = vpop.f32.mrb[44].mxu0  ;;  %v4109_v16 = vadd.f32 %v3048_v13, %v2146_v59 }
 0x1cc   : > { %v3049_v17 = vpop.f32.mrb[44].mxu1  ;;  %v2986_v18 = vpop.f32.mrb[45].mxu0 }
 0x1cd   : > { %v2987_v20 = vadd.f32 %v2986_v18, %v2985_v15  ;;  %v3050_v24 = vpop.f32.mrb[45].mxu1  ;;  %v2988_v25 = vpop.f32.mrb[46].mxu0 }
 0x1ce   : > { %v3051_v26 = vadd.f32 %v3050_v24, %v3049_v17  ;;  %v3052_v27 = vpop.f32.mrb[46].mxu1  ;;  %v2989_v28 = vpop.f32.mrb[47].mxu0 }
 0x1cf   : > { %v2151_v7 = vadd.f32 %v2987_v20, %v4073_v21  ;;  %v2990_v29 = vadd.f32 %v2989_v28, %v2988_v25  ;;  %v3053_v30 = vpop.f32.mrb[47].mxu1 }
 0x1d0   : > { %v3054_v31 = vadd.f32 %v3053_v30, %v3052_v27 }
 0x1d1   : > { %v2154_v9 = vadd.f32 %v2990_v29, %v4075_v23  ;;  %v4113_v32 = vadd.f32 %v3051_v26, %v2151_v7 }
 0x1d3   : > { %v2991_v33 = vpop.f32.mrb[48].mxu0  ;;  %v4115_v34 = vadd.f32 %v3054_v31, %v2154_v9 }
 0x1d4   : > { %v3055_v36 = vpop.f32.mrb[48].mxu1  ;;  %v2992_v38 = vpop.f32.mrb[49].mxu0 }
 0x1d5   : > { %v2993_v39 = vadd.f32 %v2992_v38, %v2991_v33  ;;  %v3056_v41 = vpop.f32.mrb[49].mxu1  ;;  %v2994_v44 = vpop.f32.mrb[50].mxu0 }
 0x1d6   : > { %v3057_v46 = vadd.f32 %v3056_v41, %v3055_v36  ;;  %v3058_v47 = vpop.f32.mrb[50].mxu1  ;;  %v2995_v48 = vpop.f32.mrb[51].mxu0 }
 0x1d7   : > { %v2159_v21 = vadd.f32 %v2993_v39, %v4077_v35  ;;  %v2996_v49 = vadd.f32 %v2995_v48, %v2994_v44  ;;  %v3059_v50 = vpop.f32.mrb[51].mxu1 }
 0x1d8   : > { %v3060_v52 = vadd.f32 %v3059_v50, %v3058_v47 }
 0x1d9   : > { %v2162_v23 = vadd.f32 %v2996_v49, %v4079_v37  ;;  %v4119_v54 = vadd.f32 %v3057_v46, %v2159_v21 }
 0x1db   : > { %v2997_v43 = vpop.f32.mrb[52].mxu0  ;;  %v4121_v55 = vadd.f32 %v3060_v52, %v2162_v23  ;;  %v4144_v23 = vld [vmem:[%s868_s9] ss:$0 sm:$0xff] }
 0x1dc   : > { %v3061_v56 = vpop.f32.mrb[52].mxu1  ;;  %v2998_v58 = vpop.f32.mrb[53].mxu0 }
 0x1dd   : > { %v2999_v45 = vadd.f32 %v2998_v58, %v2997_v43  ;;  %v3062_v61 = vpop.f32.mrb[53].mxu1  ;;  %v3000_v63 = vpop.f32.mrb[54].mxu0 }
 0x1de   : > { %v3063_v0 = vadd.f32 %v3062_v61, %v3061_v56  ;;  %v3064_v1 = vpop.f32.mrb[54].mxu1  ;;  %v3001_v2 = vpop.f32.mrb[55].mxu0 }
 0x1df   : > { %v2167_v35 = vadd.f32 %v2999_v45, %v4081_v51  ;;  %v3002_v4 = vadd.f32 %v3001_v2, %v3000_v63  ;;  %v3065_v6 = vpop.f32.mrb[55].mxu1  ;;  %v4151_v2 = vld [vmem:[%s871_s12] ss:$0 sm:$0xff] }
 0x1e0   : > { %v3066_v8 = vadd.f32 %v3065_v6, %v3064_v1 }
 0x1e1   : > { %v2170_v37 = vadd.f32 %v3002_v4, %v4083_v53  ;;  %v2264_v10 = vadd.f32 %v3063_v0, %v2167_v35 }
 0x1e3   : > { %v3003_v57 = vpop.f32.mrb[56].mxu0  ;;  %v2267_v11 = vadd.f32 %v3066_v8, %v2170_v37 }
 0x1e4   : > { %v3067_v12 = vpop.f32.mrb[56].mxu1  ;;  %v3004_v13 = vpop.f32.mrb[57].mxu0 }
 0x1e5   : > { %v3005_v59 = vadd.f32 %v3004_v13, %v3003_v57  ;;  %v3068_v15 = vpop.f32.mrb[57].mxu1  ;;  %v3006_v17 = vpop.f32.mrb[58].mxu0 }
 0x1e6   : > { %v3069_v18 = vadd.f32 %v3068_v15, %v3067_v12  ;;  %v3070_v20 = vpop.f32.mrb[58].mxu1  ;;  %v3007_v24 = vpop.f32.mrb[59].mxu0 }
 0x1e7   : > { %v2175_v25 = vadd.f32 %v3005_v59, %v4085_v3  ;;  %v3008_v51 = vadd.f32 %v3007_v24, %v3006_v17  ;;  %v3071_v26 = vpop.f32.mrb[59].mxu1 }
 0x1e8   : > { %v3072_v27 = vadd.f32 %v3071_v26, %v3070_v20 }
 0x1e9   : > { %v2178_v53 = vadd.f32 %v3008_v51, %v4087_v5  ;;  %v4127_v28 = vadd.f32 %v3069_v18, %v2175_v25 }
 0x1eb   : > { %v3009_v7 = vpop.f32.mrb[60].mxu0  ;;  %v4130_v29 = vadd.f32 %v3072_v27, %v2178_v53 }
 0x1ec   : > { %v3073_v30 = vpop.f32.mrb[60].mxu1  ;;  %v3010_v31 = vpop.f32.mrb[61].mxu0 }
 0x1ed   : > { %v3011_v9 = vadd.f32 %v3010_v31, %v3009_v7  ;;  %v3074_v33 = vpop.f32.mrb[61].mxu1  ;;  %v3012_v36 = vpop.f32.mrb[62].mxu0 }
 0x1ee   : > { %v3075_v38 = vadd.f32 %v3074_v33, %v3073_v30  ;;  %v3076_v39 = vpop.f32.mrb[62].mxu1  ;;  %v3013_v3 = vpop.f32.mrb[63].mxu0 }
 0x1ef   : > { %v2183_v41 = vadd.f32 %v3011_v9, %v4089_v19  ;;  %v3014_v44 = vadd.f32 %v3013_v3, %v3012_v36  ;;  %v3077_v46 = vpop.f32.mrb[63].mxu1 }
 0x1f0   : > { %v3078_v5 = vadd.f32 %v3077_v46, %v3076_v39 }
 0x1f1   : > { %v2186_v47 = vadd.f32 %v3014_v44, %v4091_v22  ;;  %v2280_v48 = vadd.f32 %v3075_v38, %v2183_v41 }
 0x1f3   : > { %v3113_v21 = vpop.f32.mrb[64].mxu0  ;;  %v4138_v49 = vadd.f32 %v3078_v5, %v2186_v47 }
 0x1f4   : > { %v2329_v19 = vadd.f32 %v3113_v21, %v4101_v60  ;;  %v3121_v50 = vpop.f32.mrb[64].mxu1  ;;  %v2320_v52 = vpop.f32.mrb[65].mxu0 }
 0x1f5   : > { %v2361_v43 = vadd.f32 %v3121_v50, %v2264_v10  ;;  %v2321_v22 = vadd.f32 %v2320_v52, %v4095_v40  ;;  %v2352_v56 = vpop.f32.mrb[65].mxu1  ;;  %v3114_v58 = vpop.f32.mrb[66].mxu0 }
 0x1f6   : > { %v2385_v45 = vmax.f32 %v2329_v19, 0.0  ;;  %v2353_v61 = vadd.f32 %v2352_v56, %v4119_v54  ;;  %v2332_v63 = vadd.f32 %v3114_v58, %v4103_v62  ;;  %v3122_v0 = vpop.f32.mrb[66].mxu1  ;;  %v2323_v1 = vpop.f32.mrb[67].mxu0 }
 0x1f7   : > { %v2393_v60 = vmax.f32 %v2361_v43, 0.0  ;;  %v2383_v35 = vmax.f32 %v2321_v22, 0.0  ;;  %v2364_v4 = vadd.f32 %v3122_v0, %v2267_v11  ;;  %v2324_v6 = vadd.f32 %v2323_v1, %v4097_v42  ;;  %v2355_v8 = vpop.f32.mrb[67].mxu1 }
 0x1f8   : > { %v2408_v40 = vmul.f32 %v4144_v23, %v2385_v45  ;;  %v2391_v37 = vmax.f32 %v2353_v61, 0.0  ;;  %v2386_v10 = vmax.f32 %v2332_v63, 0.0  ;;  %v2356_v57 = vadd.f32 %v2355_v8, %v4121_v55 }
 0x1f9   : > { %v2416_v54 = vmul.f32 %v4144_v23, %v2393_v60  ;;  %v2406_v62 = vmul.f32 %v4144_v23, %v2383_v35  ;;  %v2394_v12 = vmax.f32 %v2364_v4, 0.0  ;;  %v2384_v13 = vmax.f32 %v2324_v6, 0.0 }
 0x1fa   : > { %v2431_v59 = vadd.f32 %v4151_v2, %v2408_v40  ;;  %v2414_v15 = vmul.f32 %v4144_v23, %v2391_v37  ;;  %v2409_v11 = vmul.f32 %v4144_v23, %v2386_v10  ;;  %v2392_v42 = vmax.f32 %v2356_v57, 0.0 }
 0x1fb   : > { %v2439_v17 = vadd.f32 %v4151_v2, %v2416_v54  ;;  %v2429_v18 = vadd.f32 %v4151_v2, %v2406_v62  ;;  %v2417_v20 = vmul.f32 %v4144_v23, %v2394_v12  ;;  %v2407_v55 = vmul.f32 %v4144_v23, %v2384_v13  ;;  %v3117_v24 = vpop.f32.mrb[68].mxu0 }
 0x1fc   : > { %2447 = vst [vmem:[%s4165_s15 + $0x10] sm:$0xff] %v2431_v59  ;;  %v2437_v25 = vadd.f32 %v4151_v2, %v2414_v15  ;;  %v2432_v51 = vadd.f32 %v4151_v2, %v2409_v11  ;;  %v2415_v26 = vmul.f32 %v4144_v23, %v2392_v42  ;;  %v2345_v27 = vadd.f32 %v3117_v24, %v4113_v32  ;;  %v3125_v53 = vpop.f32.mrb[68].mxu1  ;;  %v2336_v7 = vpop.f32.mrb[69].mxu0 }
 0x1fd   : > { %2455 = vst [vmem:[%s4165_s15 + $0x50] sm:$0xff] %v2439_v17  ;;  %2445 = vst [vmem:[%s4165_s15] sm:$0xff] %v2429_v18  ;;  %v2440_v30 = vadd.f32 %v4151_v2, %v2417_v20  ;;  %v2430_v31 = vadd.f32 %v4151_v2, %v2407_v55  ;;  %v2377_v9 = vadd.f32 %v3125_v53, %v2280_v48  ;;  %v2368_v36 = vpop.f32.mrb[69].mxu1  ;;  %v3118_v38 = vpop.f32.mrb[70].mxu0 }
 0x1fe   : > { %v2337_v33 = vadd.f32 %v2336_v7, %v4107_v14  ;;  %2453 = vst [vmem:[%s4165_s15 + $0x40] sm:$0xff] %v2437_v25  ;;  %2448 = vst [vmem:[%s4165_s15 + $0x18] sm:$0xff] %v2432_v51  ;;  %v2438_v32 = vadd.f32 %v4151_v2, %v2415_v26  ;;  %v2389_v39 = vmax.f32 %v2345_v27, 0.0  ;;  %v2369_v3 = vadd.f32 %v2368_v36, %v4127_v28  ;;  %v3126_v44 = vpop.f32.mrb[70].mxu1  ;;  %v2339_v46 = vpop.f32.mrb[71].mxu0 }
 0x1ff   : > { %v2348_v41 = vadd.f32 %v3118_v38, %v4115_v34  ;;  %2456 = vst [vmem:[%s4165_s15 + $0x58] sm:$0xff] %v2440_v30  ;;  %2446 = vst [vmem:[%s4165_s15 + $0x8] sm:$0xff] %v2430_v31  ;;  %v2397_v5 = vmax.f32 %v2377_v9, 0.0  ;;  %v2380_v14 = vadd.f32 %v3126_v44, %v4138_v49  ;;  %v2340_v48 = vadd.f32 %v2339_v46, %v4109_v16  ;;  %v2371_v21 = vpop.f32.mrb[71].mxu1 }
 0x200   : > { %v2387_v47 = vmax.f32 %v2337_v33, 0.0  ;;  %2454 = vst [vmem:[%s4165_s15 + $0x48] sm:$0xff] %v2438_v32  ;;  %v2412_v19 = vmul.f32 %v4144_v23, %v2389_v39  ;;  %v2395_v50 = vmax.f32 %v2369_v3, 0.0  ;;  %v2372_v28 = vadd.f32 %v2371_v21, %v4130_v29 }
 0x201   : > { %v2390_v52 = vmax.f32 %v2348_v41, 0.0  ;;  %v2420_v34 = vmul.f32 %v4144_v23, %v2397_v5  ;;  %v2398_v22 = vmax.f32 %v2380_v14, 0.0  ;;  %v2388_v56 = vmax.f32 %v2340_v48, 0.0 }
 0x202   : > { %v2410_v43 = vmul.f32 %v4144_v23, %v2387_v47  ;;  %v2435_v49 = vadd.f32 %v4151_v2, %v2412_v19  ;;  %v2418_v16 = vmul.f32 %v4144_v23, %v2395_v50  ;;  %v2396_v45 = vmax.f32 %v2372_v28, 0.0  ;;  %2467 = sbr.rel (!%p3461_p6) target bundleno = 530 (0x212), region = 81 }
 0x203   : > { %v2413_v58 = vmul.f32 %v4144_v23, %v2390_v52  ;;  %v2443_v29 = vadd.f32 %v4151_v2, %v2420_v34  ;;  %v2421_v63 = vmul.f32 %v4144_v23, %v2398_v22  ;;  %v2411_v0 = vmul.f32 %v4144_v23, %v2388_v56 }
 0x204   : > { %v2433_v61 = vadd.f32 %v4151_v2, %v2410_v43  ;;  %2451 = vst [vmem:[%s4165_s15 + $0x30] sm:$0xff] %v2435_v49  ;;  %v2441_v1 = vadd.f32 %v4151_v2, %v2418_v16  ;;  %v2419_v35 = vmul.f32 %v4144_v23, %v2396_v45  ;;  %v2530_v23 = vld [vmem:[%s4165_s15] sm:$0xff] (%p3461_p6)  ;;  %v2550_v59 = vld [vmem:[%s4165_s15 + $0x50] sm:$0xff] (%p3461_p6) }
 0x205   : > { %v2436_v60 = vadd.f32 %v4151_v2, %v2413_v58  ;;  %2459 = vst [vmem:[%s4165_s15 + $0x70] sm:$0xff] %v2443_v29  ;;  %v2444_v4 = vadd.f32 %v4151_v2, %v2421_v63  ;;  %v2434_v6 = vadd.f32 %v4151_v2, %v2411_v0  ;;  %v2536_v37 = vld [vmem:[%s4165_s15 + $0x18] sm:$0xff] (%p3461_p6)  ;;  %2531 = vst [vmem:[%s2472_s23] sm:$0xff] (%p3461_p6), %v2530_v23  ;;  %v2546_v12 = vld [vmem:[%s4165_s15 + $0x40] sm:$0xff] (%p3461_p6) }
 0x206   : > { %2449 = vst [vmem:[%s4165_s15 + $0x20] sm:$0xff] %v2433_v61  ;;  %2457 = vst [vmem:[%s4165_s15 + $0x60] sm:$0xff] %v2441_v1  ;;  %v2442_v8 = vadd.f32 %v4151_v2, %v2419_v35  ;;  %v2532_v40 = vld [vmem:[%s4165_s15 + $0x8] sm:$0xff] (%p3461_p6)  ;;  %v2534_v2 = vld [vmem:[%s4165_s15 + $0x10] sm:$0xff] (%p3461_p6) }
 0x207   : > { %2452 = vst [vmem:[%s4165_s15 + $0x38] sm:$0xff] %v2436_v60  ;;  %2460 = vst [vmem:[%s4165_s15 + $0x78] sm:$0xff] %v2444_v4  ;;  %v2548_v13 = vld [vmem:[%s4165_s15 + $0x48] sm:$0xff] (%p3461_p6)  ;;  %v2552_v15 = vld [vmem:[%s4165_s15 + $0x58] sm:$0xff] (%p3461_p6) }
 0x208   : > { %2450 = vst [vmem:[%s4165_s15 + $0x28] sm:$0xff] %v2434_v6  ;;  %2458 = vst [vmem:[%s4165_s15 + $0x68] sm:$0xff] %v2442_v8 }
 0x209   : > { %2533 = vst [vmem:[%s2472_s23 + $0x10] sm:$0xff] %v2532_v40  ;;  %2535 = vst [vmem:[%s2472_s23 + $0x20] sm:$0xff] %v2534_v2 }
 0x20a   : > { %2537 = vst [vmem:[%s2472_s23 + $0x30] sm:$0xff] %v2536_v37  ;;  %2547 = vst [vmem:[%s2472_s23 + $0x80] sm:$0xff] %v2546_v12 }
 0x20b   : > { %v2542_v54 = vld [vmem:[%s4165_s15 + $0x30] sm:$0xff]  ;;  %2549 = vst [vmem:[%s2472_s23 + $0x90] sm:$0xff] %v2548_v13  ;;  %2551 = vst [vmem:[%s2472_s23 + $0xa0] sm:$0xff] %v2550_v59 }
 0x20c   : > { %2543 = vst [vmem:[%s2472_s23 + $0x60] sm:$0xff] %v2542_v54  ;;  %2553 = vst [vmem:[%s2472_s23 + $0xb0] sm:$0xff] %v2552_v15  ;;  %v2558_v17 = vld [vmem:[%s4165_s15 + $0x70] sm:$0xff] }
 0x20d   : > { %v2538_v10 = vld [vmem:[%s4165_s15 + $0x20] sm:$0xff]  ;;  %2559 = vst [vmem:[%s2472_s23 + $0xe0] sm:$0xff] %v2558_v17 }
 0x20e   : > { %2539 = vst [vmem:[%s2472_s23 + $0x40] sm:$0xff] %v2538_v10  ;;  %v2544_v62 = vld [vmem:[%s4165_s15 + $0x38] sm:$0xff]  ;;  %v2554_v11 = vld [vmem:[%s4165_s15 + $0x60] sm:$0xff] }
 0x20f   : > { %v2540_v57 = vld [vmem:[%s4165_s15 + $0x28] sm:$0xff]  ;;  %2545 = vst [vmem:[%s2472_s23 + $0x70] sm:$0xff] %v2544_v62  ;;  %2555 = vst [vmem:[%s2472_s23 + $0xc0] sm:$0xff] %v2554_v11  ;;  %v2560_v18 = vld [vmem:[%s4165_s15 + $0x78] sm:$0xff] }
 0x210   : > { %2541 = vst [vmem:[%s2472_s23 + $0x50] sm:$0xff] %v2540_v57  ;;  %v2556_v42 = vld [vmem:[%s4165_s15 + $0x68] sm:$0xff]  ;;  %2561 = vst [vmem:[%s2472_s23 + $0xf0] sm:$0xff] %v2560_v18 }
 0x211   : > { %2557 = vst [vmem:[%s2472_s23 + $0xd0] sm:$0xff] %v2556_v42 }
 0x212 PF: > { %s14_s19 = sadd.s32 1, %s3399_s19   ;;  %s4255_s15 = smov %s3387_s16 }
 0x213   : > { %p11_p12 = scmp.ge.s32.totalorder %s14_s19, 4   ;;  %s4256_s16 = smov %s3466_s25 }
 0x214   : > { %s4257_s17 = smov %s3395_s18  ;;  %s4258_s18 = smov %s4260_s20 }
 0x215   :  { %13 = sbr.rel (!%p11_p12) target bundleno = 3 (0x3), region = 159 }

// kernel: position_gan_forward.7
= control target key start
LH: loop header
LB: loop body
LE: loop exit
PB: predicated region body
PF: predicated region fallthrough
CT: control target
= control target key end

     0   :  { %s2283_s9 = smov 0   ;;  %s2285_s10 = smov 0   ;;  %s2694_s0 = inlined_call_operand.vmem [shape: bf16[512,576], index: 0, kind: input, shape index: {}]   ;;  %s2695_s1 = inlined_call_operand.vmem [shape: bf16[576,16], index: 1, kind: input, shape index: {}]   ;;  %s2696_s2 = inlined_call_operand.vmem [shape: f32[512,16], index: 2, kind: output, shape index: {}]  }
   0x1   :  { %s2287_s11 = smov 0  }
   0x2 LB: > { %s24_s12 = sadd.s32 1, %s2262_s10  ;;  %p1632_p0 = scmp.ge.s32.totalorder %s2266_s11, 1  ;;  %s2266_s11 = sphi %s2287_s11, %s12_s11   ;;  %s2262_s10 = sphi %s2285_s10, %s2698_s10   ;;  %s2258_s9 = sphi %s2283_s9, %s2697_s9  }
   0x3   : > { %p26_p1 = scmp.ge.s32.totalorder %s24_s12, 2  ;;  %p137_p2 = scmp.lt.s32.totalorder %s2266_s11, 3 }
   0x5   : > { %s2700_s12 = smov (%p26_p1, %s24_s12), 0  ;;  %p138_p3 = pnand %p1632_p0, %p137_p2 }
   0x6   : > { %v2096_v0 = vld [vmem:[%s2695_s1 + $0x40] sm:$0xff] (!%p138_p3)   ;;  %s1633_s15 = sshll.u32 (!%p138_p3), %s2258_s9, 5  ;;  %v2098_v2 = vld [vmem:[%s2695_s1 + $0x48] sm:$0xff] (!%p138_p3)   ;;  %v2100_v4 = vld [vmem:[%s2695_s1 + $0x50] sm:$0xff] (!%p138_p3)   ;;  %vm972_vm0 = vcmask (!%p138_p3), 523264   ;;  %vm1504_vm1 = vcmask (!%p138_p3), 130048  }
   0x7   : > { %141 = sbr.rel (%p138_p3) target bundleno = 413 (0x19d), region = 28  ;;  %v2097_v1 = vld [vmem:[%s2695_s1] sm:$0xff] (!%p138_p3)   ;;  %1771 = vmatprep.subr.bf16.mxu0 (!%p138_p3), %v2096_v0  ;;  %2055 = vmatprep.subr.bf16.mxu1 (!%p138_p3), %v2096_v0  ;;  %p168_p4 = scmp.lt.s32.totalorder (!%p138_p3), %s1633_s15, 63  ;;  %v2099_v3 = vld [vmem:[%s2695_s1 + $0x8] sm:$0xff] (!%p138_p3)   ;;  %v2101_v5 = vld [vmem:[%s2695_s1 + $0x10] sm:$0xff] (!%p138_p3)  }
   0x8   : > { %1772 = vmatpush3.bf16.msra.mxu0 (!%p138_p3), %v2097_v1  ;;  %2063 = vmatpush3.bf16.msra.mxu1 (!%p138_p3), %v2097_v1  ;;  %v2102_v6 = vld [vmem:[%s2695_s1 + $0x58] sm:$0xff] (!%p138_p3)   ;;  %v2104_v8 = vld [vmem:[%s2695_s1 + $0x60] sm:$0xff] (!%p138_p3)   ;;  %v2106_v10 = vld [vmem:[%s2695_s1 + $0x68] sm:$0xff] (!%p138_p3)  }
   0x9   : > { %1773 = vmatprep.subr.bf16.mxu0 (!%p138_p3), %v2098_v2  ;;  %2056 = vmatprep.subr.bf16.mxu1 (!%p138_p3), %v2098_v2  ;;  %v2103_v7 = vld [vmem:[%s2695_s1 + $0x18] sm:$0xff] (!%p138_p3)   ;;  %v2105_v9 = vld [vmem:[%s2695_s1 + $0x20] sm:$0xff] (!%p138_p3)   ;;  %v2107_v13 = vld [vmem:[%s2695_s1 + $0x28] sm:$0xff] (!%p138_p3)  }
   0xa   : > { %v2108_v14 = vld [vmem:[%s2695_s1 + $0x70] sm:$0xff] (!%p138_p3)   ;;  %v2110_v16 = vld [vmem:[%s2695_s1 + $0x78] sm:$0xff] (!%p138_p3)   ;;  %v2118_v18 = vld [vmem:[%s2695_s1 + $0xc0] sm:$0xff] (!%p138_p3)  }
   0xb   : > { %v2109_v15 = vld [vmem:[%s2695_s1 + $0x30] sm:$0xff] (!%p138_p3)   ;;  %v2111_v17 = vld [vmem:[%s2695_s1 + $0x38] sm:$0xff] (!%p138_p3)   ;;  %v2121_v19 = vld [vmem:[%s2695_s1 + $0x100] sm:$0xff] (!%p138_p3)  }
   0xc   : > { %1774 = vmatpush3.bf16.msra.mxu0 (!%p138_p3), %v2099_v3  ;;  %2064 = vmatpush3.bf16.msra.mxu1 (!%p138_p3), %v2099_v3  ;;  %v2119_v22 = vld [vmem:[%s2695_s1 + $0x80] sm:$0xff] (!%p138_p3)   ;;  %v2120_v23 = vld [vmem:[%s2695_s1 + $0xc8] sm:$0xff] (!%p138_p3)   ;;  %v2129_v28 = vld [vmem:[%s2695_s1 + $0xd0] sm:$0xff] (!%p138_p3)  }
   0xd   : > { %1775 = vmatprep.subr.bf16.mxu0 (!%p138_p3), %v2100_v4  ;;  %2057 = vmatprep.subr.bf16.mxu1 (!%p138_p3), %v2100_v4  ;;  %v2122_v26 = vld [vmem:[%s2695_s1 + $0x88] sm:$0xff] (!%p138_p3)   ;;  %v2130_v30 = vld [vmem:[%s2695_s1 + $0x90] sm:$0xff] (!%p138_p3)   ;;  %v2131_v31 = vld [vmem:[%s2695_s1 + $0xd8] sm:$0xff] (!%p138_p3)  }
   0xe   : > { %s2702_s15 = smov (!%p168_p4, %s1633_s15), 63  ;;  %v2132_v34 = vld [vmem:[%s2695_s1 + $0x98] sm:$0xff]   ;;  %v2152_v35 = vld [vmem:[%s2695_s1 + $0x108] sm:$0xff]   ;;  %v2139_v37 = vld [vmem:[%s2695_s1 + $0xe0] sm:$0xff]  }
   0xf   : > { %s2071_s28 = smul.u32 20, %s2702_s15  ;;  %v2140_v39 = vld [vmem:[%s2695_s1 + $0xa0] sm:$0xff]   ;;  %v2141_v40 = vld [vmem:[%s2695_s1 + $0xe8] sm:$0xff]   ;;  %v2149_v46 = vld [vmem:[%s2695_s1 + $0xf0] sm:$0xff]  }
  0x10   : > { %1776 = vmatpush3.bf16.msra.mxu0 %v2101_v5  ;;  %2065 = vmatpush3.bf16.msra.mxu1 %v2101_v5  ;;  %v2142_v43 = vld [vmem:[%s2695_s1 + $0xa8] sm:$0xff]   ;;  %v2172_v47 = vld [vmem:[%s2695_s1 + $0x110] sm:$0xff]   ;;  %v2151_v49 = vld [vmem:[%s2695_s1 + $0xf8] sm:$0xff]  }
  0x11   : > { %1777 = vmatprep.subr.bf16.mxu0 %v2102_v6  ;;  %2058 = vmatprep.subr.bf16.mxu1 %v2102_v6  ;;  %s2334_s7 = scalar_lea.vmem %s2694_s0, %s2071_s28  ;;  %v2150_v48 = vld [vmem:[%s2695_s1 + $0xb0] sm:$0xff]   ;;  %v2153_v52 = vld [vmem:[%s2695_s1 + $0xb8] sm:$0xff]  }
  0x12   : > { %v2114_v11 = vld [vmem:[%s2334_s7 + $0x4] ss:$20 sps:$4 sm:$0xff]   ;;  %v2112_v20 = vld [vmem:[%s2334_s7] ss:$20 sps:$4 sm:$0xff]   ;;  %v2127_v27 = vld [vmem:[%s2334_s7 + $0x28] ss:$20 sps:$4 sm:$0xff]  }
  0x13   : > { %v2117_v12 = vld [vmem:[%s2334_s7 + $0x1e4] ss:$20 sps:$4 sm:$0xff]   ;;  %1053 = vmatprep.mubr.bf16.mxu0 %v2114_v11  ;;  %v2115_v21 = vld [vmem:[%s2334_s7 + $0x1e0] ss:$20 sps:$4 sm:$0xff]   ;;  %v2128_v29 = vld [vmem:[%s2334_s7 + $0x208] ss:$20 sps:$4 sm:$0xff]  }
  0x14   : > { %1778 = vmatpush3.bf16.msra.mxu0 %v2103_v7  ;;  %2066 = vmatpush3.bf16.msra.mxu1 %v2103_v7  ;;  %v2123_v24 = vld [vmem:[%s2334_s7 + $0x2c] ss:$20 sps:$4 sm:$0xff]   ;;  %v2133_v32 = vld [vmem:[%s2334_s7 + $0x54] ss:$20 sps:$4 sm:$0xff]   ;;  %v2137_v36 = vld [vmem:[%s2334_s7 + $0x50] ss:$20 sps:$4 sm:$0xff]  }
  0x15   : > { %1779 = vmatprep.subr.bf16.mxu0 %v2104_v8  ;;  %2059 = vmatprep.subr.bf16.mxu1 %v2104_v8  ;;  %v2125_v25 = vld [vmem:[%s2334_s7 + $0x20c] ss:$20 sps:$4 sm:$0xff]   ;;  %v2135_v33 = vld [vmem:[%s2334_s7 + $0x234] ss:$20 sps:$4 sm:$0xff]   ;;  %v2138_v38 = vld [vmem:[%s2334_s7 + $0x230] ss:$20 sps:$4 sm:$0xff]  }
  0x16   : > { %1149 = vmatprep.mubr.bf16.mxu1 %v2117_v12  ;;  %v2143_v41 = vld [vmem:[%s2334_s7 + $0x7c] ss:$20 sps:$4 sm:$0xff]   ;;  %v2147_v44 = vld [vmem:[%s2334_s7 + $0x78] ss:$20 sps:$4 sm:$0xff]   ;;  %v2159_v54 = vld [vmem:[%s2334_s7 + $0xa0] ss:$20 sps:$4 sm:$0xff]  }
  0x17   : > { %v2145_v42 = vld [vmem:[%s2334_s7 + $0x25c] ss:$20 sps:$4 sm:$0xff]   ;;  %v2148_v45 = vld [vmem:[%s2334_s7 + $0x258] ss:$20 sps:$4 sm:$0xff]   ;;  %v2162_v57 = vld [vmem:[%s2334_s7 + $0x34] ss:$20 sps:$4 sm:$0xff]  }
  0x18   : > { %1780 = vmatpush3.bf16.msra.mxu0 %v2105_v9  ;;  %2067 = vmatpush3.bf16.msra.mxu1 %v2105_v9  ;;  %v2154_v50 = vld [vmem:[%s2334_s7 + $0xa4] ss:$20 sps:$4 sm:$0xff]   ;;  %v2158_v51 = vld [vmem:[%s2334_s7 + $0xc] ss:$20 sps:$4 sm:$0xff]   ;;  %v2156_v53 = vld [vmem:[%s2334_s7 + $0x8] ss:$20 sps:$4 sm:$0xff]  }
  0x19   : > { %1781 = vmatprep.subr.bf16.mxu0 %v2106_v10  ;;  %2060 = vmatprep.subr.bf16.mxu1 %v2106_v10  ;;  %v2160_v55 = vld [vmem:[%s2334_s7 + $0xcc] ss:$20 sps:$4 sm:$0xff]   ;;  %v2191_v56 = vld [vmem:[%s2695_s1 + $0x118] sm:$0xff]   ;;  %v2165_v59 = vld [vmem:[%s2334_s7 + $0x30] ss:$20 sps:$4 sm:$0xff]  }
  0x1a   : > { %v2164_v58 = vld [vmem:[%s2334_s7 + $0xc8] ss:$20 sps:$4 sm:$0xff]   ;;  %v2170_v62 = vld [vmem:[%s2334_s7 + $0xf0] ss:$20 sps:$4 sm:$0xff]   ;;  %v2171_v63 = vld [vmem:[%s2334_s7 + $0x58] ss:$20 sps:$4 sm:$0xff]  }
  0x1b   : > { %v2166_v60 = vld [vmem:[%s2334_s7 + $0xf4] ss:$20 sps:$4 sm:$0xff]   ;;  %v2168_v61 = vld [vmem:[%s2334_s7 + $0x5c] ss:$20 sps:$4 sm:$0xff]   ;;  %v2175_v1 = vld [vmem:[%s2334_s7 + $0x84] ss:$20 sps:$4 sm:$0xff]  }
  0x1c   : > { %1782 = vmatpush3.bf16.msra.mxu0 %v2107_v13  ;;  %2068 = vmatpush3.bf16.msra.mxu1 %v2107_v13  ;;  %v2173_v0 = vld [vmem:[%s2334_s7 + $0x11c] ss:$20 sps:$4 sm:$0xff]   ;;  %v2177_v2 = vld [vmem:[%s2334_s7 + $0x118] ss:$20 sps:$4 sm:$0xff]   ;;  %v2178_v3 = vld [vmem:[%s2334_s7 + $0x80] ss:$20 sps:$4 sm:$0xff]  }
  0x1d   : > { %1783 = vmatprep.subr.bf16.mxu0 %v2108_v14  ;;  %2061 = vmatprep.subr.bf16.mxu1 %v2108_v14  ;;  %v2179_v4 = vld [vmem:[%s2334_s7 + $0x144] ss:$20 sps:$4 sm:$0xff]   ;;  %v2181_v5 = vld [vmem:[%s2334_s7 + $0xac] ss:$20 sps:$4 sm:$0xff]   ;;  %v2184_v7 = vld [vmem:[%s2334_s7 + $0xa8] ss:$20 sps:$4 sm:$0xff]  }
  0x1e   : > { %v2183_v6 = vld [vmem:[%s2334_s7 + $0x140] ss:$20 sps:$4 sm:$0xff]   ;;  %v2189_v10 = vld [vmem:[%s2334_s7 + $0x168] ss:$20 sps:$4 sm:$0xff]   ;;  %v2190_v11 = vld [vmem:[%s2334_s7 + $0xd0] ss:$20 sps:$4 sm:$0xff]  }
  0x1f   : > { %v2185_v8 = vld [vmem:[%s2334_s7 + $0x16c] ss:$20 sps:$4 sm:$0xff]   ;;  %v2187_v9 = vld [vmem:[%s2334_s7 + $0xd4] ss:$20 sps:$4 sm:$0xff]   ;;  %v2194_v13 = vld [vmem:[%s2334_s7 + $0xfc] ss:$20 sps:$4 sm:$0xff]  }
  0x20   : > { %1784 = vmatpush3.bf16.msra.mxu0 %v2109_v15  ;;  %2069 = vmatpush3.bf16.msra.mxu1 %v2109_v15  ;;  %v2192_v12 = vld [vmem:[%s2334_s7 + $0x194] ss:$20 sps:$4 sm:$0xff]   ;;  %v2196_v14 = vld [vmem:[%s2334_s7 + $0x190] ss:$20 sps:$4 sm:$0xff]   ;;  %v2197_v15 = vld [vmem:[%s2334_s7 + $0xf8] ss:$20 sps:$4 sm:$0xff]  }
  0x21   : > { %1785 = vmatprep.subr.bf16.mxu0 %v2110_v16  ;;  %2062 = vmatprep.subr.bf16.mxu1 %v2110_v16  ;;  %v2198_v16 = vld [vmem:[%s2334_s7 + $0x1bc] ss:$20 sps:$4 sm:$0xff]  }
  0x24   : > { %1786 = vmatpush3.bf16.msra.mxu0 %v2111_v17  ;;  %2070 = vmatpush3.bf16.msra.mxu1 %v2111_v17  ;;  %v2200_v17 = vld [vmem:[%s2334_s7 + $0x124] ss:$20 sps:$4 sm:$0xff]  }
  0x25   : > { %1883 = vmatprep.subr.bf16.mxu1 %v2118_v18  ;;  %2015 = vmatprep.subr.bf16.mxu0 %v2121_v19  ;;  %v2202_v18 = vld [vmem:[%s2334_s7 + $0x1b8] ss:$20 sps:$4 sm:$0xff]  }
  0x27   : > { %1054 = vmatmul.mubr.bf16.vlgmr.msra.gmra.mrb[0].mxu0 %v2112_v20  ;;  %1150 = vmatmul.mubr.bf16.vlgmr.msra.gmra.mrb[0].mxu1 %v2115_v21  ;;  %v2204_v20 = vld [vmem:[%s2334_s7 + $0x14c] ss:$20 sps:$4 sm:$0xff]   ;;  %v2206_v21 = vld [vmem:[%s2334_s7 + $0x10] ss:$20 sps:$4 sm:$0xff]  }
  0x28   : > { %1884 = vmatpush3.bf16.msra.mxu1 %v2119_v22  ;;  %2016 = vmatpush3.bf16.msra.mxu0 %v2121_v19  ;;  %v2203_v19 = vld [vmem:[%s2334_s7 + $0x120] ss:$20 sps:$4 sm:$0xff]   ;;  %v2207_v22 = vld [vmem:[%s2334_s7 + $0x148] ss:$20 sps:$4 sm:$0xff]  }
  0x29   : > { %1885 = vmatprep.subr.bf16.mxu1 %v2120_v23  ;;  %1061 = vmatprep.mubr.bf16.mxu0 %v2123_v24  ;;  %v2208_v23 = vld [vmem:[%s2334_s7 + $0x38] ss:$20 sps:$4 sm:$0xff]   ;;  %v2209_v24 = vld [vmem:[%s2334_s7 + $0x174] ss:$20 sps:$4 sm:$0xff]  }
  0x2a   : > { %1157 = vmatprep.mubr.bf16.mxu1 %v2125_v25  ;;  %2017 = vmatprep.subr.bf16.mxu0 %v2152_v35  ;;  %v2211_v25 = vld [vmem:[%s2334_s7 + $0x60] ss:$20 sps:$4 sm:$0xff]  }
  0x2c   : > { %1886 = vmatpush3.bf16.msra.mxu1 %v2122_v26  ;;  %2018 = vmatpush3.bf16.msra.mxu0 %v2152_v35  ;;  %v2212_v26 = vld [vmem:[%s2334_s7 + $0x170] ss:$20 sps:$4 sm:$0xff]   ;;  %v2223_v35 = vld [vmem:[%s2334_s7 + $0x128] ss:$20 sps:$4 sm:$0xff]  }
  0x2d   : > { %1887 = vmatprep.subr.bf16.mxu1 %v2129_v28  ;;  %2019 = vmatprep.subr.bf16.mxu0 %v2172_v47  ;;  %v2214_v28 = vld [vmem:[%s2334_s7 + $0x19c] ss:$20 sps:$4 sm:$0xff]  }
  0x2f   : > { %1062 = vmatmul.mubr.bf16.gmra.mrb[4].mxu0 %v2127_v27  ;;  %1158 = vmatmul.mubr.bf16.gmra.mrb[4].mxu1 %v2128_v29  ;;  %v2213_v27 = vld [vmem:[%s2334_s7 + $0x88] ss:$20 sps:$4 sm:$0xff]   ;;  %v2216_v29 = vld [vmem:[%s2334_s7 + $0xb0] ss:$20 sps:$4 sm:$0xff]  }
  0x30   : > { %1888 = vmatpush3.bf16.msra.mxu1 %v2130_v30  ;;  %1069 = vmatprep.mubr.bf16.mxu0 %v2133_v32  ;;  %v2217_v30 = vld [vmem:[%s2334_s7 + $0x198] ss:$20 sps:$4 sm:$0xff]  }
  0x31   : > { %1889 = vmatprep.subr.bf16.mxu1 %v2131_v31  ;;  %1165 = vmatprep.mubr.bf16.mxu1 %v2135_v33  ;;  %v2218_v31 = vld [vmem:[%s2334_s7 + $0xd8] ss:$20 sps:$4 sm:$0xff]   ;;  %v2221_v33 = vld [vmem:[%s2334_s7 + $0x100] ss:$20 sps:$4 sm:$0xff]  }
  0x32   : > { %2020 = vmatpush3.bf16.msra.mxu0 %v2172_v47  ;;  %v2219_v32 = vld [vmem:[%s2334_s7 + $0x1c4] ss:$20 sps:$4 sm:$0xff]  }
  0x33   : > { %2021 = vmatprep.subr.bf16.mxu0 %v2191_v56  ;;  %v2238_v47 = vld [vmem:[%s2334_s7 + $0x218] ss:$20 sps:$4 sm:$0xff]  }
  0x34   : > { %1890 = vmatpush3.bf16.msra.mxu1 %v2132_v34  ;;  %v2222_v34 = vld [vmem:[%s2334_s7 + $0x1c0] ss:$20 sps:$4 sm:$0xff]  }
  0x35   : > { %1891 = vmatprep.subr.bf16.mxu1 %v2139_v37  ;;  %v2226_v37 = vld [vmem:[%s2334_s7 + $0x150] ss:$20 sps:$4 sm:$0xff]  }
  0x36   : > { %2022 = vmatpush3.bf16.msra.mxu0 %v2191_v56 }
  0x37   : > { %1070 = vmatmul.mubr.bf16.gmra.mrb[8].mxu0 %v2137_v36  ;;  %1166 = vmatmul.mubr.bf16.gmra.mrb[8].mxu1 %v2138_v38  ;;  %v2224_v36 = vld [vmem:[%s2334_s7 + $0x1ec] ss:$20 sps:$4 sm:$0xff]   ;;  %v2227_v38 = vld [vmem:[%s2334_s7 + $0x1e8] ss:$20 sps:$4 sm:$0xff]  }
  0x38   : > { %1892 = vmatpush3.bf16.msra.mxu1 %v2140_v39  ;;  %1077 = vmatprep.mubr.bf16.mxu0 %v2143_v41  ;;  %v2228_v39 = vld [vmem:[%s2334_s7 + $0x178] ss:$20 sps:$4 sm:$0xff]   ;;  %v2231_v41 = vld [vmem:[%s2334_s7 + $0x1a0] ss:$20 sps:$4 sm:$0xff]  }
  0x39   : > { %1893 = vmatprep.subr.bf16.mxu1 %v2141_v40  ;;  %1173 = vmatprep.mubr.bf16.mxu1 %v2145_v42  ;;  %v2229_v40 = vld [vmem:[%s2334_s7 + $0x214] ss:$20 sps:$4 sm:$0xff]   ;;  %v2232_v42 = vld [vmem:[%s2334_s7 + $0x210] ss:$20 sps:$4 sm:$0xff]  }
  0x3c   : > { %1894 = vmatpush3.bf16.msra.mxu1 %v2142_v43  ;;  %v2233_v43 = vld [vmem:[%s2334_s7 + $0x1c8] ss:$20 sps:$4 sm:$0xff]  }
  0x3d   : > { %1895 = vmatprep.subr.bf16.mxu1 %v2149_v46  ;;  %v2237_v46 = vld [vmem:[%s2334_s7 + $0x238] ss:$20 sps:$4 sm:$0xff]  }
  0x3f   : > { %1078 = vmatmul.mubr.bf16.gmra.mrb[12].mxu0 %v2147_v44  ;;  %1174 = vmatmul.mubr.bf16.gmra.mrb[12].mxu1 %v2148_v45  ;;  %v2234_v44 = vld [vmem:[%s2334_s7 + $0x23c] ss:$20 sps:$4 sm:$0xff]  }
  0x40   : > { %1896 = vmatpush3.bf16.msra.mxu1 %v2150_v48  ;;  %1085 = vmatprep.mubr.bf16.mxu0 %v2154_v50  ;;  %v2236_v45 = vld [vmem:[%s2334_s7 + $0x1f0] ss:$20 sps:$4 sm:$0xff]   ;;  %v2242_v50 = vld [vmem:[%s2334_s7 + $0x260] ss:$20 sps:$4 sm:$0xff]  }
  0x41   : > { %1897 = vmatprep.subr.bf16.mxu1 %v2151_v49  ;;  %1214 = vmatprep.mubr.bf16.mxu1 %v2158_v51  ;;  %v2239_v48 = vld [vmem:[%s2334_s7 + $0x264] ss:$20 sps:$4 sm:$0xff]   ;;  %v2241_v49 = vld [vmem:[%s2334_s7 + $0x240] ss:$20 sps:$4 sm:$0xff]   ;;  %v2243_v51 = vld [vmem:[%s2334_s7 + $0x268] ss:$20 sps:$4 sm:$0xff]  }
  0x42   : > { %s1636_s7 = sshll.u32 %s2702_s15, 3 }
  0x43   : > { %s2581_s22 = scalar_lea.vmem %s2696_s2, %s1636_s7 }
  0x44   : > { %1898 = vmatpush3.bf16.msra.mxu1 %v2153_v52 }
  0x47   : > { %1086 = vmatmul.mubr.bf16.gmra.mrb[16].mxu0 %v2159_v54  ;;  %1215 = vmatmul.mubr.bf16.vlgmr.msra.gmra.mrb[16].mxu1 %v2156_v53 }
  0x48   : > { %1093 = vmatprep.mubr.bf16.mxu0 %v2160_v55  ;;  %1222 = vmatprep.mubr.bf16.mxu1 %v2162_v57 }
  0x4f   : > { %1094 = vmatmul.mubr.bf16.gmra.mrb[20].mxu0 %v2164_v58  ;;  %1223 = vmatmul.mubr.bf16.gmra.mrb[20].mxu1 %v2165_v59 }
  0x50   : > { %1101 = vmatprep.mubr.bf16.mxu0 %v2166_v60  ;;  %1230 = vmatprep.mubr.bf16.mxu1 %v2168_v61 }
  0x57   : > { %1102 = vmatmul.mubr.bf16.gmra.mrb[24].mxu0 %v2170_v62  ;;  %1231 = vmatmul.mubr.bf16.gmra.mrb[24].mxu1 %v2171_v63 }
  0x58   : > { %1109 = vmatprep.mubr.bf16.mxu0 %v2173_v0  ;;  %1238 = vmatprep.mubr.bf16.mxu1 %v2175_v1 }
  0x5f   : > { %1110 = vmatmul.mubr.bf16.gmra.mrb[28].mxu0 %v2177_v2  ;;  %1239 = vmatmul.mubr.bf16.gmra.mrb[28].mxu1 %v2178_v3 }
  0x60   : > { %1117 = vmatprep.mubr.bf16.mxu0 %v2179_v4  ;;  %1246 = vmatprep.mubr.bf16.mxu1 %v2181_v5 }
  0x67   : > { %1118 = vmatmul.mubr.bf16.gmra.mrb[32].mxu0 %v2183_v6  ;;  %1247 = vmatmul.mubr.bf16.gmra.mrb[32].mxu1 %v2184_v7 }
  0x68   : > { %1125 = vmatprep.mubr.bf16.mxu0 %v2185_v8  ;;  %1254 = vmatprep.mubr.bf16.mxu1 %v2187_v9 }
  0x6f   : > { %1126 = vmatmul.mubr.bf16.gmra.mrb[36].mxu0 %v2189_v10  ;;  %1255 = vmatmul.mubr.bf16.gmra.mrb[36].mxu1 %v2190_v11 }
  0x70   : > { %1133 = vmatprep.mubr.bf16.mxu0 %v2192_v12  ;;  %1262 = vmatprep.mubr.bf16.mxu1 %v2194_v13 }
  0x77   : > { %1134 = vmatmul.mubr.bf16.gmra.mrb[40].mxu0 %v2196_v14  ;;  %1263 = vmatmul.mubr.bf16.gmra.mrb[40].mxu1 %v2197_v15 }
  0x78   : > { %1141 = vmatprep.mubr.bf16.mxu0 %v2198_v16  ;;  %1270 = vmatprep.mubr.bf16.mxu1 %v2200_v17 }
  0x7f   : > { %1142 = vmatmul.mubr.bf16.gmra.mrb[44].mxu0 %v2202_v18  ;;  %1271 = vmatmul.mubr.bf16.gmra.mrb[44].mxu1 %v2203_v19 }
  0x80   : > { %1278 = vmatprep.mubr.bf16.mxu1 %v2204_v20  ;;  %2023 = vmatprep.mubr.msk.bf16.mxu0 %vm972_vm0, %v2206_v21 }
  0x87   : > { %1279 = vmatmul.mubr.bf16.gmra.mrb[48].mxu1 %v2207_v22  ;;  %2024 = vmatmul.mubr.msk.bf16.vlgmr.msra.gmra.mrb[48].mxu0 %vm972_vm0, %v2208_v23 }
  0x88   : > { %1286 = vmatprep.mubr.bf16.mxu1 %v2209_v24  ;;  %2027 = vmatprep.mubr.msk.bf16.mxu0 %vm972_vm0, %v2211_v25 }
  0x8f   : > { %1287 = vmatmul.mubr.bf16.gmra.mrb[52].mxu1 %v2212_v26  ;;  %2028 = vmatmul.mubr.msk.bf16.gmra.mrb[52].mxu0 %vm972_vm0, %v2213_v27 }
  0x90   : > { %1294 = vmatprep.mubr.bf16.mxu1 %v2214_v28  ;;  %2031 = vmatprep.mubr.msk.bf16.mxu0 %vm972_vm0, %v2216_v29 }
  0x97   : > { %1295 = vmatmul.mubr.bf16.gmra.mrb[56].mxu1 %v2217_v30  ;;  %2032 = vmatmul.mubr.msk.bf16.gmra.mrb[56].mxu0 %vm972_vm0, %v2218_v31 }
  0x98   : > { %1302 = vmatprep.mubr.bf16.mxu1 %v2219_v32  ;;  %2035 = vmatprep.mubr.msk.bf16.mxu0 %vm972_vm0, %v2221_v33 }
  0x9f   : > { %1303 = vmatmul.mubr.bf16.gmra.mrb[60].mxu1 %v2222_v34  ;;  %2036 = vmatmul.mubr.msk.bf16.gmra.mrb[60].mxu0 %vm972_vm0, %v2223_v35 }
  0xa0   : > { %1310 = vmatprep.mubr.bf16.mxu1 %v2224_v36  ;;  %2039 = vmatprep.mubr.msk.bf16.mxu0 %vm972_vm0, %v2226_v37 }
  0xa7   : > { %1311 = vmatmul.mubr.bf16.gmra.mrb[64].mxu1 %v2227_v38  ;;  %2040 = vmatmul.mubr.msk.bf16.gmra.mrb[64].mxu0 %vm972_vm0, %v2228_v39 }
  0xa8   : > { %1318 = vmatprep.mubr.bf16.mxu1 %v2229_v40  ;;  %2043 = vmatprep.mubr.msk.bf16.mxu0 %vm972_vm0, %v2231_v41 }
  0xaf   : > { %1319 = vmatmul.mubr.bf16.gmra.mrb[68].mxu1 %v2232_v42  ;;  %2044 = vmatmul.mubr.msk.bf16.gmra.mrb[68].mxu0 %vm972_vm0, %v2233_v43 }
  0xb0   : > { %1326 = vmatprep.mubr.bf16.mxu1 %v2234_v44  ;;  %2047 = vmatprep.mubr.msk.bf16.mxu0 %vm972_vm0, %v2236_v45 }
  0xb7   : > { %1327 = vmatmul.mubr.bf16.gmra.mrb[72].mxu1 %v2237_v46  ;;  %2048 = vmatmul.mubr.msk.bf16.gmra.mrb[72].mxu0 %vm972_vm0, %v2238_v47 }
  0xb8   : > { %1334 = vmatprep.mubr.bf16.mxu1 %v2239_v48  ;;  %2051 = vmatprep.mubr.msk.bf16.mxu0 %vm972_vm0, %v2241_v49 }
  0xbf   : > { %1335 = vmatmul.mubr.bf16.gmra.mrb[76].mxu1 %v2242_v50  ;;  %2052 = vmatmul.mubr.msk.bf16.gmra.mrb[76].mxu0 %vm972_vm0, %v2243_v51 }
  0xfa   : > { %v1859_v52 = vpop.f32.mrb[0].mxu1  ;;  %v1787_v53 = vpop.f32.mrb[0].mxu0 }
  0xfb   : > { %v1860_v54 = vpop.f32.mrb[1].mxu1  ;;  %v1788_v55 = vpop.f32.mrb[1].mxu0 }
  0xfc   : > { %v2513_v56 = vadd.f32 %v1860_v54, %v1859_v52  ;;  %v1862_v57 = vpop.f32.mrb[2].mxu1  ;;  %v1789_v58 = vadd.f32 %v1788_v55, %v1787_v53  ;;  %v1790_v59 = vpop.f32.mrb[2].mxu0 }
  0xfd   : > { %v1863_v60 = vpop.f32.mrb[3].mxu1  ;;  %v1791_v61 = vpop.f32.mrb[3].mxu0 }
  0xfe   : > { %v2515_v62 = vadd.f32 %v1863_v60, %v1862_v57  ;;  %v1792_v63 = vadd.f32 %v1791_v61, %v1790_v59 }
 0x102   : > { %v1865_v0 = vpop.f32.mrb[4].mxu1  ;;  %v1793_v1 = vpop.f32.mrb[4].mxu0 }
 0x103   : > { %v1866_v2 = vpop.f32.mrb[5].mxu1  ;;  %v1794_v3 = vpop.f32.mrb[5].mxu0 }
 0x104   : > { %v2517_v4 = vadd.f32 %v1866_v2, %v1865_v0  ;;  %v1868_v5 = vpop.f32.mrb[6].mxu1  ;;  %v1795_v6 = vadd.f32 %v1794_v3, %v1793_v1  ;;  %v1796_v7 = vpop.f32.mrb[6].mxu0 }
 0x105   : > { %v1869_v8 = vpop.f32.mrb[7].mxu1  ;;  %v1797_v9 = vpop.f32.mrb[7].mxu0 }
 0x106   : > { %v2519_v10 = vadd.f32 %v1869_v8, %v1868_v5  ;;  %v1798_v11 = vadd.f32 %v1797_v9, %v1796_v7 }
 0x10a   : > { %v1871_v12 = vpop.f32.mrb[8].mxu1  ;;  %v1799_v13 = vpop.f32.mrb[8].mxu0 }
 0x10b   : > { %v1872_v14 = vpop.f32.mrb[9].mxu1  ;;  %v1800_v15 = vpop.f32.mrb[9].mxu0 }
 0x10c   : > { %v2521_v16 = vadd.f32 %v1872_v14, %v1871_v12  ;;  %v1874_v17 = vpop.f32.mrb[10].mxu1  ;;  %v1801_v18 = vadd.f32 %v1800_v15, %v1799_v13  ;;  %v1802_v19 = vpop.f32.mrb[10].mxu0 }
 0x10d   : > { %v1875_v20 = vpop.f32.mrb[11].mxu1  ;;  %v1803_v21 = vpop.f32.mrb[11].mxu0 }
 0x10e   : > { %v2523_v22 = vadd.f32 %v1875_v20, %v1874_v17  ;;  %v1804_v23 = vadd.f32 %v1803_v21, %v1802_v19 }
 0x112   : > { %v1877_v24 = vpop.f32.mrb[12].mxu1  ;;  %v1805_v25 = vpop.f32.mrb[12].mxu0 }
 0x113   : > { %v1878_v26 = vpop.f32.mrb[13].mxu1  ;;  %v1806_v27 = vpop.f32.mrb[13].mxu0 }
 0x114   : > { %v2525_v28 = vadd.f32 %v1878_v26, %v1877_v24  ;;  %v1880_v29 = vpop.f32.mrb[14].mxu1  ;;  %v1807_v30 = vadd.f32 %v1806_v27, %v1805_v25  ;;  %v1808_v31 = vpop.f32.mrb[14].mxu0 }
 0x115   : > { %v1881_v32 = vpop.f32.mrb[15].mxu1  ;;  %v1809_v33 = vpop.f32.mrb[15].mxu0 }
 0x116   : > { %v2527_v34 = vadd.f32 %v1881_v32, %v1880_v29  ;;  %v1810_v35 = vadd.f32 %v1809_v33, %v1808_v31 }
 0x11a   : > { %v1899_v36 = vpop.f32.mrb[16].mxu1  ;;  %v1811_v37 = vpop.f32.mrb[16].mxu0 }
 0x11b   : > { %v1900_v38 = vpop.f32.mrb[17].mxu1  ;;  %v1812_v39 = vpop.f32.mrb[17].mxu0 }
 0x11c   : > { %v1901_v40 = vadd.f32 %v1900_v38, %v1899_v36  ;;  %v1902_v41 = vpop.f32.mrb[18].mxu1  ;;  %v1813_v42 = vadd.f32 %v1812_v39, %v1811_v37  ;;  %v1814_v43 = vpop.f32.mrb[18].mxu0 }
 0x11d   : > { %v1903_v44 = vpop.f32.mrb[19].mxu1  ;;  %v1815_v45 = vpop.f32.mrb[19].mxu0 }
 0x11e   : > { %v1904_v46 = vadd.f32 %v1903_v44, %v1902_v41  ;;  %v1816_v47 = vadd.f32 %v1815_v45, %v1814_v43  ;;  %v2529_v48 = vadd.f32 %v1901_v40, %v1789_v58 }
 0x120   : > { %v2531_v49 = vadd.f32 %v1904_v46, %v1792_v63 }
 0x122   : > { %v1905_v50 = vpop.f32.mrb[20].mxu1  ;;  %v1817_v51 = vpop.f32.mrb[20].mxu0 }
 0x123   : > { %v1906_v52 = vpop.f32.mrb[21].mxu1  ;;  %v1818_v53 = vpop.f32.mrb[21].mxu0 }
 0x124   : > { %v1907_v54 = vadd.f32 %v1906_v52, %v1905_v50  ;;  %v1908_v55 = vpop.f32.mrb[22].mxu1  ;;  %v1819_v57 = vadd.f32 %v1818_v53, %v1817_v51  ;;  %v1820_v59 = vpop.f32.mrb[22].mxu0 }
 0x125   : > { %v1909_v60 = vpop.f32.mrb[23].mxu1  ;;  %v1821_v61 = vpop.f32.mrb[23].mxu0 }
 0x126   : > { %v1910_v0 = vadd.f32 %v1909_v60, %v1908_v55  ;;  %v1822_v1 = vadd.f32 %v1821_v61, %v1820_v59  ;;  %v2533_v2 = vadd.f32 %v1907_v54, %v1795_v6 }
 0x128   : > { %v2535_v3 = vadd.f32 %v1910_v0, %v1798_v11 }
 0x12a   : > { %v1911_v58 = vpop.f32.mrb[24].mxu1  ;;  %v1823_v5 = vpop.f32.mrb[24].mxu0 }
 0x12b   : > { %v1912_v63 = vpop.f32.mrb[25].mxu1  ;;  %v1824_v7 = vpop.f32.mrb[25].mxu0 }
 0x12c   : > { %v1913_v8 = vadd.f32 %v1912_v63, %v1911_v58  ;;  %v1914_v9 = vpop.f32.mrb[26].mxu1  ;;  %v1825_v12 = vadd.f32 %v1824_v7, %v1823_v5  ;;  %v1826_v13 = vpop.f32.mrb[26].mxu0 }
 0x12d   : > { %v1915_v14 = vpop.f32.mrb[27].mxu1  ;;  %v1827_v15 = vpop.f32.mrb[27].mxu0 }
 0x12e   : > { %v1916_v17 = vadd.f32 %v1915_v14, %v1914_v9  ;;  %v1828_v19 = vadd.f32 %v1827_v15, %v1826_v13  ;;  %v2537_v20 = vadd.f32 %v1913_v8, %v1801_v18 }
 0x130   : > { %v2539_v21 = vadd.f32 %v1916_v17, %v1804_v23 }
 0x132   : > { %v1917_v6 = vpop.f32.mrb[28].mxu1  ;;  %v1829_v24 = vpop.f32.mrb[28].mxu0 }
 0x133   : > { %v1918_v11 = vpop.f32.mrb[29].mxu1  ;;  %v1830_v25 = vpop.f32.mrb[29].mxu0 }
 0x134   : > { %v1919_v26 = vadd.f32 %v1918_v11, %v1917_v6  ;;  %v1920_v27 = vpop.f32.mrb[30].mxu1  ;;  %v1831_v29 = vadd.f32 %v1830_v25, %v1829_v24  ;;  %v1832_v31 = vpop.f32.mrb[30].mxu0 }
 0x135   : > { %v1921_v32 = vpop.f32.mrb[31].mxu1  ;;  %v1833_v33 = vpop.f32.mrb[31].mxu0 }
 0x136   : > { %v1922_v36 = vadd.f32 %v1921_v32, %v1920_v27  ;;  %v1834_v37 = vadd.f32 %v1833_v33, %v1832_v31  ;;  %v2541_v38 = vadd.f32 %v1919_v26, %v1807_v30 }
 0x138   : > { %v2543_v39 = vadd.f32 %v1922_v36, %v1810_v35 }
 0x13a   : > { %v1923_v18 = vpop.f32.mrb[32].mxu1  ;;  %v1835_v40 = vpop.f32.mrb[32].mxu0 }
 0x13b   : > { %v1924_v23 = vpop.f32.mrb[33].mxu1  ;;  %v1836_v41 = vpop.f32.mrb[33].mxu0 }
 0x13c   : > { %v1925_v43 = vadd.f32 %v1924_v23, %v1923_v18  ;;  %v1926_v44 = vpop.f32.mrb[34].mxu1  ;;  %v2545_v45 = vadd.f32 %v1836_v41, %v1835_v40  ;;  %v1838_v46 = vpop.f32.mrb[34].mxu0 }
 0x13d   : > { %v1927_v50 = vpop.f32.mrb[35].mxu1  ;;  %v1839_v51 = vpop.f32.mrb[35].mxu0 }
 0x13e   : > { %v1928_v52 = vadd.f32 %v1927_v50, %v1926_v44  ;;  %v2547_v53 = vadd.f32 %v1839_v51, %v1838_v46  ;;  %v2549_v54 = vadd.f32 %v1925_v43, %v1813_v42 }
 0x140   : > { %v2551_v30 = vadd.f32 %v1928_v52, %v1816_v47 }
 0x142   : > { %v1929_v35 = vpop.f32.mrb[36].mxu1  ;;  %v1841_v55 = vpop.f32.mrb[36].mxu0 }
 0x143   : > { %v1930_v59 = vpop.f32.mrb[37].mxu1  ;;  %v1842_v60 = vpop.f32.mrb[37].mxu0 }
 0x144   : > { %v1931_v61 = vadd.f32 %v1930_v59, %v1929_v35  ;;  %v1932_v0 = vpop.f32.mrb[38].mxu1  ;;  %v2553_v58 = vadd.f32 %v1842_v60, %v1841_v55  ;;  %v1844_v5 = vpop.f32.mrb[38].mxu0 }
 0x145   : > { %v1933_v63 = vpop.f32.mrb[39].mxu1  ;;  %v1845_v7 = vpop.f32.mrb[39].mxu0 }
 0x146   : > { %v1934_v8 = vadd.f32 %v1933_v63, %v1932_v0  ;;  %v2555_v9 = vadd.f32 %v1845_v7, %v1844_v5  ;;  %v2557_v13 = vadd.f32 %v1931_v61, %v1819_v57 }
 0x148   : > { %v2559_v42 = vadd.f32 %v1934_v8, %v1822_v1 }
 0x14a   : > { %v1935_v47 = vpop.f32.mrb[40].mxu1  ;;  %v1847_v14 = vpop.f32.mrb[40].mxu0 }
 0x14b   : > { %v1936_v15 = vpop.f32.mrb[41].mxu1  ;;  %v1848_v17 = vpop.f32.mrb[41].mxu0 }
 0x14c   : > { %v1937_v6 = vadd.f32 %v1936_v15, %v1935_v47  ;;  %v1938_v24 = vpop.f32.mrb[42].mxu1  ;;  %v2561_v11 = vadd.f32 %v1848_v17, %v1847_v14  ;;  %v1850_v25 = vpop.f32.mrb[42].mxu0 }
 0x14d   : > { %v1939_v26 = vpop.f32.mrb[43].mxu1  ;;  %v1851_v27 = vpop.f32.mrb[43].mxu0 }
 0x14e   : > { %v1940_v31 = vadd.f32 %v1939_v26, %v1938_v24  ;;  %v2563_v32 = vadd.f32 %v1851_v27, %v1850_v25  ;;  %v2565_v33 = vadd.f32 %v1937_v6, %v1825_v12 }
 0x150   : > { %v2567_v57 = vadd.f32 %v1940_v31, %v1828_v19 }
 0x152   : > { %v1941_v1 = vpop.f32.mrb[44].mxu1  ;;  %v1853_v36 = vpop.f32.mrb[44].mxu0 }
 0x153   : > { %v1942_v18 = vpop.f32.mrb[45].mxu1  ;;  %v1854_v40 = vpop.f32.mrb[45].mxu0 }
 0x154   : > { %v1943_v23 = vadd.f32 %v1942_v18, %v1941_v1  ;;  %v1944_v41 = vpop.f32.mrb[46].mxu1  ;;  %v2569_v43 = vadd.f32 %v1854_v40, %v1853_v36  ;;  %v1856_v44 = vpop.f32.mrb[46].mxu0 }
 0x155   : > { %v1945_v46 = vpop.f32.mrb[47].mxu1  ;;  %v1857_v50 = vpop.f32.mrb[47].mxu0 }
 0x156   : > { %v1946_v51 = vadd.f32 %v1945_v46, %v1944_v41  ;;  %v2571_v52 = vadd.f32 %v1857_v50, %v1856_v44  ;;  %v2573_v35 = vadd.f32 %v1943_v23, %v1831_v29 }
 0x158   : > { %v2576_v12 = vadd.f32 %v1946_v51, %v1834_v37 }
 0x15a   : > { %v1947_v19 = vpop.f32.mrb[48].mxu1  ;;  %v2025_v55 = vpop.f32.mrb[48].mxu0 }
 0x15b   : > { %v1386_v59 = vadd.f32 %v2025_v55, %v2533_v2  ;;  %v1948_v60 = vpop.f32.mrb[49].mxu1  ;;  %v1377_v29 = vpop.f32.mrb[49].mxu0 }
 0x15c   : > { %v1949_v61 = vadd.f32 %v1948_v60, %v1947_v19  ;;  %v1378_v37 = vadd.f32 %v1377_v29, %v2529_v48  ;;  %v1950_v0 = vpop.f32.mrb[50].mxu1  ;;  %v2026_v5 = vpop.f32.mrb[50].mxu0 }
 0x15d   : > { %1507 = vst.msk [vmem:[%s2581_s22 + $0x10] sm:$0xff] %vm1504_vm1, %v1386_v59  ;;  %v1389_v63 = vadd.f32 %v2026_v5, %v2535_v3  ;;  %v1951_v7 = vpop.f32.mrb[51].mxu1  ;;  %v1380_v8 = vpop.f32.mrb[51].mxu0 }
 0x15e   : > { %1505 = vst.msk [vmem:[%s2581_s22] sm:$0xff] %vm1504_vm1, %v1378_v37  ;;  %v1952_v47 = vadd.f32 %v1951_v7, %v1950_v0  ;;  %v1381_v2 = vadd.f32 %v1380_v8, %v2531_v49  ;;  %v2592_v14 = vadd.f32 %v1949_v61, %v2545_v45 }
 0x15f   : > { %1508 = vst.msk [vmem:[%s2581_s22 + $0x18] sm:$0xff] %vm1504_vm1, %v1389_v63 }
 0x160   : > { %1506 = vst.msk [vmem:[%s2581_s22 + $0x8] sm:$0xff] %vm1504_vm1, %v1381_v2  ;;  %v2599_v48 = vadd.f32 %v1952_v47, %v2547_v53 }
 0x162   : > { %v1953_v3 = vpop.f32.mrb[52].mxu1  ;;  %v2029_v15 = vpop.f32.mrb[52].mxu0 }
 0x163   : > { %v1402_v17 = vadd.f32 %v2029_v15, %v2541_v38  ;;  %v1954_v6 = vpop.f32.mrb[53].mxu1  ;;  %v1393_v24 = vpop.f32.mrb[53].mxu0 }
 0x164   : > { %v1955_v49 = vadd.f32 %v1954_v6, %v1953_v3  ;;  %v1394_v45 = vadd.f32 %v1393_v24, %v2537_v20  ;;  %v1956_v25 = vpop.f32.mrb[54].mxu1  ;;  %v2030_v26 = vpop.f32.mrb[54].mxu0 }
 0x165   : > { %1511 = vst.msk [vmem:[%s2581_s22 + $0x30] sm:$0xff] %vm1504_vm1, %v1402_v17  ;;  %v1405_v27 = vadd.f32 %v2030_v26, %v2543_v39  ;;  %v1957_v31 = vpop.f32.mrb[55].mxu1  ;;  %v1396_v53 = vpop.f32.mrb[55].mxu0 }
 0x166   : > { %1509 = vst.msk [vmem:[%s2581_s22 + $0x20] sm:$0xff] %vm1504_vm1, %v1394_v45  ;;  %v1958_v1 = vadd.f32 %v1957_v31, %v1956_v25  ;;  %v1397_v38 = vadd.f32 %v1396_v53, %v2539_v21  ;;  %v1289_v36 = vadd.f32 %v1955_v49, %v2553_v58 }
 0x167   : > { %1512 = vst.msk [vmem:[%s2581_s22 + $0x38] sm:$0xff] %vm1504_vm1, %v1405_v27 }
 0x168   : > { %1510 = vst.msk [vmem:[%s2581_s22 + $0x28] sm:$0xff] %vm1504_vm1, %v1397_v38  ;;  %v1292_v20 = vadd.f32 %v1958_v1, %v2555_v9 }
 0x16a   : > { %v1959_v18 = vpop.f32.mrb[56].mxu1  ;;  %v2033_v40 = vpop.f32.mrb[56].mxu0 }
 0x16b   : > { %v1418_v39 = vadd.f32 %v2033_v40, %v2557_v13  ;;  %v1960_v23 = vpop.f32.mrb[57].mxu1  ;;  %v1409_v41 = vpop.f32.mrb[57].mxu0 }
 0x16c   : > { %v1961_v44 = vadd.f32 %v1960_v23, %v1959_v18  ;;  %v1410_v21 = vadd.f32 %v1409_v41, %v2549_v54  ;;  %v1962_v46 = vpop.f32.mrb[58].mxu1  ;;  %v2034_v58 = vpop.f32.mrb[58].mxu0 }
 0x16d   : > { %1515 = vst.msk [vmem:[%s2581_s22 + $0x50] sm:$0xff] %vm1504_vm1, %v1418_v39  ;;  %v1421_v50 = vadd.f32 %v2034_v58, %v2559_v42  ;;  %v1963_v51 = vpop.f32.mrb[59].mxu1  ;;  %v1412_v19 = vpop.f32.mrb[59].mxu0 }
 0x16e   : > { %1513 = vst.msk [vmem:[%s2581_s22 + $0x40] sm:$0xff] %vm1504_vm1, %v1410_v21  ;;  %v1964_v9 = vadd.f32 %v1963_v51, %v1962_v46  ;;  %v1413_v13 = vadd.f32 %v1412_v19, %v2551_v30  ;;  %v1297_v55 = vadd.f32 %v1961_v44, %v2561_v11 }
 0x16f   : > { %1516 = vst.msk [vmem:[%s2581_s22 + $0x58] sm:$0xff] %vm1504_vm1, %v1421_v50 }
 0x170   : > { %1514 = vst.msk [vmem:[%s2581_s22 + $0x48] sm:$0xff] %vm1504_vm1, %v1413_v13  ;;  %v1300_v54 = vadd.f32 %v1964_v9, %v2563_v32 }
 0x172   : > { %v1965_v59 = vpop.f32.mrb[60].mxu1  ;;  %v2037_v60 = vpop.f32.mrb[60].mxu0 }
 0x173   : > { %v1434_v42 = vadd.f32 %v2037_v60, %v2573_v35  ;;  %v1966_v29 = vpop.f32.mrb[61].mxu1  ;;  %v1425_v61 = vpop.f32.mrb[61].mxu0 }
 0x174   : > { %v1967_v37 = vadd.f32 %v1966_v29, %v1965_v59  ;;  %v1426_v30 = vadd.f32 %v1425_v61, %v2565_v33  ;;  %v1968_v0 = vpop.f32.mrb[62].mxu1  ;;  %v2038_v11 = vpop.f32.mrb[62].mxu0 }
 0x175   : > { %1519 = vst.msk [vmem:[%s2581_s22 + $0x70] sm:$0xff] %vm1504_vm1, %v1434_v42  ;;  %v1437_v5 = vadd.f32 %v2038_v11, %v2576_v12  ;;  %v1969_v63 = vpop.f32.mrb[63].mxu1  ;;  %v1428_v7 = vpop.f32.mrb[63].mxu0 }
 0x176   : > { %1517 = vst.msk [vmem:[%s2581_s22 + $0x60] sm:$0xff] %vm1504_vm1, %v1426_v30  ;;  %v1970_v32 = vadd.f32 %v1969_v63, %v1968_v0  ;;  %v1429_v35 = vadd.f32 %v1428_v7, %v2567_v57  ;;  %v1305_v8 = vadd.f32 %v1967_v37, %v2569_v43 }
 0x177   : > { %1520 = vst.msk [vmem:[%s2581_s22 + $0x78] sm:$0xff] %vm1504_vm1, %v1437_v5 }
 0x178   : > { %1518 = vst.msk [vmem:[%s2581_s22 + $0x68] sm:$0xff] %vm1504_vm1, %v1429_v35  ;;  %v1308_v33 = vadd.f32 %v1970_v32, %v2571_v52 }
 0x17a   : > { %v1971_v47 = vpop.f32.mrb[64].mxu1  ;;  %v2041_v2 = vpop.f32.mrb[64].mxu0 }
 0x17b   : > { %v1450_v12 = vadd.f32 %v2041_v2, %v1289_v36  ;;  %v1972_v3 = vpop.f32.mrb[65].mxu1  ;;  %v1441_v15 = vpop.f32.mrb[65].mxu0 }
 0x17c   : > { %v1973_v17 = vadd.f32 %v1972_v3, %v1971_v47  ;;  %v1442_v6 = vadd.f32 %v1441_v15, %v2592_v14  ;;  %v1974_v57 = vpop.f32.mrb[66].mxu1  ;;  %v2042_v24 = vpop.f32.mrb[66].mxu0 }
 0x17d   : > { %1523 = vst.msk [vmem:[%s2581_s22 + $0x90] sm:$0xff] %vm1504_vm1, %v1450_v12  ;;  %v1453_v43 = vadd.f32 %v2042_v24, %v1292_v20  ;;  %v1975_v49 = vpop.f32.mrb[67].mxu1  ;;  %v1444_v45 = vpop.f32.mrb[67].mxu0 }
 0x17e   : > { %1521 = vst.msk [vmem:[%s2581_s22 + $0x80] sm:$0xff] %vm1504_vm1, %v1442_v6  ;;  %v1976_v52 = vadd.f32 %v1975_v49, %v1974_v57  ;;  %v1445_v25 = vadd.f32 %v1444_v45, %v2599_v48  ;;  %v1313_v26 = vadd.f32 %v1973_v17, %v2513_v56 }
 0x17f   : > { %1524 = vst.msk [vmem:[%s2581_s22 + $0x98] sm:$0xff] %vm1504_vm1, %v1453_v43 }
 0x180   : > { %1522 = vst.msk [vmem:[%s2581_s22 + $0x88] sm:$0xff] %vm1504_vm1, %v1445_v25  ;;  %v1316_v14 = vadd.f32 %v1976_v52, %v2515_v62 }
 0x182   : > { %v1977_v27 = vpop.f32.mrb[68].mxu1  ;;  %v2045_v31 = vpop.f32.mrb[68].mxu0 }
 0x183   : > { %v1466_v53 = vadd.f32 %v2045_v31, %v1305_v8  ;;  %v1978_v1 = vpop.f32.mrb[69].mxu1  ;;  %v1457_v38 = vpop.f32.mrb[69].mxu0 }
 0x184   : > { %v1979_v36 = vadd.f32 %v1978_v1, %v1977_v27  ;;  %v1458_v20 = vadd.f32 %v1457_v38, %v1297_v55  ;;  %v1980_v18 = vpop.f32.mrb[70].mxu1  ;;  %v2046_v48 = vpop.f32.mrb[70].mxu0 }
 0x185   : > { %1527 = vst.msk [vmem:[%s2581_s22 + $0xb0] sm:$0xff] %vm1504_vm1, %v1466_v53  ;;  %v1469_v56 = vadd.f32 %v2046_v48, %v1308_v33  ;;  %v1981_v40 = vpop.f32.mrb[71].mxu1  ;;  %v1460_v39 = vpop.f32.mrb[71].mxu0 }
 0x186   : > { %1525 = vst.msk [vmem:[%s2581_s22 + $0xa0] sm:$0xff] %vm1504_vm1, %v1458_v20  ;;  %v1982_v62 = vadd.f32 %v1981_v40, %v1980_v18  ;;  %v1461_v23 = vadd.f32 %v1460_v39, %v1300_v54  ;;  %v1321_v41 = vadd.f32 %v1979_v36, %v2517_v4 }
 0x187   : > { %1528 = vst.msk [vmem:[%s2581_s22 + $0xb8] sm:$0xff] %vm1504_vm1, %v1469_v56 }
 0x188   : > { %1526 = vst.msk [vmem:[%s2581_s22 + $0xa8] sm:$0xff] %vm1504_vm1, %v1461_v23  ;;  %v1324_v44 = vadd.f32 %v1982_v62, %v2519_v10 }
 0x18a   : > { %v1983_v21 = vpop.f32.mrb[72].mxu1  ;;  %v2049_v46 = vpop.f32.mrb[72].mxu0 }
 0x18b   : > { %v1482_v58 = vadd.f32 %v2049_v46, %v1321_v41  ;;  %v1984_v50 = vpop.f32.mrb[73].mxu1  ;;  %v1473_v51 = vpop.f32.mrb[73].mxu0 }
 0x18c   : > { %v1985_v19 = vadd.f32 %v1984_v50, %v1983_v21  ;;  %v1474_v9 = vadd.f32 %v1473_v51, %v1313_v26  ;;  %v1986_v13 = vpop.f32.mrb[74].mxu1  ;;  %v2050_v55 = vpop.f32.mrb[74].mxu0 }
 0x18d   : > { %1531 = vst.msk [vmem:[%s2581_s22 + $0xd0] sm:$0xff] %vm1504_vm1, %v1482_v58  ;;  %v1485_v4 = vadd.f32 %v2050_v55, %v1324_v44  ;;  %v1987_v54 = vpop.f32.mrb[75].mxu1  ;;  %v1476_v59 = vpop.f32.mrb[75].mxu0 }
 0x18e   : > { %1529 = vst.msk [vmem:[%s2581_s22 + $0xc0] sm:$0xff] %vm1504_vm1, %v1474_v9  ;;  %v1988_v60 = vadd.f32 %v1987_v54, %v1986_v13  ;;  %v1477_v10 = vadd.f32 %v1476_v59, %v1316_v14  ;;  %v1329_v42 = vadd.f32 %v1985_v19, %v2521_v16 }
 0x18f   : > { %1532 = vst.msk [vmem:[%s2581_s22 + $0xd8] sm:$0xff] %vm1504_vm1, %v1485_v4 }
 0x190   : > { %1530 = vst.msk [vmem:[%s2581_s22 + $0xc8] sm:$0xff] %vm1504_vm1, %v1477_v10  ;;  %v1332_v29 = vadd.f32 %v1988_v60, %v2523_v22 }
 0x192   : > { %v1989_v61 = vpop.f32.mrb[76].mxu1  ;;  %v2053_v37 = vpop.f32.mrb[76].mxu0 }
 0x193   : > { %v1990_v30 = vpop.f32.mrb[77].mxu1  ;;  %v1489_v0 = vpop.f32.mrb[77].mxu0 }
 0x194   : > { %v1991_v11 = vadd.f32 %v1990_v30, %v1989_v61  ;;  %v1490_v5 = vadd.f32 %v1489_v0, %v1329_v42  ;;  %v1992_v63 = vpop.f32.mrb[78].mxu1  ;;  %v2054_v7 = vpop.f32.mrb[78].mxu0 }
 0x195   : > { %v1993_v32 = vpop.f32.mrb[79].mxu1  ;;  %v1492_v35 = vpop.f32.mrb[79].mxu0 }
 0x196   : > { %v1337_v16 = vadd.f32 %v1991_v11, %v2525_v28  ;;  %1533 = vst.msk [vmem:[%s2581_s22 + $0xe0] sm:$0xff] %vm1504_vm1, %v1490_v5  ;;  %v1994_v8 = vadd.f32 %v1993_v32, %v1992_v63  ;;  %v1493_v33 = vadd.f32 %v1492_v35, %v1332_v29 }
 0x198   : > { %v1498_v22 = vadd.f32 %v2053_v37, %v1337_v16  ;;  %v1340_v47 = vadd.f32 %v1994_v8, %v2527_v34  ;;  %1534 = vst.msk [vmem:[%s2581_s22 + $0xe8] sm:$0xff] %vm1504_vm1, %v1493_v33 }
 0x19a   : > { %1535 = vst.msk [vmem:[%s2581_s22 + $0xf0] sm:$0xff] %vm1504_vm1, %v1498_v22  ;;  %v1501_v2 = vadd.f32 %v2054_v7, %v1340_v47 }
 0x19c   : > { %1536 = vst.msk [vmem:[%s2581_s22 + $0xf8] sm:$0xff] %vm1504_vm1, %v1501_v2 }
 0x19d PF: > { %s12_s11 = sadd.s32 1, %s2266_s11   ;;  %s2697_s9 = smov %s2262_s10 }
 0x19e   : > { %p9_p5 = scmp.ge.s32.totalorder %s12_s11, 4   ;;  %s2698_s10 = smov %s2700_s12 }
 0x1a0   :  { %11 = sbr.rel (!%p9_p5) target bundleno = 2 (0x2), region = 61 }

</bundles_post_ra>
